<compile_context>
chip_gen: v7x
topology: tpu7x:2x2x1
jax: 0.10.0
libtpu: 0.0.40
codegen_flags: <defaults>
</compile_context>

<pallas_src>
import functools

import numpy as np

import jax
import jax.numpy as jnp
from jax.experimental import pallas as pl
from jax.experimental.pallas import tpu as pltpu


def _round_up(a, m):
    return (a + m - 1) // m * m


def _spatial_attention_kernel(x_ref, m_ref, w_ref, o_ref, *, K, H, W, C, c_chunk):
    # x_ref: (C, H*W)   lane-dense input block for one batch element
    # m_ref: (2*K, H*W) f32 border masks: rows [0,K) = column masks (per dw),
    #                   rows [K,2K) = row masks (per dh)
    # w_ref: (2*K*K,)   SMEM conv weight, flattened in (in_ch, kh, kw) order
    # o_ref: (C, H*W)
    HW = H * W
    pad = K // 2
    n_chunks = (C + c_chunk - 1) // c_chunk

    # ---- channel pooling (torch.mean / torch.max over dim=1), chunked over C ----
    cs0 = min(c_chunk, C)
    chunk0 = x_ref[pl.ds(0, cs0), :].astype(jnp.float32)
    ssum = jnp.sum(chunk0, axis=0, keepdims=True)               # (1, HW)
    smax = jnp.max(chunk0, axis=0, keepdims=True)               # (1, HW)
    for ci in range(1, n_chunks):
        c0 = ci * c_chunk
        cs = min(c_chunk, C - c0)
        chunk = x_ref[pl.ds(c0, cs), :].astype(jnp.float32)
        ssum = ssum + jnp.sum(chunk, axis=0, keepdims=True)
        smax = jnp.maximum(smax, jnp.max(chunk, axis=0, keepdims=True))
    avg = ssum * (1.0 / C)                                      # (1, HW)

    # ---- 7x7 "same" conv on the 2-channel [avg, max] map, kept lane-dense ----
    # Spatial shift (dh, dw) == lane roll by -(dh-pad)*W - (dw-pad) on the flat
    # map; out-of-image taps are zeroed by the precomputed border masks.
    def roll_l(v, sh):
        sh = sh % HW
        return v if sh == 0 else pltpu.roll(v, sh, axis=1)

    # Hoist the column (dw) shift: 7 pre-rolled, border-masked variants per map.
    avg_w = []
    mx_w = []
    for dw in range(K):
        ow = dw - pad
        wmask = m_ref[dw:dw + 1, :]                             # (1, HW) 0/1
        avg_w.append(roll_l(avg, -ow) * wmask)
        mx_w.append(roll_l(smax, -ow) * wmask)

    att = jnp.zeros((1, HW), jnp.float32)
    for dh in range(K):
        oh = dh - pad
        part = jnp.zeros((1, HW), jnp.float32)
        for dw in range(K):
            part = (part
                    + w_ref[dh * K + dw] * roll_l(avg_w[dw], -oh * W)
                    + w_ref[K * K + dh * K + dw] * roll_l(mx_w[dw], -oh * W))
        att = att + part * m_ref[K + dh:K + dh + 1, :]          # row mask per dh
    att = jax.nn.sigmoid(att)                                   # (1, HW)

    # ---- out = x * att : lane-dense broadcast multiply, aligned stores ----
    for ci in range(n_chunks):
        c0 = ci * c_chunk
        cs = min(c_chunk, C - c0)
        o_ref[pl.ds(c0, cs), :] = (
            x_ref[pl.ds(c0, cs), :].astype(jnp.float32) * att).astype(o_ref.dtype)


def spatial_attention(x, w):
    """x: (B, C, H, W) float32; w: (1, 2, K, K) Conv2d weight (OIHW, no bias)."""
    B, C, H, W = x.shape
    K = w.shape[-1]
    pad = K // 2
    HW = H * W

    # Lane-dense views (free reshapes for contiguous NCHW).
    x2 = x.reshape(B, C, HW)
    w_flat = w.reshape(-1).astype(jnp.float32)

    # Precomputed 0/1 border masks (host-side, tiny, static): rows [0,K) mask
    # columns that fall outside [0,W) for offset dw-pad; rows [K,2K) mask rows
    # that fall outside [0,H) for offset dh-pad.  Built in flat (H*W) order.
    cols = np.arange(HW, dtype=np.int64) % W
    rows = np.arange(HW, dtype=np.int64) // W
    mask_rows = []
    for dw in range(K):
        ow = dw - pad
        mask_rows.append(((cols + ow >= 0) & (cols + ow < W)).astype(np.float32))
    for dh in range(K):
        oh = dh - pad
        mask_rows.append(((rows + oh >= 0) & (rows + oh < H)).astype(np.float32))
    masks = jnp.asarray(np.stack(mask_rows, axis=0))            # (2K, HW) f32

    # VMEM budget with (8,128) tile padding; in + out double-buffered + masks.
    itemsize = jnp.dtype(x.dtype).itemsize
    blk_bytes = _round_up(C, 8) * _round_up(HW, 128) * itemsize
    mask_bytes = _round_up(2 * K, 8) * _round_up(HW, 128) * 4
    need = 2 * 2 * blk_bytes + 2 * mask_bytes + (2 << 20)
    try:
        phys_vmem = int(getattr(pltpu.get_tpu_info(), "vmem_capacity_bytes",
                                64 << 20))
    except Exception:  # pragma: no cover - conservative fallback
        phys_vmem = 64 << 20
    vmem_limit = int(min(max(need, 16 << 20), max(phys_vmem - (2 << 20), 16 << 20)))

    kernel = functools.partial(_spatial_attention_kernel,
                               K=K, H=H, W=W, C=C, c_chunk=min(C, 128))

    out = pl.pallas_call(
        kernel,
        out_shape=jax.ShapeDtypeStruct((B, C, HW), x.dtype),
        grid_spec=pltpu.PrefetchScalarGridSpec(
            num_scalar_prefetch=0,
            grid=(B,),
            in_specs=[
                pl.BlockSpec((pl.Squeezed(), C, HW), lambda b: (b, 0, 0)),
                pl.BlockSpec((2 * K, HW), lambda b: (0, 0)),
                pl.BlockSpec(memory_space=pltpu.MemorySpace.SMEM),
            ],
            out_specs=pl.BlockSpec((pl.Squeezed(), C, HW), lambda b: (b, 0, 0)),
        ),
        compiler_params=pltpu.CompilerParams(
            dimension_semantics=("parallel",),
            vmem_limit_bytes=vmem_limit),
        cost_estimate=pl.CostEstimate(
            flops=int(B * (3 * C * HW + 5 * K * K * HW)),
            transcendentals=int(B * HW),
            bytes_accessed=int(2 * B * C * HW * itemsize + B * 2 * K * HW * 4)),
    )(x2, masks, w_flat)
    return out.reshape(B, C, H, W)


def spatial_attention_ref(x, w):
    """Pure-JAX reference mirroring the PyTorch forward."""
    K = w.shape[-1]
    pad = K // 2
    avg = jnp.mean(x, axis=1, keepdims=True)
    mx = jnp.max(x, axis=1, keepdims=True)
    cat = jnp.concatenate([avg, mx], axis=1)                    # (B, 2, H, W)
    att = jax.lax.conv_general_dilated(
        cat, w,
        window_strides=(1, 1),
        padding=[(pad, pad), (pad, pad)],
        dimension_numbers=("NCHW", "OIHW", "NCHW"))
    att = jax.nn.sigmoid(att)                                   # (B, 1, H, W)
    return x * att


if __name__ == "__main__":
    B, C, H, W = 2, 4, 16, 16
    K = 7

    key = jax.random.PRNGKey(0)
    kx, kw = jax.random.split(key, 2)

    x = jax.random.normal(kx, (B, C, H, W), dtype=jnp.float32)
    # nn.Conv2d(2, 1, kernel_size=7, padding=3, bias=False) weight: (1, 2, 7, 7)
    w = jax.random.normal(kw, (1, 2, K, K), dtype=jnp.float32) * 0.1

    out = spatial_attention(x, w)
    out = jax.block_until_ready(out)

    ref = spatial_attention_ref(x, w)
    assert out.shape == ref.shape
    assert jnp.allclose(out, ref, atol=1e-5, rtol=1e-5), "mismatch vs reference"

    print("KERNEL_OK")
</pallas_src>

<mosaic_0001>
module attributes {stable_mosaic.version = 11 : i64} {
  func.func @_spatial_attention_kernel(%arg0: i32, %arg1: memref<1x4x256xf32, #tpu.memory_space<vmem>>, %arg2: memref<14x256xf32, #tpu.memory_space<vmem>>, %arg3: memref<98xf32, #tpu.memory_space<smem>>, %arg4: memref<1x4x256xf32, #tpu.memory_space<vmem>>) attributes {dimension_semantics = [#tpu.dimension_semantics<parallel>], iteration_bounds = array<i64: 2>, scalar_prefetch = 0 : i64, scratch_operands = 0 : i64, tpu.core_type = #tpu.core_type<tc>, window_params = [{transform_indices = @transform_0, window_bounds = array<i64: 1, 4, 256>}, {pipeline_mode = #tpu.pipeline_mode<synchronous>, transform_indices = @transform_1, window_bounds = array<i64: 14, 256>}, {transform_indices = @transform_2, window_bounds = array<i64: 98>}, {transform_indices = @transform_3, window_bounds = array<i64: 1, 4, 256>}]} {
    %c0 = arith.constant 0 : index
    %c0_0 = arith.constant 0 : index
    %c0_1 = arith.constant 0 : index
    %0 = vector.load %arg1[%c0, %c0_0, %c0_1] : memref<1x4x256xf32, #tpu.memory_space<vmem>>, vector<1x4x256xf32>
    %1 = vector.shape_cast %0 : vector<1x4x256xf32> to vector<4x256xf32>
    %cst = arith.constant dense<0.000000e+00> : vector<256xf32>
    %2 = vector.multi_reduction <add>, %1, %cst [0] : vector<4x256xf32> to vector<256xf32>
    %3 = vector.shape_cast %2 : vector<256xf32> to vector<1x256xf32>
    %cst_2 = arith.constant dense<0xFF800000> : vector<256xf32>
    %4 = vector.multi_reduction <maximumf>, %1, %cst_2 [0] : vector<4x256xf32> to vector<256xf32>
    %5 = vector.shape_cast %4 : vector<256xf32> to vector<1x256xf32>
    %cst_3 = arith.constant 2.500000e-01 : f32
    %6 = vector.broadcast %cst_3 : f32 to vector<1x256xf32>
    %7 = arith.mulf %3, %6 : vector<1x256xf32>
    %c0_4 = arith.constant 0 : index
    %c0_5 = arith.constant 0 : index
    %8 = vector.load %arg2[%c0_4, %c0_5] : memref<14x256xf32, #tpu.memory_space<vmem>>, vector<1x256xf32>
    %c3_i32 = arith.constant 3 : i32
    %9 = tpu.dynamic_rotate %7 by %c3_i32 dim 1 : vector<1x256xf32>, i32 -> vector<1x256xf32>
    %10 = arith.mulf %9, %8 : vector<1x256xf32>
    %c3_i32_6 = arith.constant 3 : i32
    %11 = tpu.dynamic_rotate %5 by %c3_i32_6 dim 1 : vector<1x256xf32>, i32 -> vector<1x256xf32>
    %12 = arith.mulf %11, %8 : vector<1x256xf32>
    %c1 = arith.constant 1 : index
    %c0_7 = arith.constant 0 : index
    %13 = vector.load %arg2[%c1, %c0_7] : memref<14x256xf32, #tpu.memory_space<vmem>>, vector<1x256xf32>
    %c2_i32 = arith.constant 2 : i32
    %14 = tpu.dynamic_rotate %7 by %c2_i32 dim 1 : vector<1x256xf32>, i32 -> vector<1x256xf32>
    %15 = arith.mulf %14, %13 : vector<1x256xf32>
    %c2_i32_8 = arith.constant 2 : i32
    %16 = tpu.dynamic_rotate %5 by %c2_i32_8 dim 1 : vector<1x256xf32>, i32 -> vector<1x256xf32>
    %17 = arith.mulf %16, %13 : vector<1x256xf32>
    %c2 = arith.constant 2 : index
    %c0_9 = arith.constant 0 : index
    %18 = vector.load %arg2[%c2, %c0_9] : memref<14x256xf32, #tpu.memory_space<vmem>>, vector<1x256xf32>
    %c1_i32 = arith.constant 1 : i32
    %19 = tpu.dynamic_rotate %7 by %c1_i32 dim 1 : vector<1x256xf32>, i32 -> vector<1x256xf32>
    %20 = arith.mulf %19, %18 : vector<1x256xf32>
    %c1_i32_10 = arith.constant 1 : i32
    %21 = tpu.dynamic_rotate %5 by %c1_i32_10 dim 1 : vector<1x256xf32>, i32 -> vector<1x256xf32>
    %22 = arith.mulf %21, %18 : vector<1x256xf32>
    %c3 = arith.constant 3 : index
    %c0_11 = arith.constant 0 : index
    %23 = vector.load %arg2[%c3, %c0_11] : memref<14x256xf32, #tpu.memory_space<vmem>>, vector<1x256xf32>
    %24 = arith.mulf %7, %23 : vector<1x256xf32>
    %25 = arith.mulf %5, %23 : vector<1x256xf32>
    %c4 = arith.constant 4 : index
    %c0_12 = arith.constant 0 : index
    %26 = vector.load %arg2[%c4, %c0_12] : memref<14x256xf32, #tpu.memory_space<vmem>>, vector<1x256xf32>
    %c255_i32 = arith.constant 255 : i32
    %27 = tpu.dynamic_rotate %7 by %c255_i32 dim 1 : vector<1x256xf32>, i32 -> vector<1x256xf32>
    %28 = arith.mulf %27, %26 : vector<1x256xf32>
    %c255_i32_13 = arith.constant 255 : i32
    %29 = tpu.dynamic_rotate %5 by %c255_i32_13 dim 1 : vector<1x256xf32>, i32 -> vector<1x256xf32>
    %30 = arith.mulf %29, %26 : vector<1x256xf32>
    %c5 = arith.constant 5 : index
    %c0_14 = arith.constant 0 : index
    %31 = vector.load %arg2[%c5, %c0_14] : memref<14x256xf32, #tpu.memory_space<vmem>>, vector<1x256xf32>
    %c254_i32 = arith.constant 254 : i32
    %32 = tpu.dynamic_rotate %7 by %c254_i32 dim 1 : vector<1x256xf32>, i32 -> vector<1x256xf32>
    %33 = arith.mulf %32, %31 : vector<1x256xf32>
    %c254_i32_15 = arith.constant 254 : i32
    %34 = tpu.dynamic_rotate %5 by %c254_i32_15 dim 1 : vector<1x256xf32>, i32 -> vector<1x256xf32>
    %35 = arith.mulf %34, %31 : vector<1x256xf32>
    %c6 = arith.constant 6 : index
    %c0_16 = arith.constant 0 : index
    %36 = vector.load %arg2[%c6, %c0_16] : memref<14x256xf32, #tpu.memory_space<vmem>>, vector<1x256xf32>
    %c253_i32 = arith.constant 253 : i32
    %37 = tpu.dynamic_rotate %7 by %c253_i32 dim 1 : vector<1x256xf32>, i32 -> vector<1x256xf32>
    %38 = arith.mulf %37, %36 : vector<1x256xf32>
    %c253_i32_17 = arith.constant 253 : i32
    %39 = tpu.dynamic_rotate %5 by %c253_i32_17 dim 1 : vector<1x256xf32>, i32 -> vector<1x256xf32>
    %40 = arith.mulf %39, %36 : vector<1x256xf32>
    %cst_18 = arith.constant 0.000000e+00 : f32
    %41 = vector.broadcast %cst_18 : f32 to vector<1x256xf32>
    %cst_19 = arith.constant 0.000000e+00 : f32
    %42 = vector.broadcast %cst_19 : f32 to vector<1x256xf32>
    %c0_20 = arith.constant 0 : index
    %43 = memref.load %arg3[%c0_20] : memref<98xf32, #tpu.memory_space<smem>>
    %c48_i32 = arith.constant 48 : i32
    %44 = tpu.dynamic_rotate %10 by %c48_i32 dim 1 : vector<1x256xf32>, i32 -> vector<1x256xf32>
    %45 = vector.broadcast %43 : f32 to vector<1x256xf32>
    %46 = arith.mulf %45, %44 : vector<1x256xf32>
    %47 = arith.addf %42, %46 : vector<1x256xf32>
    %c49 = arith.constant 49 : index
    %48 = memref.load %arg3[%c49] : memref<98xf32, #tpu.memory_space<smem>>
    %c48_i32_21 = arith.constant 48 : i32
    %49 = tpu.dynamic_rotate %12 by %c48_i32_21 dim 1 : vector<1x256xf32>, i32 -> vector<1x256xf32>
    %50 = vector.broadcast %48 : f32 to vector<1x256xf32>
    %51 = arith.mulf %50, %49 : vector<1x256xf32>
    %52 = arith.addf %47, %51 : vector<1x256xf32>
    %c1_22 = arith.constant 1 : index
    %53 = memref.load %arg3[%c1_22] : memref<98xf32, #tpu.memory_space<smem>>
    %c48_i32_23 = arith.constant 48 : i32
    %54 = tpu.dynamic_rotate %15 by %c48_i32_23 dim 1 : vector<1x256xf32>, i32 -> vector<1x256xf32>
    %55 = vector.broadcast %53 : f32 to vector<1x256xf32>
    %56 = arith.mulf %55, %54 : vector<1x256xf32>
    %57 = arith.addf %52, %56 : vector<1x256xf32>
    %c50 = arith.constant 50 : index
    %58 = memref.load %arg3[%c50] : memref<98xf32, #tpu.memory_space<smem>>
    %c48_i32_24 = arith.constant 48 : i32
    %59 = tpu.dynamic_rotate %17 by %c48_i32_24 dim 1 : vector<1x256xf32>, i32 -> vector<1x256xf32>
    %60 = vector.broadcast %58 : f32 to vector<1x256xf32>
    %61 = arith.mulf %60, %59 : vector<1x256xf32>
    %62 = arith.addf %57, %61 : vector<1x256xf32>
    %c2_25 = arith.constant 2 : index
    %63 = memref.load %arg3[%c2_25] : memref<98xf32, #tpu.memory_space<smem>>
    %c48_i32_26 = arith.constant 48 : i32
    %64 = tpu.dynamic_rotate %20 by %c48_i32_26 dim 1 : vector<1x256xf32>, i32 -> vector<1x256xf32>
    %65 = vector.broadcast %63 : f32 to vector<1x256xf32>
    %66 = arith.mulf %65, %64 : vector<1x256xf32>
    %67 = arith.addf %62, %66 : vector<1x256xf32>
    %c51 = arith.constant 51 : index
    %68 = memref.load %arg3[%c51] : memref<98xf32, #tpu.memory_space<smem>>
    %c48_i32_27 = arith.constant 48 : i32
    %69 = tpu.dynamic_rotate %22 by %c48_i32_27 dim 1 : vector<1x256xf32>, i32 -> vector<1x256xf32>
    %70 = vector.broadcast %68 : f32 to vector<1x256xf32>
    %71 = arith.mulf %70, %69 : vector<1x256xf32>
    %72 = arith.addf %67, %71 : vector<1x256xf32>
    %c3_28 = arith.constant 3 : index
    %73 = memref.load %arg3[%c3_28] : memref<98xf32, #tpu.memory_space<smem>>
    %c48_i32_29 = arith.constant 48 : i32
    %74 = tpu.dynamic_rotate %24 by %c48_i32_29 dim 1 : vector<1x256xf32>, i32 -> vector<1x256xf32>
    %75 = vector.broadcast %73 : f32 to vector<1x256xf32>
    %76 = arith.mulf %75, %74 : vector<1x256xf32>
    %77 = arith.addf %72, %76 : vector<1x256xf32>
    %c52 = arith.constant 52 : index
    %78 = memref.load %arg3[%c52] : memref<98xf32, #tpu.memory_space<smem>>
    %c48_i32_30 = arith.constant 48 : i32
    %79 = tpu.dynamic_rotate %25 by %c48_i32_30 dim 1 : vector<1x256xf32>, i32 -> vector<1x256xf32>
    %80 = vector.broadcast %78 : f32 to vector<1x256xf32>
    %81 = arith.mulf %80, %79 : vector<1x256xf32>
    %82 = arith.addf %77, %81 : vector<1x256xf32>
    %c4_31 = arith.constant 4 : index
    %83 = memref.load %arg3[%c4_31] : memref<98xf32, #tpu.memory_space<smem>>
    %c48_i32_32 = arith.constant 48 : i32
    %84 = tpu.dynamic_rotate %28 by %c48_i32_32 dim 1 : vector<1x256xf32>, i32 -> vector<1x256xf32>
    %85 = vector.broadcast %83 : f32 to vector<1x256xf32>
    %86 = arith.mulf %85, %84 : vector<1x256xf32>
    %87 = arith.addf %82, %86 : vector<1x256xf32>
    %c53 = arith.constant 53 : index
    %88 = memref.load %arg3[%c53] : memref<98xf32, #tpu.memory_space<smem>>
    %c48_i32_33 = arith.constant 48 : i32
    %89 = tpu.dynamic_rotate %30 by %c48_i32_33 dim 1 : vector<1x256xf32>, i32 -> vector<1x256xf32>
    %90 = vector.broadcast %88 : f32 to vector<1x256xf32>
    %91 = arith.mulf %90, %89 : vector<1x256xf32>
    %92 = arith.addf %87, %91 : vector<1x256xf32>
    %c5_34 = arith.constant 5 : index
    %93 = memref.load %arg3[%c5_34] : memref<98xf32, #tpu.memory_space<smem>>
    %c48_i32_35 = arith.constant 48 : i32
    %94 = tpu.dynamic_rotate %33 by %c48_i32_35 dim 1 : vector<1x256xf32>, i32 -> vector<1x256xf32>
    %95 = vector.broadcast %93 : f32 to vector<1x256xf32>
    %96 = arith.mulf %95, %94 : vector<1x256xf32>
    %97 = arith.addf %92, %96 : vector<1x256xf32>
    %c54 = arith.constant 54 : index
    %98 = memref.load %arg3[%c54] : memref<98xf32, #tpu.memory_space<smem>>
    %c48_i32_36 = arith.constant 48 : i32
    %99 = tpu.dynamic_rotate %35 by %c48_i32_36 dim 1 : vector<1x256xf32>, i32 -> vector<1x256xf32>
    %100 = vector.broadcast %98 : f32 to vector<1x256xf32>
    %101 = arith.mulf %100, %99 : vector<1x256xf32>
    %102 = arith.addf %97, %101 : vector<1x256xf32>
    %c6_37 = arith.constant 6 : index
    %103 = memref.load %arg3[%c6_37] : memref<98xf32, #tpu.memory_space<smem>>
    %c48_i32_38 = arith.constant 48 : i32
    %104 = tpu.dynamic_rotate %38 by %c48_i32_38 dim 1 : vector<1x256xf32>, i32 -> vector<1x256xf32>
    %105 = vector.broadcast %103 : f32 to vector<1x256xf32>
    %106 = arith.mulf %105, %104 : vector<1x256xf32>
    %107 = arith.addf %102, %106 : vector<1x256xf32>
    %c55 = arith.constant 55 : index
    %108 = memref.load %arg3[%c55] : memref<98xf32, #tpu.memory_space<smem>>
    %c48_i32_39 = arith.constant 48 : i32
    %109 = tpu.dynamic_rotate %40 by %c48_i32_39 dim 1 : vector<1x256xf32>, i32 -> vector<1x256xf32>
    %110 = vector.broadcast %108 : f32 to vector<1x256xf32>
    %111 = arith.mulf %110, %109 : vector<1x256xf32>
    %112 = arith.addf %107, %111 : vector<1x256xf32>
    %c7 = arith.constant 7 : index
    %c0_40 = arith.constant 0 : index
    %113 = vector.load %arg2[%c7, %c0_40] : memref<14x256xf32, #tpu.memory_space<vmem>>, vector<1x256xf32>
    %114 = arith.mulf %112, %113 : vector<1x256xf32>
    %115 = arith.addf %41, %114 : vector<1x256xf32>
    %cst_41 = arith.constant 0.000000e+00 : f32
    %116 = vector.broadcast %cst_41 : f32 to vector<1x256xf32>
    %c7_42 = arith.constant 7 : index
    %117 = memref.load %arg3[%c7_42] : memref<98xf32, #tpu.memory_space<smem>>
    %c32_i32 = arith.constant 32 : i32
    %118 = tpu.dynamic_rotate %10 by %c32_i32 dim 1 : vector<1x256xf32>, i32 -> vector<1x256xf32>
    %119 = vector.broadcast %117 : f32 to vector<1x256xf32>
    %120 = arith.mulf %119, %118 : vector<1x256xf32>
    %121 = arith.addf %116, %120 : vector<1x256xf32>
    %c56 = arith.constant 56 : index
    %122 = memref.load %arg3[%c56] : memref<98xf32, #tpu.memory_space<smem>>
    %c32_i32_43 = arith.constant 32 : i32
    %123 = tpu.dynamic_rotate %12 by %c32_i32_43 dim 1 : vector<1x256xf32>, i32 -> vector<1x256xf32>
    %124 = vector.broadcast %122 : f32 to vector<1x256xf32>
    %125 = arith.mulf %124, %123 : vector<1x256xf32>
    %126 = arith.addf %121, %125 : vector<1x256xf32>
    %c8 = arith.constant 8 : index
    %127 = memref.load %arg3[%c8] : memref<98xf32, #tpu.memory_space<smem>>
    %c32_i32_44 = arith.constant 32 : i32
    %128 = tpu.dynamic_rotate %15 by %c32_i32_44 dim 1 : vector<1x256xf32>, i32 -> vector<1x256xf32>
    %129 = vector.broadcast %127 : f32 to vector<1x256xf32>
    %130 = arith.mulf %129, %128 : vector<1x256xf32>
    %131 = arith.addf %126, %130 : vector<1x256xf32>
    %c57 = arith.constant 57 : index
    %132 = memref.load %arg3[%c57] : memref<98xf32, #tpu.memory_space<smem>>
    %c32_i32_45 = arith.constant 32 : i32
    %133 = tpu.dynamic_rotate %17 by %c32_i32_45 dim 1 : vector<1x256xf32>, i32 -> vector<1x256xf32>
    %134 = vector.broadcast %132 : f32 to vector<1x256xf32>
    %135 = arith.mulf %134, %133 : vector<1x256xf32>
    %136 = arith.addf %131, %135 : vector<1x256xf32>
    %c9 = arith.constant 9 : index
    %137 = memref.load %arg3[%c9] : memref<98xf32, #tpu.memory_space<smem>>
    %c32_i32_46 = arith.constant 32 : i32
    %138 = tpu.dynamic_rotate %20 by %c32_i32_46 dim 1 : vector<1x256xf32>, i32 -> vector<1x256xf32>
    %139 = vector.broadcast %137 : f32 to vector<1x256xf32>
    %140 = arith.mulf %139, %138 : vector<1x256xf32>
    %141 = arith.addf %136, %140 : vector<1x256xf32>
    %c58 = arith.constant 58 : index
    %142 = memref.load %arg3[%c58] : memref<98xf32, #tpu.memory_space<smem>>
    %c32_i32_47 = arith.constant 32 : i32
    %143 = tpu.dynamic_rotate %22 by %c32_i32_47 dim 1 : vector<1x256xf32>, i32 -> vector<1x256xf32>
    %144 = vector.broadcast %142 : f32 to vector<1x256xf32>
    %145 = arith.mulf %144, %143 : vector<1x256xf32>
    %146 = arith.addf %141, %145 : vector<1x256xf32>
    %c10 = arith.constant 10 : index
    %147 = memref.load %arg3[%c10] : memref<98xf32, #tpu.memory_space<smem>>
    %c32_i32_48 = arith.constant 32 : i32
    %148 = tpu.dynamic_rotate %24 by %c32_i32_48 dim 1 : vector<1x256xf32>, i32 -> vector<1x256xf32>
    %149 = vector.broadcast %147 : f32 to vector<1x256xf32>
    %150 = arith.mulf %149, %148 : vector<1x256xf32>
    %151 = arith.addf %146, %150 : vector<1x256xf32>
    %c59 = arith.constant 59 : index
    %152 = memref.load %arg3[%c59] : memref<98xf32, #tpu.memory_space<smem>>
    %c32_i32_49 = arith.constant 32 : i32
    %153 = tpu.dynamic_rotate %25 by %c32_i32_49 dim 1 : vector<1x256xf32>, i32 -> vector<1x256xf32>
    %154 = vector.broadcast %152 : f32 to vector<1x256xf32>
    %155 = arith.mulf %154, %153 : vector<1x256xf32>
    %156 = arith.addf %151, %155 : vector<1x256xf32>
    %c11 = arith.constant 11 : index
    %157 = memref.load %arg3[%c11] : memref<98xf32, #tpu.memory_space<smem>>
    %c32_i32_50 = arith.constant 32 : i32
    %158 = tpu.dynamic_rotate %28 by %c32_i32_50 dim 1 : vector<1x256xf32>, i32 -> vector<1x256xf32>
    %159 = vector.broadcast %157 : f32 to vector<1x256xf32>
    %160 = arith.mulf %159, %158 : vector<1x256xf32>
    %161 = arith.addf %156, %160 : vector<1x256xf32>
    %c60 = arith.constant 60 : index
    %162 = memref.load %arg3[%c60] : memref<98xf32, #tpu.memory_space<smem>>
    %c32_i32_51 = arith.constant 32 : i32
    %163 = tpu.dynamic_rotate %30 by %c32_i32_51 dim 1 : vector<1x256xf32>, i32 -> vector<1x256xf32>
    %164 = vector.broadcast %162 : f32 to vector<1x256xf32>
    %165 = arith.mulf %164, %163 : vector<1x256xf32>
    %166 = arith.addf %161, %165 : vector<1x256xf32>
    %c12 = arith.constant 12 : index
    %167 = memref.load %arg3[%c12] : memref<98xf32, #tpu.memory_space<smem>>
    %c32_i32_52 = arith.constant 32 : i32
    %168 = tpu.dynamic_rotate %33 by %c32_i32_52 dim 1 : vector<1x256xf32>, i32 -> vector<1x256xf32>
    %169 = vector.broadcast %167 : f32 to vector<1x256xf32>
    %170 = arith.mulf %169, %168 : vector<1x256xf32>
    %171 = arith.addf %166, %170 : vector<1x256xf32>
    %c61 = arith.constant 61 : index
    %172 = memref.load %arg3[%c61] : memref<98xf32, #tpu.memory_space<smem>>
    %c32_i32_53 = arith.constant 32 : i32
    %173 = tpu.dynamic_rotate %35 by %c32_i32_53 dim 1 : vector<1x256xf32>, i32 -> vector<1x256xf32>
    %174 = vector.broadcast %172 : f32 to vector<1x256xf32>
    %175 = arith.mulf %174, %173 : vector<1x256xf32>
    %176 = arith.addf %171, %175 : vector<1x256xf32>
    %c13 = arith.constant 13 : index
    %177 = memref.load %arg3[%c13] : memref<98xf32, #tpu.memory_space<smem>>
    %c32_i32_54 = arith.constant 32 : i32
    %178 = tpu.dynamic_rotate %38 by %c32_i32_54 dim 1 : vector<1x256xf32>, i32 -> vector<1x256xf32>
    %179 = vector.broadcast %177 : f32 to vector<1x256xf32>
    %180 = arith.mulf %179, %178 : vector<1x256xf32>
    %181 = arith.addf %176, %180 : vector<1x256xf32>
    %c62 = arith.constant 62 : index
    %182 = memref.load %arg3[%c62] : memref<98xf32, #tpu.memory_space<smem>>
    %c32_i32_55 = arith.constant 32 : i32
    %183 = tpu.dynamic_rotate %40 by %c32_i32_55 dim 1 : vector<1x256xf32>, i32 -> vector<1x256xf32>
    %184 = vector.broadcast %182 : f32 to vector<1x256xf32>
    %185 = arith.mulf %184, %183 : vector<1x256xf32>
    %186 = arith.addf %181, %185 : vector<1x256xf32>
    %c8_56 = arith.constant 8 : index
    %c0_57 = arith.constant 0 : index
    %187 = vector.load %arg2[%c8_56, %c0_57] : memref<14x256xf32, #tpu.memory_space<vmem>>, vector<1x256xf32>
    %188 = arith.mulf %186, %187 : vector<1x256xf32>
    %189 = arith.addf %115, %188 : vector<1x256xf32>
    %cst_58 = arith.constant 0.000000e+00 : f32
    %190 = vector.broadcast %cst_58 : f32 to vector<1x256xf32>
    %c14 = arith.constant 14 : index
    %191 = memref.load %arg3[%c14] : memref<98xf32, #tpu.memory_space<smem>>
    %c16_i32 = arith.constant 16 : i32
    %192 = tpu.dynamic_rotate %10 by %c16_i32 dim 1 : vector<1x256xf32>, i32 -> vector<1x256xf32>
    %193 = vector.broadcast %191 : f32 to vector<1x256xf32>
    %194 = arith.mulf %193, %192 : vector<1x256xf32>
    %195 = arith.addf %190, %194 : vector<1x256xf32>
    %c63 = arith.constant 63 : index
    %196 = memref.load %arg3[%c63] : memref<98xf32, #tpu.memory_space<smem>>
    %c16_i32_59 = arith.constant 16 : i32
    %197 = tpu.dynamic_rotate %12 by %c16_i32_59 dim 1 : vector<1x256xf32>, i32 -> vector<1x256xf32>
    %198 = vector.broadcast %196 : f32 to vector<1x256xf32>
    %199 = arith.mulf %198, %197 : vector<1x256xf32>
    %200 = arith.addf %195, %199 : vector<1x256xf32>
    %c15 = arith.constant 15 : index
    %201 = memref.load %arg3[%c15] : memref<98xf32, #tpu.memory_space<smem>>
    %c16_i32_60 = arith.constant 16 : i32
    %202 = tpu.dynamic_rotate %15 by %c16_i32_60 dim 1 : vector<1x256xf32>, i32 -> vector<1x256xf32>
    %203 = vector.broadcast %201 : f32 to vector<1x256xf32>
    %204 = arith.mulf %203, %202 : vector<1x256xf32>
    %205 = arith.addf %200, %204 : vector<1x256xf32>
    %c64 = arith.constant 64 : index
    %206 = memref.load %arg3[%c64] : memref<98xf32, #tpu.memory_space<smem>>
    %c16_i32_61 = arith.constant 16 : i32
    %207 = tpu.dynamic_rotate %17 by %c16_i32_61 dim 1 : vector<1x256xf32>, i32 -> vector<1x256xf32>
    %208 = vector.broadcast %206 : f32 to vector<1x256xf32>
    %209 = arith.mulf %208, %207 : vector<1x256xf32>
    %210 = arith.addf %205, %209 : vector<1x256xf32>
    %c16 = arith.constant 16 : index
    %211 = memref.load %arg3[%c16] : memref<98xf32, #tpu.memory_space<smem>>
    %c16_i32_62 = arith.constant 16 : i32
    %212 = tpu.dynamic_rotate %20 by %c16_i32_62 dim 1 : vector<1x256xf32>, i32 -> vector<1x256xf32>
    %213 = vector.broadcast %211 : f32 to vector<1x256xf32>
    %214 = arith.mulf %213, %212 : vector<1x256xf32>
    %215 = arith.addf %210, %214 : vector<1x256xf32>
    %c65 = arith.constant 65 : index
    %216 = memref.load %arg3[%c65] : memref<98xf32, #tpu.memory_space<smem>>
    %c16_i32_63 = arith.constant 16 : i32
    %217 = tpu.dynamic_rotate %22 by %c16_i32_63 dim 1 : vector<1x256xf32>, i32 -> vector<1x256xf32>
    %218 = vector.broadcast %216 : f32 to vector<1x256xf32>
    %219 = arith.mulf %218, %217 : vector<1x256xf32>
    %220 = arith.addf %215, %219 : vector<1x256xf32>
    %c17 = arith.constant 17 : index
    %221 = memref.load %arg3[%c17] : memref<98xf32, #tpu.memory_space<smem>>
    %c16_i32_64 = arith.constant 16 : i32
    %222 = tpu.dynamic_rotate %24 by %c16_i32_64 dim 1 : vector<1x256xf32>, i32 -> vector<1x256xf32>
    %223 = vector.broadcast %221 : f32 to vector<1x256xf32>
    %224 = arith.mulf %223, %222 : vector<1x256xf32>
    %225 = arith.addf %220, %224 : vector<1x256xf32>
    %c66 = arith.constant 66 : index
    %226 = memref.load %arg3[%c66] : memref<98xf32, #tpu.memory_space<smem>>
    %c16_i32_65 = arith.constant 16 : i32
    %227 = tpu.dynamic_rotate %25 by %c16_i32_65 dim 1 : vector<1x256xf32>, i32 -> vector<1x256xf32>
    %228 = vector.broadcast %226 : f32 to vector<1x256xf32>
    %229 = arith.mulf %228, %227 : vector<1x256xf32>
    %230 = arith.addf %225, %229 : vector<1x256xf32>
    %c18 = arith.constant 18 : index
    %231 = memref.load %arg3[%c18] : memref<98xf32, #tpu.memory_space<smem>>
    %c16_i32_66 = arith.constant 16 : i32
    %232 = tpu.dynamic_rotate %28 by %c16_i32_66 dim 1 : vector<1x256xf32>, i32 -> vector<1x256xf32>
    %233 = vector.broadcast %231 : f32 to vector<1x256xf32>
    %234 = arith.mulf %233, %232 : vector<1x256xf32>
    %235 = arith.addf %230, %234 : vector<1x256xf32>
    %c67 = arith.constant 67 : index
    %236 = memref.load %arg3[%c67] : memref<98xf32, #tpu.memory_space<smem>>
    %c16_i32_67 = arith.constant 16 : i32
    %237 = tpu.dynamic_rotate %30 by %c16_i32_67 dim 1 : vector<1x256xf32>, i32 -> vector<1x256xf32>
    %238 = vector.broadcast %236 : f32 to vector<1x256xf32>
    %239 = arith.mulf %238, %237 : vector<1x256xf32>
    %240 = arith.addf %235, %239 : vector<1x256xf32>
    %c19 = arith.constant 19 : index
    %241 = memref.load %arg3[%c19] : memref<98xf32, #tpu.memory_space<smem>>
    %c16_i32_68 = arith.constant 16 : i32
    %242 = tpu.dynamic_rotate %33 by %c16_i32_68 dim 1 : vector<1x256xf32>, i32 -> vector<1x256xf32>
    %243 = vector.broadcast %241 : f32 to vector<1x256xf32>
    %244 = arith.mulf %243, %242 : vector<1x256xf32>
    %245 = arith.addf %240, %244 : vector<1x256xf32>
    %c68 = arith.constant 68 : index
    %246 = memref.load %arg3[%c68] : memref<98xf32, #tpu.memory_space<smem>>
    %c16_i32_69 = arith.constant 16 : i32
    %247 = tpu.dynamic_rotate %35 by %c16_i32_69 dim 1 : vector<1x256xf32>, i32 -> vector<1x256xf32>
    %248 = vector.broadcast %246 : f32 to vector<1x256xf32>
    %249 = arith.mulf %248, %247 : vector<1x256xf32>
    %250 = arith.addf %245, %249 : vector<1x256xf32>
    %c20 = arith.constant 20 : index
    %251 = memref.load %arg3[%c20] : memref<98xf32, #tpu.memory_space<smem>>
    %c16_i32_70 = arith.constant 16 : i32
    %252 = tpu.dynamic_rotate %38 by %c16_i32_70 dim 1 : vector<1x256xf32>, i32 -> vector<1x256xf32>
    %253 = vector.broadcast %251 : f32 to vector<1x256xf32>
    %254 = arith.mulf %253, %252 : vector<1x256xf32>
    %255 = arith.addf %250, %254 : vector<1x256xf32>
    %c69 = arith.constant 69 : index
    %256 = memref.load %arg3[%c69] : memref<98xf32, #tpu.memory_space<smem>>
    %c16_i32_71 = arith.constant 16 : i32
    %257 = tpu.dynamic_rotate %40 by %c16_i32_71 dim 1 : vector<1x256xf32>, i32 -> vector<1x256xf32>
    %258 = vector.broadcast %256 : f32 to vector<1x256xf32>
    %259 = arith.mulf %258, %257 : vector<1x256xf32>
    %260 = arith.addf %255, %259 : vector<1x256xf32>
    %c9_72 = arith.constant 9 : index
    %c0_73 = arith.constant 0 : index
    %261 = vector.load %arg2[%c9_72, %c0_73] : memref<14x256xf32, #tpu.memory_space<vmem>>, vector<1x256xf32>
    %262 = arith.mulf %260, %261 : vector<1x256xf32>
    %263 = arith.addf %189, %262 : vector<1x256xf32>
    %cst_74 = arith.constant 0.000000e+00 : f32
    %264 = vector.broadcast %cst_74 : f32 to vector<1x256xf32>
    %c21 = arith.constant 21 : index
    %265 = memref.load %arg3[%c21] : memref<98xf32, #tpu.memory_space<smem>>
    %266 = vector.broadcast %265 : f32 to vector<1x256xf32>
    %267 = arith.mulf %266, %10 : vector<1x256xf32>
    %268 = arith.addf %264, %267 : vector<1x256xf32>
    %c70 = arith.constant 70 : index
    %269 = memref.load %arg3[%c70] : memref<98xf32, #tpu.memory_space<smem>>
    %270 = vector.broadcast %269 : f32 to vector<1x256xf32>
    %271 = arith.mulf %270, %12 : vector<1x256xf32>
    %272 = arith.addf %268, %271 : vector<1x256xf32>
    %c22 = arith.constant 22 : index
    %273 = memref.load %arg3[%c22] : memref<98xf32, #tpu.memory_space<smem>>
    %274 = vector.broadcast %273 : f32 to vector<1x256xf32>
    %275 = arith.mulf %274, %15 : vector<1x256xf32>
    %276 = arith.addf %272, %275 : vector<1x256xf32>
    %c71 = arith.constant 71 : index
    %277 = memref.load %arg3[%c71] : memref<98xf32, #tpu.memory_space<smem>>
    %278 = vector.broadcast %277 : f32 to vector<1x256xf32>
    %279 = arith.mulf %278, %17 : vector<1x256xf32>
    %280 = arith.addf %276, %279 : vector<1x256xf32>
    %c23 = arith.constant 23 : index
    %281 = memref.load %arg3[%c23] : memref<98xf32, #tpu.memory_space<smem>>
    %282 = vector.broadcast %281 : f32 to vector<1x256xf32>
    %283 = arith.mulf %282, %20 : vector<1x256xf32>
    %284 = arith.addf %280, %283 : vector<1x256xf32>
    %c72 = arith.constant 72 : index
    %285 = memref.load %arg3[%c72] : memref<98xf32, #tpu.memory_space<smem>>
    %286 = vector.broadcast %285 : f32 to vector<1x256xf32>
    %287 = arith.mulf %286, %22 : vector<1x256xf32>
    %288 = arith.addf %284, %287 : vector<1x256xf32>
    %c24 = arith.constant 24 : index
    %289 = memref.load %arg3[%c24] : memref<98xf32, #tpu.memory_space<smem>>
    %290 = vector.broadcast %289 : f32 to vector<1x256xf32>
    %291 = arith.mulf %290, %24 : vector<1x256xf32>
    %292 = arith.addf %288, %291 : vector<1x256xf32>
    %c73 = arith.constant 73 : index
    %293 = memref.load %arg3[%c73] : memref<98xf32, #tpu.memory_space<smem>>
    %294 = vector.broadcast %293 : f32 to vector<1x256xf32>
    %295 = arith.mulf %294, %25 : vector<1x256xf32>
    %296 = arith.addf %292, %295 : vector<1x256xf32>
    %c25 = arith.constant 25 : index
    %297 = memref.load %arg3[%c25] : memref<98xf32, #tpu.memory_space<smem>>
    %298 = vector.broadcast %297 : f32 to vector<1x256xf32>
    %299 = arith.mulf %298, %28 : vector<1x256xf32>
    %300 = arith.addf %296, %299 : vector<1x256xf32>
    %c74 = arith.constant 74 : index
    %301 = memref.load %arg3[%c74] : memref<98xf32, #tpu.memory_space<smem>>
    %302 = vector.broadcast %301 : f32 to vector<1x256xf32>
    %303 = arith.mulf %302, %30 : vector<1x256xf32>
    %304 = arith.addf %300, %303 : vector<1x256xf32>
    %c26 = arith.constant 26 : index
    %305 = memref.load %arg3[%c26] : memref<98xf32, #tpu.memory_space<smem>>
    %306 = vector.broadcast %305 : f32 to vector<1x256xf32>
    %307 = arith.mulf %306, %33 : vector<1x256xf32>
    %308 = arith.addf %304, %307 : vector<1x256xf32>
    %c75 = arith.constant 75 : index
    %309 = memref.load %arg3[%c75] : memref<98xf32, #tpu.memory_space<smem>>
    %310 = vector.broadcast %309 : f32 to vector<1x256xf32>
    %311 = arith.mulf %310, %35 : vector<1x256xf32>
    %312 = arith.addf %308, %311 : vector<1x256xf32>
    %c27 = arith.constant 27 : index
    %313 = memref.load %arg3[%c27] : memref<98xf32, #tpu.memory_space<smem>>
    %314 = vector.broadcast %313 : f32 to vector<1x256xf32>
    %315 = arith.mulf %314, %38 : vector<1x256xf32>
    %316 = arith.addf %312, %315 : vector<1x256xf32>
    %c76 = arith.constant 76 : index
    %317 = memref.load %arg3[%c76] : memref<98xf32, #tpu.memory_space<smem>>
    %318 = vector.broadcast %317 : f32 to vector<1x256xf32>
    %319 = arith.mulf %318, %40 : vector<1x256xf32>
    %320 = arith.addf %316, %319 : vector<1x256xf32>
    %c10_75 = arith.constant 10 : index
    %c0_76 = arith.constant 0 : index
    %321 = vector.load %arg2[%c10_75, %c0_76] : memref<14x256xf32, #tpu.memory_space<vmem>>, vector<1x256xf32>
    %322 = arith.mulf %320, %321 : vector<1x256xf32>
    %323 = arith.addf %263, %322 : vector<1x256xf32>
    %cst_77 = arith.constant 0.000000e+00 : f32
    %324 = vector.broadcast %cst_77 : f32 to vector<1x256xf32>
    %c28 = arith.constant 28 : index
    %325 = memref.load %arg3[%c28] : memref<98xf32, #tpu.memory_space<smem>>
    %c240_i32 = arith.constant 240 : i32
    %326 = tpu.dynamic_rotate %10 by %c240_i32 dim 1 : vector<1x256xf32>, i32 -> vector<1x256xf32>
    %327 = vector.broadcast %325 : f32 to vector<1x256xf32>
    %328 = arith.mulf %327, %326 : vector<1x256xf32>
    %329 = arith.addf %324, %328 : vector<1x256xf32>
    %c77 = arith.constant 77 : index
    %330 = memref.load %arg3[%c77] : memref<98xf32, #tpu.memory_space<smem>>
    %c240_i32_78 = arith.constant 240 : i32
    %331 = tpu.dynamic_rotate %12 by %c240_i32_78 dim 1 : vector<1x256xf32>, i32 -> vector<1x256xf32>
    %332 = vector.broadcast %330 : f32 to vector<1x256xf32>
    %333 = arith.mulf %332, %331 : vector<1x256xf32>
    %334 = arith.addf %329, %333 : vector<1x256xf32>
    %c29 = arith.constant 29 : index
    %335 = memref.load %arg3[%c29] : memref<98xf32, #tpu.memory_space<smem>>
    %c240_i32_79 = arith.constant 240 : i32
    %336 = tpu.dynamic_rotate %15 by %c240_i32_79 dim 1 : vector<1x256xf32>, i32 -> vector<1x256xf32>
    %337 = vector.broadcast %335 : f32 to vector<1x256xf32>
    %338 = arith.mulf %337, %336 : vector<1x256xf32>
    %339 = arith.addf %334, %338 : vector<1x256xf32>
    %c78 = arith.constant 78 : index
    %340 = memref.load %arg3[%c78] : memref<98xf32, #tpu.memory_space<smem>>
    %c240_i32_80 = arith.constant 240 : i32
    %341 = tpu.dynamic_rotate %17 by %c240_i32_80 dim 1 : vector<1x256xf32>, i32 -> vector<1x256xf32>
    %342 = vector.broadcast %340 : f32 to vector<1x256xf32>
    %343 = arith.mulf %342, %341 : vector<1x256xf32>
    %344 = arith.addf %339, %343 : vector<1x256xf32>
    %c30 = arith.constant 30 : index
    %345 = memref.load %arg3[%c30] : memref<98xf32, #tpu.memory_space<smem>>
    %c240_i32_81 = arith.constant 240 : i32
    %346 = tpu.dynamic_rotate %20 by %c240_i32_81 dim 1 : vector<1x256xf32>, i32 -> vector<1x256xf32>
    %347 = vector.broadcast %345 : f32 to vector<1x256xf32>
    %348 = arith.mulf %347, %346 : vector<1x256xf32>
    %349 = arith.addf %344, %348 : vector<1x256xf32>
    %c79 = arith.constant 79 : index
    %350 = memref.load %arg3[%c79] : memref<98xf32, #tpu.memory_space<smem>>
    %c240_i32_82 = arith.constant 240 : i32
    %351 = tpu.dynamic_rotate %22 by %c240_i32_82 dim 1 : vector<1x256xf32>, i32 -> vector<1x256xf32>
    %352 = vector.broadcast %350 : f32 to vector<1x256xf32>
    %353 = arith.mulf %352, %351 : vector<1x256xf32>
    %354 = arith.addf %349, %353 : vector<1x256xf32>
    %c31 = arith.constant 31 : index
    %355 = memref.load %arg3[%c31] : memref<98xf32, #tpu.memory_space<smem>>
    %c240_i32_83 = arith.constant 240 : i32
    %356 = tpu.dynamic_rotate %24 by %c240_i32_83 dim 1 : vector<1x256xf32>, i32 -> vector<1x256xf32>
    %357 = vector.broadcast %355 : f32 to vector<1x256xf32>
    %358 = arith.mulf %357, %356 : vector<1x256xf32>
    %359 = arith.addf %354, %358 : vector<1x256xf32>
    %c80 = arith.constant 80 : index
    %360 = memref.load %arg3[%c80] : memref<98xf32, #tpu.memory_space<smem>>
    %c240_i32_84 = arith.constant 240 : i32
    %361 = tpu.dynamic_rotate %25 by %c240_i32_84 dim 1 : vector<1x256xf32>, i32 -> vector<1x256xf32>
    %362 = vector.broadcast %360 : f32 to vector<1x256xf32>
    %363 = arith.mulf %362, %361 : vector<1x256xf32>
    %364 = arith.addf %359, %363 : vector<1x256xf32>
    %c32 = arith.constant 32 : index
    %365 = memref.load %arg3[%c32] : memref<98xf32, #tpu.memory_space<smem>>
    %c240_i32_85 = arith.constant 240 : i32
    %366 = tpu.dynamic_rotate %28 by %c240_i32_85 dim 1 : vector<1x256xf32>, i32 -> vector<1x256xf32>
    %367 = vector.broadcast %365 : f32 to vector<1x256xf32>
    %368 = arith.mulf %367, %366 : vector<1x256xf32>
    %369 = arith.addf %364, %368 : vector<1x256xf32>
    %c81 = arith.constant 81 : index
    %370 = memref.load %arg3[%c81] : memref<98xf32, #tpu.memory_space<smem>>
    %c240_i32_86 = arith.constant 240 : i32
    %371 = tpu.dynamic_rotate %30 by %c240_i32_86 dim 1 : vector<1x256xf32>, i32 -> vector<1x256xf32>
    %372 = vector.broadcast %370 : f32 to vector<1x256xf32>
    %373 = arith.mulf %372, %371 : vector<1x256xf32>
    %374 = arith.addf %369, %373 : vector<1x256xf32>
    %c33 = arith.constant 33 : index
    %375 = memref.load %arg3[%c33] : memref<98xf32, #tpu.memory_space<smem>>
    %c240_i32_87 = arith.constant 240 : i32
    %376 = tpu.dynamic_rotate %33 by %c240_i32_87 dim 1 : vector<1x256xf32>, i32 -> vector<1x256xf32>
    %377 = vector.broadcast %375 : f32 to vector<1x256xf32>
    %378 = arith.mulf %377, %376 : vector<1x256xf32>
    %379 = arith.addf %374, %378 : vector<1x256xf32>
    %c82 = arith.constant 82 : index
    %380 = memref.load %arg3[%c82] : memref<98xf32, #tpu.memory_space<smem>>
    %c240_i32_88 = arith.constant 240 : i32
    %381 = tpu.dynamic_rotate %35 by %c240_i32_88 dim 1 : vector<1x256xf32>, i32 -> vector<1x256xf32>
    %382 = vector.broadcast %380 : f32 to vector<1x256xf32>
    %383 = arith.mulf %382, %381 : vector<1x256xf32>
    %384 = arith.addf %379, %383 : vector<1x256xf32>
    %c34 = arith.constant 34 : index
    %385 = memref.load %arg3[%c34] : memref<98xf32, #tpu.memory_space<smem>>
    %c240_i32_89 = arith.constant 240 : i32
    %386 = tpu.dynamic_rotate %38 by %c240_i32_89 dim 1 : vector<1x256xf32>, i32 -> vector<1x256xf32>
    %387 = vector.broadcast %385 : f32 to vector<1x256xf32>
    %388 = arith.mulf %387, %386 : vector<1x256xf32>
    %389 = arith.addf %384, %388 : vector<1x256xf32>
    %c83 = arith.constant 83 : index
    %390 = memref.load %arg3[%c83] : memref<98xf32, #tpu.memory_space<smem>>
    %c240_i32_90 = arith.constant 240 : i32
    %391 = tpu.dynamic_rotate %40 by %c240_i32_90 dim 1 : vector<1x256xf32>, i32 -> vector<1x256xf32>
    %392 = vector.broadcast %390 : f32 to vector<1x256xf32>
    %393 = arith.mulf %392, %391 : vector<1x256xf32>
    %394 = arith.addf %389, %393 : vector<1x256xf32>
    %c11_91 = arith.constant 11 : index
    %c0_92 = arith.constant 0 : index
    %395 = vector.load %arg2[%c11_91, %c0_92] : memref<14x256xf32, #tpu.memory_space<vmem>>, vector<1x256xf32>
    %396 = arith.mulf %394, %395 : vector<1x256xf32>
    %397 = arith.addf %323, %396 : vector<1x256xf32>
    %cst_93 = arith.constant 0.000000e+00 : f32
    %398 = vector.broadcast %cst_93 : f32 to vector<1x256xf32>
    %c35 = arith.constant 35 : index
    %399 = memref.load %arg3[%c35] : memref<98xf32, #tpu.memory_space<smem>>
    %c224_i32 = arith.constant 224 : i32
    %400 = tpu.dynamic_rotate %10 by %c224_i32 dim 1 : vector<1x256xf32>, i32 -> vector<1x256xf32>
    %401 = vector.broadcast %399 : f32 to vector<1x256xf32>
    %402 = arith.mulf %401, %400 : vector<1x256xf32>
    %403 = arith.addf %398, %402 : vector<1x256xf32>
    %c84 = arith.constant 84 : index
    %404 = memref.load %arg3[%c84] : memref<98xf32, #tpu.memory_space<smem>>
    %c224_i32_94 = arith.constant 224 : i32
    %405 = tpu.dynamic_rotate %12 by %c224_i32_94 dim 1 : vector<1x256xf32>, i32 -> vector<1x256xf32>
    %406 = vector.broadcast %404 : f32 to vector<1x256xf32>
    %407 = arith.mulf %406, %405 : vector<1x256xf32>
    %408 = arith.addf %403, %407 : vector<1x256xf32>
    %c36 = arith.constant 36 : index
    %409 = memref.load %arg3[%c36] : memref<98xf32, #tpu.memory_space<smem>>
    %c224_i32_95 = arith.constant 224 : i32
    %410 = tpu.dynamic_rotate %15 by %c224_i32_95 dim 1 : vector<1x256xf32>, i32 -> vector<1x256xf32>
    %411 = vector.broadcast %409 : f32 to vector<1x256xf32>
    %412 = arith.mulf %411, %410 : vector<1x256xf32>
    %413 = arith.addf %408, %412 : vector<1x256xf32>
    %c85 = arith.constant 85 : index
    %414 = memref.load %arg3[%c85] : memref<98xf32, #tpu.memory_space<smem>>
    %c224_i32_96 = arith.constant 224 : i32
    %415 = tpu.dynamic_rotate %17 by %c224_i32_96 dim 1 : vector<1x256xf32>, i32 -> vector<1x256xf32>
    %416 = vector.broadcast %414 : f32 to vector<1x256xf32>
    %417 = arith.mulf %416, %415 : vector<1x256xf32>
    %418 = arith.addf %413, %417 : vector<1x256xf32>
    %c37 = arith.constant 37 : index
    %419 = memref.load %arg3[%c37] : memref<98xf32, #tpu.memory_space<smem>>
    %c224_i32_97 = arith.constant 224 : i32
    %420 = tpu.dynamic_rotate %20 by %c224_i32_97 dim 1 : vector<1x256xf32>, i32 -> vector<1x256xf32>
    %421 = vector.broadcast %419 : f32 to vector<1x256xf32>
    %422 = arith.mulf %421, %420 : vector<1x256xf32>
    %423 = arith.addf %418, %422 : vector<1x256xf32>
    %c86 = arith.constant 86 : index
    %424 = memref.load %arg3[%c86] : memref<98xf32, #tpu.memory_space<smem>>
    %c224_i32_98 = arith.constant 224 : i32
    %425 = tpu.dynamic_rotate %22 by %c224_i32_98 dim 1 : vector<1x256xf32>, i32 -> vector<1x256xf32>
    %426 = vector.broadcast %424 : f32 to vector<1x256xf32>
    %427 = arith.mulf %426, %425 : vector<1x256xf32>
    %428 = arith.addf %423, %427 : vector<1x256xf32>
    %c38 = arith.constant 38 : index
    %429 = memref.load %arg3[%c38] : memref<98xf32, #tpu.memory_space<smem>>
    %c224_i32_99 = arith.constant 224 : i32
    %430 = tpu.dynamic_rotate %24 by %c224_i32_99 dim 1 : vector<1x256xf32>, i32 -> vector<1x256xf32>
    %431 = vector.broadcast %429 : f32 to vector<1x256xf32>
    %432 = arith.mulf %431, %430 : vector<1x256xf32>
    %433 = arith.addf %428, %432 : vector<1x256xf32>
    %c87 = arith.constant 87 : index
    %434 = memref.load %arg3[%c87] : memref<98xf32, #tpu.memory_space<smem>>
    %c224_i32_100 = arith.constant 224 : i32
    %435 = tpu.dynamic_rotate %25 by %c224_i32_100 dim 1 : vector<1x256xf32>, i32 -> vector<1x256xf32>
    %436 = vector.broadcast %434 : f32 to vector<1x256xf32>
    %437 = arith.mulf %436, %435 : vector<1x256xf32>
    %438 = arith.addf %433, %437 : vector<1x256xf32>
    %c39 = arith.constant 39 : index
    %439 = memref.load %arg3[%c39] : memref<98xf32, #tpu.memory_space<smem>>
    %c224_i32_101 = arith.constant 224 : i32
    %440 = tpu.dynamic_rotate %28 by %c224_i32_101 dim 1 : vector<1x256xf32>, i32 -> vector<1x256xf32>
    %441 = vector.broadcast %439 : f32 to vector<1x256xf32>
    %442 = arith.mulf %441, %440 : vector<1x256xf32>
    %443 = arith.addf %438, %442 : vector<1x256xf32>
    %c88 = arith.constant 88 : index
    %444 = memref.load %arg3[%c88] : memref<98xf32, #tpu.memory_space<smem>>
    %c224_i32_102 = arith.constant 224 : i32
    %445 = tpu.dynamic_rotate %30 by %c224_i32_102 dim 1 : vector<1x256xf32>, i32 -> vector<1x256xf32>
    %446 = vector.broadcast %444 : f32 to vector<1x256xf32>
    %447 = arith.mulf %446, %445 : vector<1x256xf32>
    %448 = arith.addf %443, %447 : vector<1x256xf32>
    %c40 = arith.constant 40 : index
    %449 = memref.load %arg3[%c40] : memref<98xf32, #tpu.memory_space<smem>>
    %c224_i32_103 = arith.constant 224 : i32
    %450 = tpu.dynamic_rotate %33 by %c224_i32_103 dim 1 : vector<1x256xf32>, i32 -> vector<1x256xf32>
    %451 = vector.broadcast %449 : f32 to vector<1x256xf32>
    %452 = arith.mulf %451, %450 : vector<1x256xf32>
    %453 = arith.addf %448, %452 : vector<1x256xf32>
    %c89 = arith.constant 89 : index
    %454 = memref.load %arg3[%c89] : memref<98xf32, #tpu.memory_space<smem>>
    %c224_i32_104 = arith.constant 224 : i32
    %455 = tpu.dynamic_rotate %35 by %c224_i32_104 dim 1 : vector<1x256xf32>, i32 -> vector<1x256xf32>
    %456 = vector.broadcast %454 : f32 to vector<1x256xf32>
    %457 = arith.mulf %456, %455 : vector<1x256xf32>
    %458 = arith.addf %453, %457 : vector<1x256xf32>
    %c41 = arith.constant 41 : index
    %459 = memref.load %arg3[%c41] : memref<98xf32, #tpu.memory_space<smem>>
    %c224_i32_105 = arith.constant 224 : i32
    %460 = tpu.dynamic_rotate %38 by %c224_i32_105 dim 1 : vector<1x256xf32>, i32 -> vector<1x256xf32>
    %461 = vector.broadcast %459 : f32 to vector<1x256xf32>
    %462 = arith.mulf %461, %460 : vector<1x256xf32>
    %463 = arith.addf %458, %462 : vector<1x256xf32>
    %c90 = arith.constant 90 : index
    %464 = memref.load %arg3[%c90] : memref<98xf32, #tpu.memory_space<smem>>
    %c224_i32_106 = arith.constant 224 : i32
    %465 = tpu.dynamic_rotate %40 by %c224_i32_106 dim 1 : vector<1x256xf32>, i32 -> vector<1x256xf32>
    %466 = vector.broadcast %464 : f32 to vector<1x256xf32>
    %467 = arith.mulf %466, %465 : vector<1x256xf32>
    %468 = arith.addf %463, %467 : vector<1x256xf32>
    %c12_107 = arith.constant 12 : index
    %c0_108 = arith.constant 0 : index
    %469 = vector.load %arg2[%c12_107, %c0_108] : memref<14x256xf32, #tpu.memory_space<vmem>>, vector<1x256xf32>
    %470 = arith.mulf %468, %469 : vector<1x256xf32>
    %471 = arith.addf %397, %470 : vector<1x256xf32>
    %cst_109 = arith.constant 0.000000e+00 : f32
    %472 = vector.broadcast %cst_109 : f32 to vector<1x256xf32>
    %c42 = arith.constant 42 : index
    %473 = memref.load %arg3[%c42] : memref<98xf32, #tpu.memory_space<smem>>
    %c208_i32 = arith.constant 208 : i32
    %474 = tpu.dynamic_rotate %10 by %c208_i32 dim 1 : vector<1x256xf32>, i32 -> vector<1x256xf32>
    %475 = vector.broadcast %473 : f32 to vector<1x256xf32>
    %476 = arith.mulf %475, %474 : vector<1x256xf32>
    %477 = arith.addf %472, %476 : vector<1x256xf32>
    %c91 = arith.constant 91 : index
    %478 = memref.load %arg3[%c91] : memref<98xf32, #tpu.memory_space<smem>>
    %c208_i32_110 = arith.constant 208 : i32
    %479 = tpu.dynamic_rotate %12 by %c208_i32_110 dim 1 : vector<1x256xf32>, i32 -> vector<1x256xf32>
    %480 = vector.broadcast %478 : f32 to vector<1x256xf32>
    %481 = arith.mulf %480, %479 : vector<1x256xf32>
    %482 = arith.addf %477, %481 : vector<1x256xf32>
    %c43 = arith.constant 43 : index
    %483 = memref.load %arg3[%c43] : memref<98xf32, #tpu.memory_space<smem>>
    %c208_i32_111 = arith.constant 208 : i32
    %484 = tpu.dynamic_rotate %15 by %c208_i32_111 dim 1 : vector<1x256xf32>, i32 -> vector<1x256xf32>
    %485 = vector.broadcast %483 : f32 to vector<1x256xf32>
    %486 = arith.mulf %485, %484 : vector<1x256xf32>
    %487 = arith.addf %482, %486 : vector<1x256xf32>
    %c92 = arith.constant 92 : index
    %488 = memref.load %arg3[%c92] : memref<98xf32, #tpu.memory_space<smem>>
    %c208_i32_112 = arith.constant 208 : i32
    %489 = tpu.dynamic_rotate %17 by %c208_i32_112 dim 1 : vector<1x256xf32>, i32 -> vector<1x256xf32>
    %490 = vector.broadcast %488 : f32 to vector<1x256xf32>
    %491 = arith.mulf %490, %489 : vector<1x256xf32>
    %492 = arith.addf %487, %491 : vector<1x256xf32>
    %c44 = arith.constant 44 : index
    %493 = memref.load %arg3[%c44] : memref<98xf32, #tpu.memory_space<smem>>
    %c208_i32_113 = arith.constant 208 : i32
    %494 = tpu.dynamic_rotate %20 by %c208_i32_113 dim 1 : vector<1x256xf32>, i32 -> vector<1x256xf32>
    %495 = vector.broadcast %493 : f32 to vector<1x256xf32>
    %496 = arith.mulf %495, %494 : vector<1x256xf32>
    %497 = arith.addf %492, %496 : vector<1x256xf32>
    %c93 = arith.constant 93 : index
    %498 = memref.load %arg3[%c93] : memref<98xf32, #tpu.memory_space<smem>>
    %c208_i32_114 = arith.constant 208 : i32
    %499 = tpu.dynamic_rotate %22 by %c208_i32_114 dim 1 : vector<1x256xf32>, i32 -> vector<1x256xf32>
    %500 = vector.broadcast %498 : f32 to vector<1x256xf32>
    %501 = arith.mulf %500, %499 : vector<1x256xf32>
    %502 = arith.addf %497, %501 : vector<1x256xf32>
    %c45 = arith.constant 45 : index
    %503 = memref.load %arg3[%c45] : memref<98xf32, #tpu.memory_space<smem>>
    %c208_i32_115 = arith.constant 208 : i32
    %504 = tpu.dynamic_rotate %24 by %c208_i32_115 dim 1 : vector<1x256xf32>, i32 -> vector<1x256xf32>
    %505 = vector.broadcast %503 : f32 to vector<1x256xf32>
    %506 = arith.mulf %505, %504 : vector<1x256xf32>
    %507 = arith.addf %502, %506 : vector<1x256xf32>
    %c94 = arith.constant 94 : index
    %508 = memref.load %arg3[%c94] : memref<98xf32, #tpu.memory_space<smem>>
    %c208_i32_116 = arith.constant 208 : i32
    %509 = tpu.dynamic_rotate %25 by %c208_i32_116 dim 1 : vector<1x256xf32>, i32 -> vector<1x256xf32>
    %510 = vector.broadcast %508 : f32 to vector<1x256xf32>
    %511 = arith.mulf %510, %509 : vector<1x256xf32>
    %512 = arith.addf %507, %511 : vector<1x256xf32>
    %c46 = arith.constant 46 : index
    %513 = memref.load %arg3[%c46] : memref<98xf32, #tpu.memory_space<smem>>
    %c208_i32_117 = arith.constant 208 : i32
    %514 = tpu.dynamic_rotate %28 by %c208_i32_117 dim 1 : vector<1x256xf32>, i32 -> vector<1x256xf32>
    %515 = vector.broadcast %513 : f32 to vector<1x256xf32>
    %516 = arith.mulf %515, %514 : vector<1x256xf32>
    %517 = arith.addf %512, %516 : vector<1x256xf32>
    %c95 = arith.constant 95 : index
    %518 = memref.load %arg3[%c95] : memref<98xf32, #tpu.memory_space<smem>>
    %c208_i32_118 = arith.constant 208 : i32
    %519 = tpu.dynamic_rotate %30 by %c208_i32_118 dim 1 : vector<1x256xf32>, i32 -> vector<1x256xf32>
    %520 = vector.broadcast %518 : f32 to vector<1x256xf32>
    %521 = arith.mulf %520, %519 : vector<1x256xf32>
    %522 = arith.addf %517, %521 : vector<1x256xf32>
    %c47 = arith.constant 47 : index
    %523 = memref.load %arg3[%c47] : memref<98xf32, #tpu.memory_space<smem>>
    %c208_i32_119 = arith.constant 208 : i32
    %524 = tpu.dynamic_rotate %33 by %c208_i32_119 dim 1 : vector<1x256xf32>, i32 -> vector<1x256xf32>
    %525 = vector.broadcast %523 : f32 to vector<1x256xf32>
    %526 = arith.mulf %525, %524 : vector<1x256xf32>
    %527 = arith.addf %522, %526 : vector<1x256xf32>
    %c96 = arith.constant 96 : index
    %528 = memref.load %arg3[%c96] : memref<98xf32, #tpu.memory_space<smem>>
    %c208_i32_120 = arith.constant 208 : i32
    %529 = tpu.dynamic_rotate %35 by %c208_i32_120 dim 1 : vector<1x256xf32>, i32 -> vector<1x256xf32>
    %530 = vector.broadcast %528 : f32 to vector<1x256xf32>
    %531 = arith.mulf %530, %529 : vector<1x256xf32>
    %532 = arith.addf %527, %531 : vector<1x256xf32>
    %c48 = arith.constant 48 : index
    %533 = memref.load %arg3[%c48] : memref<98xf32, #tpu.memory_space<smem>>
    %c208_i32_121 = arith.constant 208 : i32
    %534 = tpu.dynamic_rotate %38 by %c208_i32_121 dim 1 : vector<1x256xf32>, i32 -> vector<1x256xf32>
    %535 = vector.broadcast %533 : f32 to vector<1x256xf32>
    %536 = arith.mulf %535, %534 : vector<1x256xf32>
    %537 = arith.addf %532, %536 : vector<1x256xf32>
    %c97 = arith.constant 97 : index
    %538 = memref.load %arg3[%c97] : memref<98xf32, #tpu.memory_space<smem>>
    %c208_i32_122 = arith.constant 208 : i32
    %539 = tpu.dynamic_rotate %40 by %c208_i32_122 dim 1 : vector<1x256xf32>, i32 -> vector<1x256xf32>
    %540 = vector.broadcast %538 : f32 to vector<1x256xf32>
    %541 = arith.mulf %540, %539 : vector<1x256xf32>
    %542 = arith.addf %537, %541 : vector<1x256xf32>
    %c13_123 = arith.constant 13 : index
    %c0_124 = arith.constant 0 : index
    %543 = vector.load %arg2[%c13_123, %c0_124] : memref<14x256xf32, #tpu.memory_space<vmem>>, vector<1x256xf32>
    %544 = arith.mulf %542, %543 : vector<1x256xf32>
    %545 = arith.addf %471, %544 : vector<1x256xf32>
    %546 = arith.negf %545 : vector<1x256xf32>
    %547 = math.exp %546 : vector<1x256xf32>
    %cst_125 = arith.constant 1.000000e+00 : f32
    %548 = vector.broadcast %cst_125 : f32 to vector<1x256xf32>
    %549 = arith.addf %548, %547 : vector<1x256xf32>
    %550 = arith.divf %548, %549 : vector<1x256xf32>
    %c0_126 = arith.constant 0 : index
    %c0_127 = arith.constant 0 : index
    %c0_128 = arith.constant 0 : index
    %551 = vector.load %arg1[%c0_126, %c0_127, %c0_128] : memref<1x4x256xf32, #tpu.memory_space<vmem>>, vector<1x4x256xf32>
    %552 = vector.shape_cast %551 : vector<1x4x256xf32> to vector<4x256xf32>
    %553 = vector.broadcast %550 : vector<1x256xf32> to vector<4x256xf32>
    %554 = arith.mulf %552, %553 : vector<4x256xf32>
    %c0_129 = arith.constant 0 : index
    %c0_130 = arith.constant 0 : index
    %c0_131 = arith.constant 0 : index
    %555 = vector.load %arg4[%c0_129, %c0_130, %c0_131] : memref<1x4x256xf32, #tpu.memory_space<vmem>>, vector<1x4x256xf32>
    %556 = vector.shape_cast %555 : vector<1x4x256xf32> to vector<4x256xf32>
    %557 = vector.shape_cast %554 : vector<4x256xf32> to vector<1x4x256xf32>
    tpu.vector_store %arg4[%c0_129, %c0_130, %c0_131], %557 {strides = array<i32>} : memref<1x4x256xf32, #tpu.memory_space<vmem>>, vector<1x4x256xf32>,
    return
  }
  func.func @transform_0(%arg0: i32) -> (i32, i32, i32) {
    %c0_i32 = arith.constant 0 : i32
    %c0_i32_0 = arith.constant 0 : i32
    %c0_i32_1 = arith.constant 0 : i32
    return %arg0, %c0_i32, %c0_i32_0 : i32, i32, i32
  }
  func.func @transform_1(%arg0: i32) -> (i32, i32) {
    %c0_i32 = arith.constant 0 : i32
    %c0_i32_0 = arith.constant 0 : i32
    %c0_i32_1 = arith.constant 0 : i32
    return %c0_i32, %c0_i32_0 : i32, i32
  }
  func.func @transform_2(%arg0: i32) -> i32 {
    %c0_i32 = arith.constant 0 : i32
    %c0_i32_0 = arith.constant 0 : i32
    return %c0_i32 : i32
  }
  func.func @transform_3(%arg0: i32) -> (i32, i32, i32) {
    %c0_i32 = arith.constant 0 : i32
    %c0_i32_0 = arith.constant 0 : i32
    %c0_i32_1 = arith.constant 0 : i32
    return %arg0, %c0_i32, %c0_i32_0 : i32, i32, i32
  }
}

</mosaic_0001>

<bundles_post_ra>
// kernel: tpu_custom_call.1
= control target key start
LH: loop header
LB: loop body
LE: loop exit
PB: predicated region body
PF: predicated region fallthrough
CT: control target
= control target key end

     0   :  { %s4152_s0 = inlined_call_operand.hbm [shape: f32[2,4,256], index: 0, kind: input, shape index: {}]   ;;  %s4153_s1 = inlined_call_operand.hbm [shape: f32[14,256], index: 1, kind: input, shape index: {}]   ;;  %s4154_s2 = inlined_call_operand.vmem [shape: f32[98], index: 2, kind: input, shape index: {}]   ;;  %s4155_s3 = inlined_call_operand.hbm [shape: f32[2,4,256], index: 3, kind: output, shape index: {}]  }
   0x1   :  { %4223 = sst [smem:[#allocation70_spill]] %s4152_s0 }
   0x2   :  { %4224 = sst [smem:[#allocation71_spill]] %s4153_s1 }
   0x3   :  { %4225 = sst [smem:[#allocation72_spill]] %s4154_s2 }
   0x4   :  { %8 = vsyncpa [#allocation3], 0 }
   0x5   :  { %10 = vsyncpa [#allocation3 + $0x1], 0 }
   0x6   :  { %11 = vsyncpa [#allocation7], 0 }
   0x7   :  { %12 = vsyncpa [#allocation5], 0 }
   0x8   :  { %13 = vsyncpa [#allocation4], 0 }
   0x9   :  { %15 = vsyncpa [#allocation4 + $0x1], 0  ;;  %s2196_s12 = smov 0   ;;  %s2198_s13 = smov 0  }
   0xa   :  { %s2200_s14 = smov 0   ;;  %s2202_s15 = smov 0  }
   0xb LB: > { %4226 = sst [smem:[#allocation14_spill]] %s2144_s12  ;;  %s2217_s16 = sadd.s32 4294967295, %s2156_s15   ;;  %s2156_s15 = sphi %s2202_s15, %s4391_s15   ;;  %s2152_s14 = sphi %s2200_s14, %s4394_s14   ;;  %s2148_s13 = sphi %s2198_s13, %s4393_s13   ;;  %s2144_s12 = sphi %s2196_s12, %s4392_s12  }
   0xc   : > { %4227 = sst [smem:[#allocation15_spill]] %s2148_s13  ;;  %s1799_s17 = sadd.s32 4294967294, %s2156_s15  }
   0xd   : > { %4228 = sst [smem:[#allocation16_spill]] %s2152_s14  ;;  %p41_p0 = scmp.ne.s32.totalorder %s2148_s13, %s2144_s12 }
   0xe   : > { %4229 = sst [smem:[#allocation17_spill]] %s2156_s15  ;;  %p4156_p1 = scmp.eq.s32.totalorder %s2217_s16, 0 }
   0xf   : > { %p113_p3 = scmp.eq.s32.totalorder %s1799_s17, 1  ;;  %p1800_p5 = scmp.ge.s32.totalorder %s2156_s15, 1 }
  0x10   : > { %p2226_p4 = por %p4156_p1, %p41_p0  ;;  %p120_p7 = scmp.lt.s32.totalorder %s2156_s15, 3 }
  0x11   : > { %p2231_p6 = por %p113_p3, %p41_p0  ;;  %s2158_s21 = smov [#allocation6]  }
  0x12   : > { %s4230_s18 = scalar_select %p2226_p4, 1, 0 }
  0x13   : > { %s4231_s19 = scalar_select %p2231_p6, 1, 0 }
  0x14   : > { %p2236_p8 = pnand %p1800_p5, %p120_p7  ;;  %s132_s22 = sshll.u32 %s2158_s21, 4  ;;  %s133_s22 = int_to_ptr.vmem [resolvable:$true] %s132_s22 }
  0x15   : > { %4232 = sst [smem:[#allocation18_spill]] %s4231_s19  ;;  %s4234_s2 = sld [smem:[#allocation72_spill]] }
  0x16   : > { %s4233_s20 = scalar_select %p2236_p8, 1, 0 }
  0x17   : > { %p1930_p9 = pneg %p2236_p8  ;;  %s4236_s1 = sld [smem:[#allocation71_spill]] }
  0x19   : > { %p2248_p11 = pnand %p1930_p9, %p4156_p1 }
  0x1b   : > { %s146_s25 = sshll.u32 %s4234_s2, 4  ;;  %p2011_p13 = pneg %p2248_p11  ;;  %s2252_s25 = int_to_ptr.vmem [resolvable:$true] %s146_s25 }
  0x1d   : > { %s2009_s29 = scalar_lea.hbm %s4236_s1, 512 }
  0x1e   : > { %p2010_p12 = scmp.ne.s32.totalorder %s4236_s1, %s2009_s29  ;;  %p2016_p5 = scmp.lt.u32.totalorder %s2009_s29, %s4236_s1 }
  0x20   : > { %p2012_p0 = pnand %p2011_p13, %p2010_p12 }
  0x22   : > { %p2013_p3 = pneg %p2012_p0 }
  0x24   : > { %p2018_p7 = pnand %p2016_p5, %p2013_p3 }
  0x26   : > { %2021 = shalt.err (!%p2018_p7)
}
  0x27   : > { %s2022_s7 = scalar_lea.vmem %s133_s22, 512  ;;  %p2030_p2 = scmp.lt.s32.totalorder %s133_s22, %s133_s22 }
  0x28   : > { %p2023_p9 = scmp.ne.s32.totalorder %s133_s22, %s2022_s7  ;;  %p2031_p6 = scmp.lt.s32.totalorder %s2022_s7, %s2022_s7 }
  0x2a   : > { %p2025_p10 = pnand %p2023_p9, %p2011_p13  ;;  %p2032_p4 = por %p2031_p6, %p2030_p2 }
  0x2c   : > { %p2026_p1 = pneg %p2025_p10 }
  0x2e   : > { %p2033_p8 = pnand %p2032_p4, %p2026_p1 }
  0x30   : > { %2036 = shalt.err (!%p2033_p8)
}
  0x31   : > { %s2159_s8 = smov 256   ;;  %s2160_s9 = smov 16  }
  0x32   : > { %1933 = dma.hbm_to_vmem [thread:$0]  (!%p2248_p11), %s4236_s1, 512, %s133_s22, [#allocation7], %s2159_s8, %s2159_s8, %s2160_s9  }
  0x33   : > { %s2037_s17 = scalar_lea.vmem %s2252_s25, 16  ;;  %p2045_p1 = scmp.lt.s32.totalorder %s2252_s25, %s2252_s25 }
  0x34   : > { %p2038_p12 = scmp.ne.s32.totalorder %s2252_s25, %s2037_s17  ;;  %p2046_p4 = scmp.lt.s32.totalorder %s2037_s17, %s2037_s17 }
  0x36   : > { %p2040_p10 = pnand %p2038_p12, %p2011_p13  ;;  %p2047_p6 = por %p2046_p4, %p2045_p1 }
  0x38   : > { %p2041_p2 = pneg %p2040_p10 }
  0x3a   : > { %p2048_p8 = pnand %p2047_p6, %p2041_p2 }
  0x3c   : > { %2051 = shalt.err (!%p2048_p8)
}
  0x3d   : > { %s2161_s21 = smov [#allocation8]   ;;  %s2287_s22 = sadd.s32 1, %s2156_s15  }
  0x3e   : > { %1936 = dma.vmem_to_smem (!%p2248_p11), %s2252_s25, 16, %s2161_s21, [#allocation5]  }
  0x3f   : > { %4237 = sst [smem:[#allocation19_spill]] %s2287_s22  ;;  %s28_s23 = sadd.s32 1, %s2152_s14 }
  0x40   : > { %s25_s24 = ssub.s32 %s2156_s15, %s2287_s22  ;;  %p35_p13 = scmp.ne.s32.totalorder %s2152_s14, %s2148_s13 }
  0x41   : > { %p26_p0 = scmp.eq.s32.totalorder %s25_s24, 0  ;;  %p36_p3 = scmp.eq.s32.totalorder %s2156_s15, 0 }
  0x42   : > { %p4238_p5 = scmp.eq.s32.totalorder %s2217_s16, 1  ;;  %p1947_p9 = scmp.lt.s32.totalorder %s2156_s15, 2 }
  0x43   : > { %s2303_s27 = scalar_select %p26_p0, %s2152_s14, %s28_s23  }
  0x44   : > { %p2297_p7 = por %p4238_p5, %p35_p13  ;;  %p37_p12 = por %p36_p3, %p35_p13 }
  0x45   : > { %4240 = sst [smem:[#allocation20_spill]] %s2303_s27  ;;  %s157_s28 = sand.u32 1, %s2152_s14  }
  0x46   : > { %s1804_s29 = sshll.u32 %s157_s28, 3  ;;  %s1916_s25 = sshll.u32 %s2156_s15, 7 }
  0x47   : > { %s4241_s0 = sld [smem:[#allocation70_spill]]  ;;  %s161_s6 = scalar_lea.vmem [#allocation2], %s1804_s29 }
  0x48   : > { %s169_s7 = sshll.u32 %s161_s6, 4  ;;  %p2314_p11 = pnand %p1947_p9, %p37_p12  ;;  %s2312_s7 = int_to_ptr.vmem [resolvable:$true] %s169_s7 }
  0x49   : > { %s158_s9 = scalar_lea.sflag [#allocation3], %s157_s28 }
  0x4a   : > { %p2054_p2 = pneg %p2314_p11 }
  0x4d   : > { %s2310_s5 = scalar_lea.hbm %s4241_s0, %s1916_s25  ;;  %s2057_s21 = scalar_lea.hbm %s4241_s0, 256 }
  0x4e   : > { %s2052_s10 = scalar_lea.hbm %s2310_s5, 128  ;;  %p2058_p6 = scmp.lt.u32.totalorder %s2310_s5, %s4241_s0 }
  0x4f   : > { %p2053_p10 = scmp.ne.s32.totalorder %s2310_s5, %s2052_s10  ;;  %p2059_p8 = scmp.lt.u32.totalorder %s2057_s21, %s2052_s10 }
  0x50   : > { %p2061_p0 = scmp.lt.u32.totalorder %s2052_s10, %s2310_s5 }
  0x51   : > { %p2055_p1 = pnand %p2054_p2, %p2053_p10  ;;  %p2060_p13 = por %p2059_p8, %p2058_p6 }
  0x53   : > { %p2056_p4 = pneg %p2055_p1  ;;  %p2062_p3 = por %p2061_p0, %p2060_p13 }
  0x55   : > { %p2063_p5 = pnand %p2062_p3, %p2056_p4 }
  0x57   : > { %2066 = shalt.err (!%p2063_p5)
}
  0x58   : > { %s2067_s28 = scalar_lea.vmem %s2312_s7, 128  ;;  %s2162_s29 = smov [#allocation2]  }
  0x59   : > { %p2068_p9 = scmp.ne.s32.totalorder %s2312_s7, %s2067_s28  ;;  %s2072_s25 = sshll.u32 %s2162_s29, 4  ;;  %s2073_s25 = int_to_ptr.vmem [resolvable:$false] %s2072_s25 }
  0x5a   : > { %s2074_s30 = scalar_lea.vmem %s2073_s25, 256  ;;  %p2075_p1 = scmp.lt.s32.totalorder %s2312_s7, %s2073_s25 }
  0x5b   : > { %p2070_p12 = pnand %p2068_p9, %p2054_p2  ;;  %p2076_p6 = scmp.lt.s32.totalorder %s2074_s30, %s2067_s28 }
  0x5d   : > { %p2071_p10 = pneg %p2070_p12  ;;  %p2077_p8 = por %p2076_p6, %p2075_p1 }
  0x5f   : > { %p2078_p13 = pnand %p2077_p8, %p2071_p10 }
  0x61   : > { %2081 = shalt.err (!%p2078_p13)
}
  0x62   : > { %1940 = dma.hbm_to_vmem [thread:$0]  (!%p2314_p11), %s2310_s5, 128, %s2312_s7, %s158_s9  }
  0x63   : > { %p4243_p4 = scmp.ne.s32.totalorder %s4233_s20, 0 }
  0x65   : > { %178 = sbr.rel (%p4243_p4) target bundleno = 768 (0x300), region = 32 }
  0x6c   : > { %s2346_s4 = sand.u32 1, %s2148_s13   ;;  %p4244_p2 = scmp.ne.s32.totalorder %s4230_s18, 0 }
  0x6d   : > { %s4210_s6 = sshll.u32 %s2346_s4, 3  ;;  %s181_s10 = scalar_lea.sflag [#allocation3], %s2346_s4 }
  0x6e   : > { %s2352_s11 = scalar_lea.vmem [#allocation2], %s4210_s6 }
  0x6f   : > { %2127 = dma.done.wait (%p4244_p2), %s181_s10, 128  }
  0x70   : > { %2129 = vsyncadd (%p4244_p2), %s181_s10, 4294967168  ;;  %p4245_p11 = scmp.eq.s32.totalorder %s2217_s16, 0 }
  0x72   : > { %2131 = dma.done.wait (%p4245_p11), [#allocation7], 512   ;;  %p4246_p0 = pmov %p4245_p11 }
  0x74   : > { %2133 = vsyncadd (%p4246_p0), [#allocation7], 4294966784  ;;  %p4247_p3 = pmov %p4246_p0 }
  0x75   : > { %p4248_p5 = pmov %p4246_p0 }
  0x76   : > { %2135 = dma.done.wait (%p4247_p3), [#allocation5], 16  }
  0x77   : > { %2137 = vsyncadd (%p4248_p5), [#allocation5], 4294967280 }
  0x78   : > { %197 = sfence }
  0x79   : > { %v216_v0 = vld [vmem:[%s2352_s11] sm:$0xff]  ;;  %vm220_vm0 = vcmask 1043456   ;;  %s2163_s18 = smov 2   ;;  %s2164_s20 = smov 3   ;;  %v256_v32 = vlaneseq }
  0x7a   : > { %v235_v1 = vsel %vm220_vm0, %v216_v0, -inf  ;;  %v221_v2 = vsel %vm220_vm0, %v216_v0, 0.0  ;;  %v218_v3 = vcombine.high %v216_v0, %v216_v0  ;;  %s2165_s5 = smov 1   ;;  %s2166_s7 = smov 127  }
  0x7b   : > { %v236_v4 = vrot.slane %v235_v1, 4  ;;  %v222_v5 = vrot.slane %v221_v2, 4  ;;  %s2167_s8 = smov 126   ;;  %v263_v33 = vshrl.u32 %v256_v32, 7  ;;  %s2168_s9 = smov 125   ;;  %v2397_v43 = vand.u32 127, %v256_v32 }
  0x7c   : > { %v242_v6 = vsel %vm220_vm0, %v218_v3, -inf  ;;  %v228_v7 = vsel %vm220_vm0, %v218_v3, 0.0  ;;  %v343_v36 = vld [vmem:[#allocation6 + $0x3] ss:$8 sm:$0x3]  ;;  %s2169_s17 = smov 48  }
  0x7d   : > { %v237_v8 = vmax.f32 %v235_v1, %v236_v4  ;;  %v223_v9 = vadd.f32 %v222_v5, %v221_v2  ;;  %v243_v10 = vrot.slane %v242_v6, 4  ;;  %v229_v11 = vrot.slane %v228_v7, 4  ;;  %s2170_s21 = smov 32   ;;  %v251_v44 = vld [vmem:[#allocation6] ss:$8 sm:$0x3] }
  0x7e   : > { %v2367_v34 = vsub.s32 0, %v263_v33  ;;  %v2369_v35 = vsub.s32 1, %v263_v33  ;;  %vm258_vm1 = vcmp.lt.s32.totalorder %v2397_v43, 3  ;;  %v283_v49 = vld [vmem:[#allocation6 + $0x1] ss:$8 sm:$0x3] }
  0x7f   : > { %v238_v12 = vrot.slane %v237_v8, 2  ;;  %v224_v13 = vrot.slane %v223_v9, 2  ;;  %v244_v14 = vmax.f32 %v242_v6, %v243_v10  ;;  %v230_v15 = vadd.f32 %v229_v11, %v228_v7  ;;  %v313_v4 = vld [vmem:[#allocation6 + $0x2] ss:$8 sm:$0x3]  ;;  %s2171_s23 = smov 16  }
  0x80   : > { %4249 = vst [vmem:[#allocation21_spill] sm:$0xff] %v2367_v34  ;;  %4250 = vst [vmem:[#allocation22_spill] sm:$0xff] %v2369_v35  ;;  %v348_v37 = vrot.slane %v343_v36, %v2367_v34  ;;  %v352_v38 = vrot.slane %v343_v36, %v2369_v35  ;;  %v2401_v47 = vrot.slane %v251_v44, %v2367_v34  ;;  %vm288_vm2 = vcmp.lt.s32.totalorder %v2397_v43, 2  ;;  %s2172_s24 = smov 112   ;;  %s4213_s28 = smov 96  }
  0x81   : > { %v239_v16 = vmax.f32 %v237_v8, %v238_v12  ;;  %v225_v17 = vadd.f32 %v224_v13, %v223_v9  ;;  %v245_v18 = vrot.slane %v244_v14, 2  ;;  %v231_v19 = vrot.slane %v230_v15, 2  ;;  %s4211_s29 = smov 80   ;;  %s1840_s25 = sld [smem:[#allocation8 + $0x3f]] }
  0x82   : > { %v2404_v48 = vrot.slane %v251_v44, %v2369_v35  ;;  %v2420_v56 = vrot.slane %v283_v49, %v2367_v34  ;;  %v2423_v57 = vrot.slane %v283_v49, %v2369_v35  ;;  %vm318_vm3 = vcmp.lt.s32.totalorder %v2397_v43, 1  ;;  %v420_v44 = vld [vmem:[#allocation6 + $0x6] ss:$8 sm:$0x3]  ;;  %s2905_s30 = sld [smem:[#allocation8 + $0xe]]  ;;  %s2907_s10 = sld [smem:[#allocation8 + $0xf]] }
  0x83   : > { %v240_v20 = vrot.slane %v239_v16, 1  ;;  %v226_v21 = vrot.slane %v225_v17, 1  ;;  %v246_v22 = vmax.f32 %v244_v14, %v245_v18  ;;  %v232_v23 = vadd.f32 %v231_v19, %v230_v15  ;;  %v360_v15 = vld [vmem:[#allocation6 + $0x4] ss:$8 sm:$0x3]  ;;  %s3200_s6 = sld [smem:[#allocation8 + $0x3b]] }
  0x84   : > { %v2453_v5 = vrot.slane %v313_v4, %v2367_v34  ;;  %v2456_v6 = vrot.slane %v313_v4, %v2369_v35  ;;  %vm365_vm4 = vcmp.lt.s32.totalorder %v2397_v43, 127  ;;  %vm395_vm5 = vcmp.lt.s32.totalorder %v2397_v43, 126  ;;  %s3220_s0 = sld [smem:[#allocation8 + $0x54]]  ;;  %s3222_s1 = sld [smem:[#allocation8 + $0x35]] }
  0x85   : > { %v241_v24 = vmax.f32 %v239_v16, %v240_v20  ;;  %v227_v25 = vadd.f32 %v226_v21, %v225_v17  ;;  %v247_v26 = vrot.slane %v246_v22, 1  ;;  %v233_v29 = vrot.slane %v232_v23, 1  ;;  %s3224_s2 = sld [smem:[#allocation8 + $0x36]]  ;;  %s4299_s27 = smov 96  }
  0x86   : > { %v2478_v16 = vrot.slane %v360_v15, %v2367_v34  ;;  %v2481_v17 = vrot.slane %v360_v15, %v2369_v35  ;;  %vm425_vm6 = vcmp.lt.s32.totalorder %v2397_v43, 125  ;;  %vm826_vm7 = vcmp.lt.s32.totalorder %v2397_v43, 16  ;;  %s3277_s14 = sld [smem:[#allocation8]]  ;;  %s3279_s13 = sld [smem:[#allocation8 + $0x1]] }
  0x87   : > { %304 = vrot.lane.b32.xlu0 %v241_v24, %s2163_s18  ;;  %274 = vrot.lane.b32.xlu1 %v241_v24, %s2164_s20  ;;  %v249_v27 = vmul.f32 0.25, %v227_v25  ;;  %v248_v28 = vmax.f32 %v246_v22, %v247_v26  ;;  %v234_v30 = vadd.f32 %v233_v29, %v232_v23  ;;  %v2381_v41 = vmul.f32 %v348_v37, %v241_v24  ;;  %v390_v26 = vld [vmem:[#allocation6 + $0x5] ss:$8 sm:$0x3]  ;;  %s3282_s22 = sld [smem:[#allocation8 + $0x2]]  ;;  %s3284_s15 = sld [smem:[#allocation8 + $0x7]] }
  0x88   : > { %vm1113_vm8 = vcmp.lt.s32.totalorder %v2397_v43, 112  ;;  %vm1299_vm9 = vcmp.lt.s32.totalorder %v2397_v43, 96  ;;  %vm454_vm10 = vcmp.lt.s32.totalorder %v2397_v43, 48  ;;  %s3299_s19 = sld [smem:[#allocation8 + $0x2a]]  ;;  %s3301_s12 = sld [smem:[#allocation8 + $0x5b]]  ;;  %vm640_vm11 = vcmp.lt.s32.totalorder %v2397_v43, 32 }
  0x89   : > { %v250_v31 = vmul.f32 0.25, %v234_v30  ;;  %v2373_v39 = vmul.f32 %v348_v37, %v249_v27  ;;  %v2383_v42 = vmul.f32 %v352_v38, %v248_v28  ;;  %vm1485_vm12 = vcmp.lt.s32.totalorder %v2397_v43, 80 }
  0x8b   : > { %252 = vrot.lane.b32.xlu0 %v249_v27, %s2164_s20  ;;  %276 = vrot.lane.b32.xlu1 %v248_v28, %s2164_s20  ;;  %v2375_v40 = vmul.f32 %v352_v38, %v250_v31 }
  0x8f   : > { %284 = vrot.lane.b32.xlu0 %v249_v27, %s2163_s18  ;;  %306 = vrot.lane.b32.xlu1 %v248_v28, %s2163_s18 }
  0x93   : > { %314 = vrot.lane.b32.xlu0 %v249_v27, %s2165_s5  ;;  %286 = vrot.lane.b32.xlu1 %v250_v31, %s2163_s18  ;;  %s2913_s18 = sld [smem:[#allocation8 + $0x40]] }
  0x97   : > { %316 = vrot.lane.b32.xlu1 %v250_v31, %s2165_s5  ;;  %254 = vrot.lane.b32.xlu0 %v250_v31, %s2164_s20  ;;  %s2915_s20 = sld [smem:[#allocation8 + $0x10]] }
  0x9b   : > { %336 = vrot.lane.b32.xlu1 %v248_v28, %s2165_s5  ;;  %334 = vrot.lane.b32.xlu0 %v241_v24, %s2165_s5  ;;  %s2926_s5 = sld [smem:[#allocation8 + $0x41]] }
  0x9f   : > { %363 = vrot.lane.b32.xlu1 %v250_v31, %s2166_s7  ;;  %361 = vrot.lane.b32.xlu0 %v249_v27, %s2166_s7 }
  0xa3   : > { %383 = vrot.lane.b32.xlu1 %v248_v28, %s2166_s7  ;;  %381 = vrot.lane.b32.xlu0 %v241_v24, %s2166_s7  ;;  %s2938_s7 = sld [smem:[#allocation8 + $0x11]] }
  0xa7   : > { %393 = vrot.lane.b32.xlu1 %v250_v31, %s2167_s8  ;;  %391 = vrot.lane.b32.xlu0 %v249_v27, %s2167_s8 }
  0xab   : > { %413 = vrot.lane.b32.xlu1 %v248_v28, %s2167_s8  ;;  %411 = vrot.lane.b32.xlu0 %v241_v24, %s2167_s8  ;;  %s2949_s8 = sld [smem:[#allocation8 + $0x42]] }
  0xaf   : > { %423 = vrot.lane.b32.xlu1 %v250_v31, %s2168_s9  ;;  %421 = vrot.lane.b32.xlu0 %v249_v27, %s2168_s9  ;;  %v402_v27 = vrot.slane %v390_v26, %v2367_v34 }
  0xb3   : > { %443 = vrot.lane.b32.xlu1 %v248_v28, %s2168_s9  ;;  %441 = vrot.lane.b32.xlu0 %v241_v24, %s2168_s9  ;;  %v406_v28 = vrot.slane %v390_v26, %v2369_v35  ;;  %s2965_s9 = sld [smem:[#allocation8 + $0x12]] }
  0xb7   : > { %523 = vrot.lane.b32.xlu0 %v2373_v39, %s2169_s17  ;;  %525 = vrot.lane.b32.xlu1 %v2375_v40, %s2169_s17 }
  0xbb   : > { %535 = vrot.lane.b32.xlu0 %v2381_v41, %s2169_s17  ;;  %537 = vrot.lane.b32.xlu1 %v2383_v42, %s2169_s17 }
  0xbf   : > { %709 = vrot.lane.b32.xlu0 %v2373_v39, %s2170_s21  ;;  %711 = vrot.lane.b32.xlu1 %v2375_v40, %s2170_s21 }
  0xc3   : > { %721 = vrot.lane.b32.xlu0 %v2381_v41, %s2170_s21  ;;  %723 = vrot.lane.b32.xlu1 %v2383_v42, %s2170_s21 }
  0xf9   : > { %v305_v45 = vpop.permute.xlu0 %304  ;;  %v275_v46 = vpop.permute.xlu1 %274 }
  0xfd   : > { %v2406_v50 = vpop.permute.xlu0 %252  ;;  %v277_v51 = vpop.permute.xlu1 %276 }
  0xfe   : > { %v278_v52 = vsel %vm258_vm1, %v275_v46, %v277_v51  ;;  %v279_v53 = vsel %vm258_vm1, %v277_v51, %v275_v46  ;;  %v436_v46 = vrot.slane %v420_v44, %v2369_v35 }
  0xff   : > { %v2414_v54 = vmul.f32 %v279_v53, %v2401_v47  ;;  %v2417_v55 = vmul.f32 %v278_v52, %v2404_v48 }
 0x101   : > { %v2425_v58 = vpop.permute.xlu0 %284  ;;  %v307_v59 = vpop.permute.xlu1 %306  ;;  %463 = vrot.lane.b32.xlu0 %v2414_v54, %s2169_s17  ;;  %465 = vrot.lane.b32.xlu1 %v2417_v55, %s2169_s17 }
 0x102   : > { %v308_v60 = vsel %vm288_vm2, %v305_v45, %v307_v59  ;;  %v309_v61 = vsel %vm288_vm2, %v307_v59, %v305_v45  ;;  %v432_v45 = vrot.slane %v420_v44, %v2367_v34 }
 0x103   : > { %v2436_v62 = vmul.f32 %v309_v61, %v2420_v56  ;;  %v2439_v63 = vmul.f32 %v308_v60, %v2423_v57 }
 0x105   : > { %v2441_v0 = vpop.permute.xlu0 %314  ;;  %v2443_v1 = vpop.permute.xlu1 %286  ;;  %487 = vrot.lane.b32.xlu0 %v2436_v62, %s2169_s17  ;;  %489 = vrot.lane.b32.xlu1 %v2439_v63, %s2169_s17 }
 0x109   : > { %v2449_v2 = vpop.permute.xlu1 %316  ;;  %v255_v3 = vpop.permute.xlu0 %254 }
 0x10a   : > { %v259_v61 = vsel %vm258_vm1, %v2406_v50, %v255_v3  ;;  %v260_v4 = vsel %vm258_vm1, %v255_v3, %v2406_v50  ;;  %v290_v50 = vsel %vm288_vm2, %v2443_v1, %v2425_v58  ;;  %v319_v3 = vsel %vm318_vm3, %v2441_v0, %v2449_v2 }
 0x10d   : > { %v337_v7 = vpop.permute.xlu1 %336  ;;  %v335_v8 = vpop.permute.xlu0 %334 }
 0x10e   : > { %v338_v9 = vsel %vm318_vm3, %v335_v8, %v337_v7  ;;  %v339_v10 = vsel %vm318_vm3, %v337_v7, %v335_v8  ;;  %v2546_v7 = vmul.f32 %v2401_v47, %v260_v4  ;;  %v2549_v8 = vmul.f32 %v2404_v48, %v259_v61 }
 0x10f   : > { %v2463_v11 = vmul.f32 %v339_v10, %v2453_v5  ;;  %v2466_v12 = vmul.f32 %v338_v9, %v2456_v6  ;;  %v289_v9 = vsel %vm288_vm2, %v2425_v58, %v2443_v1  ;;  %v2564_v47 = vmul.f32 %v2420_v56, %v290_v50 }
 0x110   : > { %v2567_v48 = vmul.f32 %v2423_v57, %v289_v9  ;;  %v320_v58 = vsel %vm318_vm3, %v2449_v2, %v2441_v0  ;;  %v2585_v57 = vmul.f32 %v2456_v6, %v319_v3 }
 0x111   : > { %v2468_v13 = vpop.permute.xlu1 %363  ;;  %511 = vrot.lane.b32.xlu0 %v2463_v11, %s2169_s17  ;;  %v2472_v14 = vpop.permute.xlu0 %361  ;;  %513 = vrot.lane.b32.xlu1 %v2466_v12, %s2169_s17  ;;  %v2582_v56 = vmul.f32 %v2453_v5, %v320_v58 }
 0x112   : > { %v366_v1 = vsel %vm365_vm4, %v2472_v14, %v2468_v13  ;;  %v367_v0 = vsel %vm365_vm4, %v2468_v13, %v2472_v14 }
 0x113   : > { %v2600_v2 = vmul.f32 %v2478_v16, %v366_v1  ;;  %v2603_v5 = vmul.f32 %v2481_v17, %v367_v0 }
 0x115   : > { %v384_v18 = vpop.permute.xlu1 %383  ;;  %v382_v19 = vpop.permute.xlu0 %381 }
 0x116   : > { %v385_v20 = vsel %vm365_vm4, %v382_v19, %v384_v18  ;;  %v386_v21 = vsel %vm365_vm4, %v384_v18, %v382_v19 }
 0x117   : > { %v2488_v22 = vmul.f32 %v385_v20, %v2478_v16  ;;  %v2491_v23 = vmul.f32 %v386_v21, %v2481_v17 }
 0x119   : > { %v394_v24 = vpop.permute.xlu1 %393  ;;  %559 = vrot.lane.b32.xlu0 %v2488_v22, %s2169_s17  ;;  %v392_v25 = vpop.permute.xlu0 %391  ;;  %561 = vrot.lane.b32.xlu1 %v2491_v23, %s2169_s17 }
 0x11a   : > { %v396_v6 = vsel %vm395_vm5, %v392_v25, %v394_v24  ;;  %v397_v10 = vsel %vm395_vm5, %v394_v24, %v392_v25 }
 0x11b   : > { %v2613_v13 = vmul.f32 %v402_v27, %v396_v6  ;;  %v2615_v14 = vmul.f32 %v406_v28, %v397_v10 }
 0x11d   : > { %v414_v29 = vpop.permute.xlu1 %413  ;;  %v412_v30 = vpop.permute.xlu0 %411 }
 0x11e   : > { %v415_v31 = vsel %vm395_vm5, %v412_v30, %v414_v29  ;;  %v416_v32 = vsel %vm395_vm5, %v414_v29, %v412_v30 }
 0x11f   : > { %v2504_v33 = vmul.f32 %v415_v31, %v402_v27  ;;  %v2506_v36 = vmul.f32 %v416_v32, %v406_v28 }
 0x121   : > { %v424_v37 = vpop.permute.xlu1 %423  ;;  %583 = vrot.lane.b32.xlu0 %v2504_v33, %s2169_s17  ;;  %v422_v38 = vpop.permute.xlu0 %421  ;;  %585 = vrot.lane.b32.xlu1 %v2506_v36, %s2169_s17 }
 0x122   : > { %v426_v15 = vsel %vm425_vm6, %v422_v38, %v424_v37  ;;  %v427_v16 = vsel %vm425_vm6, %v424_v37, %v422_v38 }
 0x123   : > { %v2625_v17 = vmul.f32 %v432_v45, %v426_v15  ;;  %v2627_v18 = vmul.f32 %v436_v46, %v427_v16 }
 0x125   : > { %v444_v49 = vpop.permute.xlu1 %443  ;;  %v442_v51 = vpop.permute.xlu0 %441 }
 0x126   : > { %v445_v52 = vsel %vm425_vm6, %v442_v51, %v444_v49  ;;  %v446_v53 = vsel %vm425_vm6, %v444_v49, %v442_v51 }
 0x127   : > { %v2519_v59 = vmul.f32 %v445_v52, %v432_v45  ;;  %v2521_v60 = vmul.f32 %v446_v53, %v436_v46 }
 0x129   : > { %607 = vrot.lane.b32.xlu0 %v2519_v59, %s2169_s17  ;;  %609 = vrot.lane.b32.xlu1 %v2521_v60, %s2169_s17  ;;  %v2661_v19 = vpop.permute.xlu0 %523  ;;  %v2663_v20 = vpop.permute.xlu1 %525 }
 0x12d   : > { %649 = vrot.lane.b32.xlu0 %v2414_v54, %s2170_s21  ;;  %651 = vrot.lane.b32.xlu1 %v2417_v55, %s2170_s21  ;;  %v2673_v21 = vpop.permute.xlu0 %535  ;;  %v2675_v24 = vpop.permute.xlu1 %537 }
 0x131   : > { %673 = vrot.lane.b32.xlu0 %v2436_v62, %s2170_s21  ;;  %675 = vrot.lane.b32.xlu1 %v2439_v63, %s2170_s21  ;;  %v2681_v25 = vpop.permute.xlu0 %709  ;;  %v2683_v26 = vpop.permute.xlu1 %711 }
 0x132   : > { %4251 = vst [vmem:[#allocation23_spill] sm:$0xff] %v2681_v25  ;;  %4252 = vst [vmem:[#allocation24_spill] sm:$0xff] %v2683_v26 }
 0x135   : > { %697 = vrot.lane.b32.xlu0 %v2463_v11, %s2170_s21  ;;  %699 = vrot.lane.b32.xlu1 %v2466_v12, %s2170_s21  ;;  %v2693_v27 = vpop.permute.xlu0 %721  ;;  %v2695_v28 = vpop.permute.xlu1 %723 }
 0x136   : > { %4253 = vst [vmem:[#allocation25_spill] sm:$0xff] %v2693_v27  ;;  %4254 = vst [vmem:[#allocation26_spill] sm:$0xff] %v2695_v28 }
 0x139   : > { %450 = vrot.lane.b32.xlu0 %v2546_v7, %s2169_s17  ;;  %452 = vrot.lane.b32.xlu1 %v2549_v8, %s2169_s17 }
 0x13d   : > { %475 = vrot.lane.b32.xlu0 %v2564_v47, %s2169_s17  ;;  %477 = vrot.lane.b32.xlu1 %v2567_v48, %s2169_s17 }
 0x141   : > { %499 = vrot.lane.b32.xlu0 %v2582_v56, %s2169_s17  ;;  %501 = vrot.lane.b32.xlu1 %v2585_v57, %s2169_s17 }
 0x145   : > { %547 = vrot.lane.b32.xlu0 %v2600_v2, %s2169_s17  ;;  %549 = vrot.lane.b32.xlu1 %v2603_v5, %s2169_s17 }
 0x149   : > { %571 = vrot.lane.b32.xlu0 %v2613_v13, %s2169_s17  ;;  %573 = vrot.lane.b32.xlu1 %v2615_v14, %s2169_s17 }
 0x14d   : > { %595 = vrot.lane.b32.xlu0 %v2625_v17, %s2169_s17  ;;  %597 = vrot.lane.b32.xlu1 %v2627_v18, %s2169_s17  ;;  %s2977_s17 = sld [smem:[#allocation8 + $0x43]] }
 0x151   : > { %636 = vrot.lane.b32.xlu0 %v2546_v7, %s2170_s21  ;;  %638 = vrot.lane.b32.xlu1 %v2549_v8, %s2170_s21 }
 0x155   : > { %661 = vrot.lane.b32.xlu0 %v2564_v47, %s2170_s21  ;;  %663 = vrot.lane.b32.xlu1 %v2567_v48, %s2170_s21 }
 0x159   : > { %685 = vrot.lane.b32.xlu0 %v2582_v56, %s2170_s21  ;;  %687 = vrot.lane.b32.xlu1 %v2585_v57, %s2170_s21 }
 0x15d   : > { %733 = vrot.lane.b32.xlu0 %v2600_v2, %s2170_s21  ;;  %735 = vrot.lane.b32.xlu1 %v2603_v5, %s2170_s21 }
 0x161   : > { %745 = vrot.lane.b32.xlu0 %v2488_v22, %s2170_s21  ;;  %747 = vrot.lane.b32.xlu1 %v2491_v23, %s2170_s21 }
 0x165   : > { %757 = vrot.lane.b32.xlu0 %v2613_v13, %s2170_s21  ;;  %759 = vrot.lane.b32.xlu1 %v2615_v14, %s2170_s21 }
 0x169   : > { %769 = vrot.lane.b32.xlu0 %v2504_v33, %s2170_s21  ;;  %771 = vrot.lane.b32.xlu1 %v2506_v36, %s2170_s21 }
 0x16d   : > { %781 = vrot.lane.b32.xlu0 %v2625_v17, %s2170_s21  ;;  %783 = vrot.lane.b32.xlu1 %v2627_v18, %s2170_s21 }
 0x171   : > { %793 = vrot.lane.b32.xlu0 %v2519_v59, %s2170_s21  ;;  %795 = vrot.lane.b32.xlu1 %v2521_v60, %s2170_s21  ;;  %s2988_s21 = sld [smem:[#allocation8 + $0x13]] }
 0x173   : > { %v2701_v29 = vpop.permute.xlu0 %463  ;;  %v2703_v30 = vpop.permute.xlu1 %465 }
 0x175   : > { %822 = vrot.lane.b32.xlu0 %v2546_v7, %s2171_s23  ;;  %824 = vrot.lane.b32.xlu1 %v2549_v8, %s2171_s23 }
 0x177   : > { %v2713_v31 = vpop.permute.xlu0 %487  ;;  %v2715_v32 = vpop.permute.xlu1 %489 }
 0x179   : > { %835 = vrot.lane.b32.xlu0 %v2414_v54, %s2171_s23  ;;  %837 = vrot.lane.b32.xlu1 %v2417_v55, %s2171_s23 }
 0x17d   : > { %847 = vrot.lane.b32.xlu0 %v2564_v47, %s2171_s23  ;;  %849 = vrot.lane.b32.xlu1 %v2567_v48, %s2171_s23 }
 0x181   : > { %859 = vrot.lane.b32.xlu0 %v2436_v62, %s2171_s23  ;;  %861 = vrot.lane.b32.xlu1 %v2439_v63, %s2171_s23 }
 0x183   : > { %v2721_v37 = vpop.permute.xlu0 %511  ;;  %v2723_v38 = vpop.permute.xlu1 %513 }
 0x184   : > { %4255 = vst [vmem:[#allocation27_spill] sm:$0xff] %v2721_v37  ;;  %4256 = vst [vmem:[#allocation28_spill] sm:$0xff] %v2723_v38  ;;  %v865_v37 = vstv %s2913_s18  ;;  %s3041_s18 = sld [smem:[#allocation8 + $0x4d]] }
 0x185   : > { %871 = vrot.lane.b32.xlu0 %v2582_v56, %s2171_s23  ;;  %873 = vrot.lane.b32.xlu1 %v2585_v57, %s2171_s23 }
 0x189   : > { %883 = vrot.lane.b32.xlu0 %v2463_v11, %s2171_s23  ;;  %885 = vrot.lane.b32.xlu1 %v2466_v12, %s2171_s23 }
 0x18b   : > { %v2729_v44 = vpop.permute.xlu0 %559  ;;  %v2731_v45 = vpop.permute.xlu1 %561 }
 0x18c   : > { %4257 = vst [vmem:[#allocation29_spill] sm:$0xff] %v2729_v44  ;;  %4258 = vst [vmem:[#allocation30_spill] sm:$0xff] %v2731_v45 }
 0x18d   : > { %895 = vrot.lane.b32.xlu0 %v2373_v39, %s2171_s23  ;;  %897 = vrot.lane.b32.xlu1 %v2375_v40, %s2171_s23 }
 0x191   : > { %907 = vrot.lane.b32.xlu0 %v2381_v41, %s2171_s23  ;;  %909 = vrot.lane.b32.xlu1 %v2383_v42, %s2171_s23 }
 0x193   : > { %v2737_v46 = vpop.permute.xlu0 %583  ;;  %v2739_v49 = vpop.permute.xlu1 %585 }
 0x194   : > { %4259 = vst [vmem:[#allocation31_spill] sm:$0xff] %v2737_v46  ;;  %4260 = vst [vmem:[#allocation32_spill] sm:$0xff] %v2739_v49 }
 0x195   : > { %919 = vrot.lane.b32.xlu0 %v2600_v2, %s2171_s23  ;;  %921 = vrot.lane.b32.xlu1 %v2603_v5, %s2171_s23 }
 0x199   : > { %931 = vrot.lane.b32.xlu0 %v2488_v22, %s2171_s23  ;;  %933 = vrot.lane.b32.xlu1 %v2491_v23, %s2171_s23 }
 0x19b   : > { %v2745_v51 = vpop.permute.xlu0 %607  ;;  %v2747_v52 = vpop.permute.xlu1 %609 }
 0x19c   : > { %4261 = vst [vmem:[#allocation33_spill] sm:$0xff] %v2745_v51  ;;  %4262 = vst [vmem:[#allocation34_spill] sm:$0xff] %v2747_v52 }
 0x19d   : > { %943 = vrot.lane.b32.xlu0 %v2613_v13, %s2171_s23  ;;  %945 = vrot.lane.b32.xlu1 %v2615_v14, %s2171_s23 }
 0x19f   : > { %v2753_v53 = vpop.permute.xlu0 %649  ;;  %v2755_v61 = vpop.permute.xlu1 %651 }
 0x1a0   : > { %4263 = vst [vmem:[#allocation35_spill] sm:$0xff] %v2753_v53  ;;  %4264 = vst [vmem:[#allocation36_spill] sm:$0xff] %v2755_v61 }
 0x1a1   : > { %955 = vrot.lane.b32.xlu0 %v2504_v33, %s2171_s23  ;;  %957 = vrot.lane.b32.xlu1 %v2506_v36, %s2171_s23 }
 0x1a3   : > { %v2761_v4 = vpop.permute.xlu0 %673  ;;  %v2763_v9 = vpop.permute.xlu1 %675 }
 0x1a4   : > { %4265 = vst [vmem:[#allocation37_spill] sm:$0xff] %v2761_v4  ;;  %4266 = vst [vmem:[#allocation38_spill] sm:$0xff] %v2763_v9 }
 0x1a5   : > { %967 = vrot.lane.b32.xlu0 %v2625_v17, %s2171_s23  ;;  %969 = vrot.lane.b32.xlu1 %v2627_v18, %s2171_s23 }
 0x1a7   : > { %v2769_v50 = vpop.permute.xlu0 %697  ;;  %v2771_v3 = vpop.permute.xlu1 %699 }
 0x1a8   : > { %4267 = vst [vmem:[#allocation39_spill] sm:$0xff] %v2769_v50  ;;  %4268 = vst [vmem:[#allocation40_spill] sm:$0xff] %v2771_v3  ;;  %v841_v3 = vstv %s1840_s25  ;;  %s3010_s25 = sld [smem:[#allocation8 + $0x14]] }
 0x1a9   : > { %979 = vrot.lane.b32.xlu0 %v2519_v59, %s2171_s23  ;;  %981 = vrot.lane.b32.xlu1 %v2521_v60, %s2171_s23  ;;  %s2999_s23 = sld [smem:[#allocation8 + $0x44]] }
 0x1ab   : > { %v2777_v58 = vpop.permute.xlu0 %450  ;;  %v2779_v1 = vpop.permute.xlu1 %452 }
 0x1ac   : > { %4269 = vst [vmem:[#allocation41_spill] sm:$0xff] %v2779_v1 }
 0x1ad   : > { %1109 = vrot.lane.b32.xlu0 %v2546_v7, %s2172_s24  ;;  %1111 = vrot.lane.b32.xlu1 %v2549_v8, %s2172_s24 }
 0x1af   : > { %v2785_v0 = vpop.permute.xlu0 %475  ;;  %v2787_v6 = vpop.permute.xlu1 %477 }
 0x1b0   : > { %4270 = vst [vmem:[#allocation42_spill] sm:$0xff] %v2785_v0  ;;  %4271 = vst [vmem:[#allocation43_spill] sm:$0xff] %v2787_v6  ;;  %v877_v0 = vstv %s2915_s20  ;;  %s1869_s20 = sld [smem:[#allocation8 + $0x1d]] }
 0x1b1   : > { %1122 = vrot.lane.b32.xlu0 %v2414_v54, %s2172_s24  ;;  %1124 = vrot.lane.b32.xlu1 %v2417_v55, %s2172_s24 }
 0x1b3   : > { %v2793_v10 = vpop.permute.xlu0 %499  ;;  %v2795_v15 = vpop.permute.xlu1 %501 }
 0x1b4   : > { %4272 = vst [vmem:[#allocation44_spill] sm:$0xff] %v2793_v10  ;;  %4273 = vst [vmem:[#allocation45_spill] sm:$0xff] %v2795_v15  ;;  %v829_v15 = vstv %s2905_s30  ;;  %v853_v10 = vstv %s2907_s10  ;;  %s3021_s30 = sld [smem:[#allocation8 + $0x45]]  ;;  %s1867_s10 = sld [smem:[#allocation8 + $0x1c]] }
 0x1b5   : > { %1134 = vrot.lane.b32.xlu0 %v2564_v47, %s2172_s24  ;;  %1136 = vrot.lane.b32.xlu1 %v2567_v48, %s2172_s24 }
 0x1b7   : > { %v2801_v16 = vpop.permute.xlu0 %547  ;;  %v2803_v35 = vpop.permute.xlu1 %549 }
 0x1b8   : > { %4274 = vst [vmem:[#allocation46_spill] sm:$0xff] %v2801_v16  ;;  %4275 = vst [vmem:[#allocation47_spill] sm:$0xff] %v2803_v35 }
 0x1b9   : > { %1146 = vrot.lane.b32.xlu0 %v2436_v62, %s2172_s24  ;;  %1148 = vrot.lane.b32.xlu1 %v2439_v63, %s2172_s24 }
 0x1bb   : > { %v2809_v34 = vpop.permute.xlu0 %571  ;;  %v2811_v51 = vpop.permute.xlu1 %573 }
 0x1bc   : > { %4276 = vst [vmem:[#allocation48_spill] sm:$0xff] %v2809_v34  ;;  %4277 = vst [vmem:[#allocation49_spill] sm:$0xff] %v2811_v51 }
 0x1bd   : > { %1158 = vrot.lane.b32.xlu0 %v2582_v56, %s2172_s24  ;;  %1160 = vrot.lane.b32.xlu1 %v2585_v57, %s2172_s24 }
 0x1bf   : > { %v2817_v52 = vpop.permute.xlu0 %595  ;;  %v2819_v46 = vpop.permute.xlu1 %597 }
 0x1c0   : > { %4278 = vst [vmem:[#allocation50_spill] sm:$0xff] %v2817_v52  ;;  %4279 = vst [vmem:[#allocation51_spill] sm:$0xff] %v2819_v46 }
 0x1c1   : > { %1170 = vrot.lane.b32.xlu0 %v2463_v11, %s2172_s24  ;;  %1172 = vrot.lane.b32.xlu1 %v2466_v12, %s2172_s24 }
 0x1c3   : > { %v2825_v49 = vpop.permute.xlu0 %636  ;;  %v2827_v34 = vpop.permute.xlu1 %638 }
 0x1c4   : > { %4280 = vst [vmem:[#allocation52_spill] sm:$0xff] %v2825_v49  ;;  %4281 = vst [vmem:[#allocation53_spill] sm:$0xff] %v2827_v34 }
 0x1c5   : > { %1182 = vrot.lane.b32.xlu0 %v2373_v39, %s2172_s24  ;;  %1184 = vrot.lane.b32.xlu1 %v2375_v40, %s2172_s24 }
 0x1c7   : > { %v2833_v51 = vpop.permute.xlu0 %661  ;;  %v2835_v52 = vpop.permute.xlu1 %663 }
 0x1c8   : > { %4282 = vst [vmem:[#allocation54_spill] sm:$0xff] %v2833_v51  ;;  %4283 = vst [vmem:[#allocation55_spill] sm:$0xff] %v2835_v52 }
 0x1c9   : > { %1194 = vrot.lane.b32.xlu0 %v2381_v41, %s2172_s24  ;;  %1196 = vrot.lane.b32.xlu1 %v2383_v42, %s2172_s24 }
 0x1cb   : > { %v2841_v46 = vpop.permute.xlu0 %685  ;;  %v2843_v44 = vpop.permute.xlu1 %687 }
 0x1cc   : > { %4284 = vst [vmem:[#allocation56_spill] sm:$0xff] %v2841_v46  ;;  %4285 = vst [vmem:[#allocation57_spill] sm:$0xff] %v2843_v44 }
 0x1cd   : > { %1206 = vrot.lane.b32.xlu0 %v2600_v2, %s2172_s24  ;;  %1208 = vrot.lane.b32.xlu1 %v2603_v5, %s2172_s24 }
 0x1cf   : > { %v2849_v45 = vpop.permute.xlu0 %733  ;;  %v2851_v16 = vpop.permute.xlu1 %735 }
 0x1d0   : > { %4286 = vst [vmem:[#allocation58_spill] sm:$0xff] %v2849_v45  ;;  %4287 = vst [vmem:[#allocation59_spill] sm:$0xff] %v2851_v16 }
 0x1d1   : > { %1218 = vrot.lane.b32.xlu0 %v2488_v22, %s2172_s24  ;;  %1220 = vrot.lane.b32.xlu1 %v2491_v23, %s2172_s24 }
 0x1d3   : > { %v2857_v35 = vpop.permute.xlu0 %745  ;;  %v2859_v27 = vpop.permute.xlu1 %747 }
 0x1d4   : > { %4288 = vst [vmem:[#allocation60_spill] sm:$0xff] %v2857_v35  ;;  %4289 = vst [vmem:[#allocation61_spill] sm:$0xff] %v2859_v27 }
 0x1d5   : > { %1230 = vrot.lane.b32.xlu0 %v2613_v13, %s2172_s24  ;;  %1295 = vrot.lane.b32.xlu1 %v2546_v7, %s4213_s28 }
 0x1d7   : > { %v2865_v45 = vpop.permute.xlu0 %757  ;;  %v2867_v16 = vpop.permute.xlu1 %759 }
 0x1d8   : > { %4290 = vst [vmem:[#allocation62_spill] sm:$0xff] %v2865_v45  ;;  %4291 = vst [vmem:[#allocation63_spill] sm:$0xff] %v2867_v16 }
 0x1d9   : > { %1297 = vrot.lane.b32.xlu0 %v2549_v8, %s4213_s28  ;;  %1308 = vrot.lane.b32.xlu1 %v2414_v54, %s4213_s28 }
 0x1db   : > { %v2873_v35 = vpop.permute.xlu0 %769  ;;  %v2875_v27 = vpop.permute.xlu1 %771 }
 0x1dc   : > { %4292 = vst [vmem:[#allocation64_spill] sm:$0xff] %v2873_v35  ;;  %4293 = vst [vmem:[#allocation65_spill] sm:$0xff] %v2875_v27 }
 0x1dd   : > { %1310 = vrot.lane.b32.xlu0 %v2417_v55, %s4213_s28  ;;  %1320 = vrot.lane.b32.xlu1 %v2564_v47, %s4213_s28 }
 0x1df   : > { %v2881_v28 = vpop.permute.xlu0 %781  ;;  %v2883_v45 = vpop.permute.xlu1 %783 }
 0x1e0   : > { %4294 = vst [vmem:[#allocation66_spill] sm:$0xff] %v2881_v28  ;;  %4295 = vst [vmem:[#allocation67_spill] sm:$0xff] %v2883_v45 }
 0x1e1   : > { %1322 = vrot.lane.b32.xlu0 %v2567_v48, %s4213_s28  ;;  %1481 = vrot.lane.b32.xlu1 %v2546_v7, %s4211_s29 }
 0x1e3   : > { %v2889_v35 = vpop.permute.xlu0 %793  ;;  %v2891_v27 = vpop.permute.xlu1 %795 }
 0x1e4   : > { %4296 = vst [vmem:[#allocation68_spill] sm:$0xff] %v2889_v35  ;;  %4297 = vst [vmem:[#allocation69_spill] sm:$0xff] %v2891_v27 }
 0x1e5   : > { %1483 = vrot.lane.b32.xlu0 %v2549_v8, %s4211_s29  ;;  %1494 = vrot.lane.b32.xlu1 %v2414_v54, %s4211_s29 }
 0x1e7   : > { %v823_v28 = vpop.permute.xlu0 %822  ;;  %v825_v16 = vpop.permute.xlu1 %824 }
 0x1e8   : > { %v827_v4 = vsel %vm826_vm7, %v823_v28, %v825_v16  ;;  %v828_v9 = vsel %vm826_vm7, %v825_v16, %v823_v28 }
 0x1e9   : > { %1496 = vrot.lane.b32.xlu0 %v2417_v55, %s4211_s29  ;;  %1332 = vrot.lane.b32.xlu1 %v2436_v62, %s4213_s28 }
 0x1eb   : > { %v836_v45 = vpop.permute.xlu0 %835  ;;  %v838_v25 = vpop.permute.xlu1 %837 }
 0x1ec   : > { %v839_v46 = vsel %vm826_vm7, %v836_v45, %v838_v25  ;;  %v840_v44 = vsel %vm826_vm7, %v838_v25, %v836_v45 }
 0x1ed   : > { %1334 = vrot.lane.b32.xlu0 %v2439_v63, %s4213_s28  ;;  %1506 = vrot.lane.b32.xlu1 %v2564_v47, %s4211_s29  ;;  %v842_v45 = vmul.f32 %v841_v3, %v840_v44  ;;  %v843_v49 = vmul.f32 %v841_v3, %v839_v46 }
 0x1ef   : > { %v848_v35 = vpop.permute.xlu0 %847  ;;  %v850_v27 = vpop.permute.xlu1 %849 }
 0x1f0   : > { %v851_v34 = vsel %vm826_vm7, %v848_v35, %v850_v27  ;;  %v852_v25 = vsel %vm826_vm7, %v850_v27, %v848_v35  ;;  %v830_v35 = vmul.f32 %v829_v15, %v828_v9  ;;  %v831_v27 = vmul.f32 %v829_v15, %v827_v4 }
 0x1f1   : > { %1508 = vrot.lane.b32.xlu0 %v2567_v48, %s4211_s29  ;;  %1344 = vrot.lane.b32.xlu1 %v2582_v56, %s4213_s28  ;;  %v854_v44 = vmul.f32 %v853_v10, %v852_v25  ;;  %v855_v46 = vmul.f32 %v853_v10, %v851_v34  ;;  %v889_v4 = vstv %s2926_s5  ;;  %v901_v15 = vstv %s2938_s7  ;;  %s3065_s5 = sld [smem:[#allocation8 + $0x4e]] }
 0x1f2   : > { %s3075_s7 = sld [smem:[#allocation8 + $0x1e]] }
 0x1f3   : > { %v860_v26 = vpop.permute.xlu0 %859  ;;  %v862_v50 = vpop.permute.xlu1 %861 }
 0x1f4   : > { %v863_v38 = vsel %vm826_vm7, %v860_v26, %v862_v50  ;;  %v864_v28 = vsel %vm826_vm7, %v862_v50, %v860_v26  ;;  %v844_v26 = vadd.f32 %v842_v45, %v830_v35  ;;  %v845_v50 = vadd.f32 %v843_v49, %v831_v27 }
 0x1f5   : > { %1346 = vrot.lane.b32.xlu0 %v2585_v57, %s4213_s28  ;;  %1518 = vrot.lane.b32.xlu1 %v2436_v62, %s4211_s29  ;;  %v866_v53 = vmul.f32 %v865_v37, %v864_v28  ;;  %v867_v1 = vmul.f32 %v865_v37, %v863_v38 }
 0x1f6   : > { %v857_v49 = vadd.f32 %v855_v46, %v845_v50 }
 0x1f7   : > { %v872_v52 = vpop.permute.xlu0 %871  ;;  %v874_v51 = vpop.permute.xlu1 %873 }
 0x1f8   : > { %v875_v6 = vsel %vm826_vm7, %v872_v52, %v874_v51  ;;  %v876_v61 = vsel %vm826_vm7, %v874_v51, %v872_v52  ;;  %v856_v51 = vadd.f32 %v854_v44, %v844_v26  ;;  %v869_v35 = vadd.f32 %v867_v1, %v857_v49 }
 0x1f9   : > { %1520 = vrot.lane.b32.xlu0 %v2439_v63, %s4211_s29  ;;  %1356 = vrot.lane.b32.xlu1 %v2463_v11, %s4213_s28  ;;  %v878_v52 = vmul.f32 %v877_v0, %v876_v61  ;;  %v879_v37 = vmul.f32 %v877_v0, %v875_v6  ;;  %v913_v61 = vstv %s2949_s8  ;;  %s3077_s8 = sld [smem:[#allocation8 + $0x15]] }
 0x1fa   : > { %v868_v28 = vadd.f32 %v866_v53, %v856_v51  ;;  %v925_v51 = vstv %s2965_s9  ;;  %s3087_s9 = sld [smem:[#allocation8 + $0x46]] }
 0x1fb   : > { %v884_v3 = vpop.permute.xlu0 %883  ;;  %v886_v16 = vpop.permute.xlu1 %885  ;;  %v881_v6 = vadd.f32 %v879_v37, %v869_v35 }
 0x1fc   : > { %v887_v34 = vsel %vm826_vm7, %v884_v3, %v886_v16  ;;  %v888_v9 = vsel %vm826_vm7, %v886_v16, %v884_v3  ;;  %v880_v0 = vadd.f32 %v878_v52, %v868_v28 }
 0x1fd   : > { %1358 = vrot.lane.b32.xlu0 %v2466_v12, %s4213_s28  ;;  %1530 = vrot.lane.b32.xlu1 %v2582_v56, %s4211_s29  ;;  %v890_v27 = vmul.f32 %v889_v4, %v888_v9  ;;  %v891_v3 = vmul.f32 %v889_v4, %v887_v34 }
 0x1ff   : > { %v896_v38 = vpop.permute.xlu0 %895  ;;  %v898_v10 = vpop.permute.xlu1 %897  ;;  %v892_v50 = vadd.f32 %v890_v27, %v880_v0  ;;  %v893_v4 = vadd.f32 %v891_v3, %v881_v6  ;;  %v937_v27 = vstv %s2977_s17  ;;  %s3090_s17 = sld [smem:[#allocation8 + $0x4f]] }
 0x200   : > { %v899_v25 = vsel %vm826_vm7, %v896_v38, %v898_v10  ;;  %v900_v45 = vsel %vm826_vm7, %v898_v10, %v896_v38 }
 0x201   : > { %1532 = vrot.lane.b32.xlu0 %v2585_v57, %s4211_s29  ;;  %1368 = vrot.lane.b32.xlu1 %v2373_v39, %s4213_s28  ;;  %v902_v44 = vmul.f32 %v901_v15, %v900_v45  ;;  %v903_v46 = vmul.f32 %v901_v15, %v899_v25 }
 0x203   : > { %v908_v16 = vpop.permute.xlu0 %907  ;;  %v910_v26 = vpop.permute.xlu1 %909  ;;  %v904_v49 = vadd.f32 %v902_v44, %v892_v50  ;;  %v905_v52 = vadd.f32 %v903_v46, %v893_v4 }
 0x204   : > { %v911_v53 = vsel %vm826_vm7, %v908_v16, %v910_v26  ;;  %v912_v1 = vsel %vm826_vm7, %v910_v26, %v908_v16 }
 0x205   : > { %v914_v34 = vmul.f32 %v913_v61, %v912_v1  ;;  %v915_v9 = vmul.f32 %v913_v61, %v911_v53  ;;  %1370 = vrot.lane.b32.xlu0 %v2375_v40, %s4213_s28  ;;  %1542 = vrot.lane.b32.xlu1 %v2463_v11, %s4211_s29  ;;  %v949_v53 = vstv %s2988_s21  ;;  %s3100_s21 = sld [smem:[#allocation8 + $0x16]] }
 0x207   : > { %v920_v37 = vpop.permute.xlu0 %919  ;;  %v922_v38 = vpop.permute.xlu1 %921  ;;  %v916_v25 = vadd.f32 %v914_v34, %v904_v49  ;;  %v917_v45 = vadd.f32 %v915_v9, %v905_v52 }
 0x208   : > { %v923_v10 = vsel %vm826_vm7, %v920_v37, %v922_v38  ;;  %v924_v15 = vsel %vm826_vm7, %v922_v38, %v920_v37  ;;  %v961_v37 = vstv %s2999_s23  ;;  %s3103_s23 = sld [smem:[#allocation8 + $0x1f]] }
 0x209   : > { %v926_v28 = vmul.f32 %v925_v51, %v924_v15  ;;  %v927_v35 = vmul.f32 %v925_v51, %v923_v10  ;;  %1544 = vrot.lane.b32.xlu0 %v2466_v12, %s4211_s29  ;;  %1380 = vrot.lane.b32.xlu1 %v2381_v41, %s4213_s28 }
 0x20b   : > { %v928_v3 = vadd.f32 %v926_v28, %v916_v25  ;;  %v929_v61 = vadd.f32 %v927_v35, %v917_v45  ;;  %v932_v0 = vpop.permute.xlu0 %931  ;;  %v934_v6 = vpop.permute.xlu1 %933 }
 0x20c   : > { %v935_v44 = vsel %vm826_vm7, %v932_v0, %v934_v6  ;;  %v936_v46 = vsel %vm826_vm7, %v934_v6, %v932_v0 }
 0x20d   : > { %v938_v16 = vmul.f32 %v937_v27, %v936_v46  ;;  %v939_v26 = vmul.f32 %v937_v27, %v935_v44  ;;  %1382 = vrot.lane.b32.xlu0 %v2383_v42, %s4213_s28  ;;  %1554 = vrot.lane.b32.xlu1 %v2373_v39, %s4211_s29 }
 0x20f   : > { %v940_v1 = vadd.f32 %v938_v16, %v928_v3  ;;  %v941_v50 = vadd.f32 %v939_v26, %v929_v61  ;;  %v944_v4 = vpop.permute.xlu0 %943  ;;  %v946_v34 = vpop.permute.xlu1 %945  ;;  %v973_v3 = vstv %s3010_s25  ;;  %s3115_s25 = sld [smem:[#allocation8 + $0x47]] }
 0x210   : > { %v947_v9 = vsel %vm826_vm7, %v944_v4, %v946_v34  ;;  %v948_v51 = vsel %vm826_vm7, %v946_v34, %v944_v4 }
 0x211   : > { %v950_v49 = vmul.f32 %v949_v53, %v948_v51  ;;  %v951_v52 = vmul.f32 %v949_v53, %v947_v9  ;;  %1556 = vrot.lane.b32.xlu0 %v2375_v40, %s4211_s29  ;;  %1392 = vrot.lane.b32.xlu1 %v2600_v2, %s4213_s28 }
 0x213   : > { %v952_v38 = vadd.f32 %v950_v49, %v940_v1  ;;  %v953_v10 = vadd.f32 %v951_v52, %v941_v50  ;;  %v956_v15 = vpop.permute.xlu0 %955  ;;  %v958_v25 = vpop.permute.xlu1 %957  ;;  %v985_v1 = vstv %s3021_s30  ;;  %s3118_s30 = sld [smem:[#allocation8 + $0x50]] }
 0x214   : > { %v959_v45 = vsel %vm826_vm7, %v956_v15, %v958_v25  ;;  %v960_v28 = vsel %vm826_vm7, %v958_v25, %v956_v15 }
 0x215   : > { %v962_v35 = vmul.f32 %v961_v37, %v960_v28  ;;  %v963_v27 = vmul.f32 %v961_v37, %v959_v45  ;;  %1394 = vrot.lane.b32.xlu0 %v2603_v5, %s4213_s28  ;;  %1566 = vrot.lane.b32.xlu1 %v2381_v41, %s4211_s29 }
 0x217   : > { %v964_v61 = vadd.f32 %v962_v35, %v952_v38  ;;  %v965_v0 = vadd.f32 %v963_v27, %v953_v10  ;;  %v968_v6 = vpop.permute.xlu0 %967  ;;  %v970_v44 = vpop.permute.xlu1 %969  ;;  %v1116_v35 = vstv %s1867_s10  ;;  %v1128_v27 = vstv %s3041_s18  ;;  %s3131_s10 = sld [smem:[#allocation8 + $0x17]]  ;;  %s3134_s18 = sld [smem:[#allocation8 + $0x20]] }
 0x218   : > { %v971_v46 = vsel %vm826_vm7, %v968_v6, %v970_v44  ;;  %v972_v16 = vsel %vm826_vm7, %v970_v44, %v968_v6 }
 0x219   : > { %v974_v26 = vmul.f32 %v973_v3, %v972_v16  ;;  %v975_v53 = vmul.f32 %v973_v3, %v971_v46  ;;  %1568 = vrot.lane.b32.xlu0 %v2383_v42, %s4211_s29  ;;  %1232 = vrot.lane.b32.xlu1 %v2615_v14, %s2172_s24 }
 0x21b   : > { %v976_v50 = vadd.f32 %v974_v26, %v964_v61  ;;  %v977_v4 = vadd.f32 %v975_v53, %v965_v0  ;;  %v980_v34 = vpop.permute.xlu0 %979  ;;  %v982_v9 = vpop.permute.xlu1 %981 }
 0x21c   : > { %v983_v51 = vsel %vm826_vm7, %v980_v34, %v982_v9  ;;  %v984_v49 = vsel %vm826_vm7, %v982_v9, %v980_v34 }
 0x21d   : > { %v986_v52 = vmul.f32 %v985_v1, %v984_v49  ;;  %v987_v37 = vmul.f32 %v985_v1, %v983_v51  ;;  %1404 = vrot.lane.b32.xlu0 %v2488_v22, %s4213_s28  ;;  %1406 = vrot.lane.b32.xlu1 %v2491_v23, %s4213_s28 }
 0x21f   : > { %v3052_v38 = vadd.f32 %v986_v52, %v976_v50  ;;  %v3054_v10 = vadd.f32 %v987_v37, %v977_v4  ;;  %v1110_v15 = vpop.permute.xlu0 %1109  ;;  %v1112_v25 = vpop.permute.xlu1 %1111  ;;  %v1140_v4 = vstv %s1869_s20  ;;  %s3145_s20 = sld [smem:[#allocation8 + $0x48]] }
 0x220   : > { %v1114_v45 = vsel %vm1113_vm8, %v1110_v15, %v1112_v25  ;;  %v1115_v28 = vsel %vm1113_vm8, %v1112_v25, %v1110_v15  ;;  %v1152_v15 = vstv %s3065_s5  ;;  %s3151_s5 = sld [smem:[#allocation8 + $0x51]] }
 0x221   : > { %1578 = vrot.lane.b32.xlu0 %v2600_v2, %s4211_s29  ;;  %1580 = vrot.lane.b32.xlu1 %v2603_v5, %s4211_s29  ;;  %v1117_v44 = vmul.f32 %v1116_v35, %v1114_v45  ;;  %v1118_v46 = vmul.f32 %v1116_v35, %v1115_v28 }
 0x223   : > { %v1123_v3 = vpop.permute.xlu0 %1122  ;;  %v1125_v61 = vpop.permute.xlu1 %1124 }
 0x224   : > { %v1126_v0 = vsel %vm1113_vm8, %v1123_v3, %v1125_v61  ;;  %v1127_v6 = vsel %vm1113_vm8, %v1125_v61, %v1123_v3 }
 0x225   : > { %v1129_v16 = vmul.f32 %v1128_v27, %v1126_v0  ;;  %v1130_v26 = vmul.f32 %v1128_v27, %v1127_v6  ;;  %1242 = vrot.lane.b32.xlu0 %v2504_v33, %s2172_s24  ;;  %1244 = vrot.lane.b32.xlu1 %v2506_v36, %s2172_s24  ;;  %v1164_v6 = vstv %s3075_s7  ;;  %s3153_s7 = sld [smem:[#allocation8 + $0x18]] }
 0x227   : > { %v1131_v53 = vadd.f32 %v1129_v16, %v1117_v44  ;;  %v1132_v1 = vadd.f32 %v1130_v26, %v1118_v46  ;;  %v1135_v50 = vpop.permute.xlu0 %1134  ;;  %v1137_v34 = vpop.permute.xlu1 %1136  ;;  %v1008_v26 = vstv %s3077_s8  ;;  %s3167_s8 = sld [smem:[#allocation8 + $0x49]] }
 0x228   : > { %v1138_v9 = vsel %vm1113_vm8, %v1135_v50, %v1137_v34  ;;  %v1139_v51 = vsel %vm1113_vm8, %v1137_v34, %v1135_v50  ;;  %v1014_v34 = vstv %s3087_s9  ;;  %s3169_s9 = sld [smem:[#allocation8 + $0x19]] }
 0x229   : > { %1416 = vrot.lane.b32.xlu0 %v2613_v13, %s4213_s28  ;;  %v1141_v49 = vmul.f32 %v1140_v4, %v1138_v9  ;;  %v1142_v52 = vmul.f32 %v1140_v4, %v1139_v51  ;;  %1418 = vrot.lane.b32.xlu1 %v2615_v14, %s4213_s28  ;;  %v1176_v51 = vstv %s3090_s17  ;;  %s3171_s17 = sld [smem:[#allocation8 + $0x4a]] }
 0x22b   : > { %v1147_v37 = vpop.permute.xlu0 %1146  ;;  %v1143_v25 = vadd.f32 %v1141_v49, %v1131_v53  ;;  %v1144_v45 = vadd.f32 %v1142_v52, %v1132_v1  ;;  %v1149_v28 = vpop.permute.xlu1 %1148  ;;  %v1009_v49 = vmul.f32 %v1008_v26, %v2546_v7  ;;  %v1020_v7 = vstv %s3100_s21  ;;  %s3173_s21 = sld [smem:[#allocation8 + $0x1a]] }
 0x22c   : > { %v1150_v35 = vsel %vm1113_vm8, %v1147_v37, %v1149_v28  ;;  %v1151_v27 = vsel %vm1113_vm8, %v1149_v28, %v1147_v37  ;;  %v1015_v28 = vmul.f32 %v1014_v34, %v2414_v54 }
 0x22d   : > { %1590 = vrot.lane.b32.xlu0 %v2488_v22, %s4211_s29  ;;  %v1153_v3 = vmul.f32 %v1152_v15, %v1150_v35  ;;  %v1154_v61 = vmul.f32 %v1152_v15, %v1151_v27  ;;  %1592 = vrot.lane.b32.xlu1 %v2491_v23, %s4211_s29 }
 0x22f   : > { %v1159_v0 = vpop.permute.xlu0 %1158  ;;  %v1155_v44 = vadd.f32 %v1153_v3, %v1143_v25  ;;  %v1156_v46 = vadd.f32 %v1154_v61, %v1144_v45  ;;  %v1161_v16 = vpop.permute.xlu1 %1160  ;;  %v1188_v61 = vstv %s3103_s23  ;;  %s3183_s23 = sld [smem:[#allocation8 + $0x1b]] }
 0x230   : > { %v1162_v53 = vsel %vm1113_vm8, %v1159_v0, %v1161_v16  ;;  %v1163_v1 = vsel %vm1113_vm8, %v1161_v16, %v1159_v0  ;;  %v1010_v0 = vmul.f32 %v1008_v26, %v2549_v8 }
 0x231   : > { %1254 = vrot.lane.b32.xlu0 %v2625_v17, %s2172_s24  ;;  %v1165_v50 = vmul.f32 %v1164_v6, %v1162_v53  ;;  %v1166_v4 = vmul.f32 %v1164_v6, %v1163_v1  ;;  %1256 = vrot.lane.b32.xlu1 %v2627_v18, %s2172_s24  ;;  %v1017_v6 = vadd.f32 %v1015_v28, %v1009_v49 }
 0x232   : > { %v1016_v1 = vmul.f32 %v1014_v34, %v2417_v55 }
 0x233   : > { %v1171_v9 = vpop.permute.xlu0 %1170  ;;  %v1167_v52 = vadd.f32 %v1165_v50, %v1155_v44  ;;  %v1168_v37 = vadd.f32 %v1166_v4, %v1156_v46  ;;  %v1173_v15 = vpop.permute.xlu1 %1172  ;;  %v1021_v50 = vmul.f32 %v1020_v7, %v2564_v47  ;;  %v1026_v4 = vstv %s3115_s25  ;;  %s3187_s25 = sld [smem:[#allocation8 + $0x3]] }
 0x234   : > { %v1174_v25 = vsel %vm1113_vm8, %v1171_v9, %v1173_v15  ;;  %v1175_v45 = vsel %vm1113_vm8, %v1173_v15, %v1171_v9  ;;  %v1018_v49 = vadd.f32 %v1016_v1, %v1010_v0 }
 0x235   : > { %1428 = vrot.lane.b32.xlu0 %v2504_v33, %s4213_s28  ;;  %v1177_v35 = vmul.f32 %v1176_v51, %v1174_v25  ;;  %v1178_v27 = vmul.f32 %v1176_v51, %v1175_v45  ;;  %1430 = vrot.lane.b32.xlu1 %v2506_v36, %s4213_s28  ;;  %v1200_v51 = vstv %s3118_s30  ;;  %v1023_v55 = vadd.f32 %v1021_v50, %v1017_v6  ;;  %s3191_s30 = sld [smem:[#allocation8 + $0x4c]] }
 0x236   : > { %v1027_v25 = vmul.f32 %v1026_v4, %v2436_v62  ;;  %v1022_v45 = vmul.f32 %v1020_v7, %v2567_v48  ;;  %v1038_v50 = vstv %s3145_s20  ;;  %s3206_s20 = sld [smem:[#allocation8 + $0x33]] }
 0x237   : > { %v1183_v3 = vpop.permute.xlu0 %1182  ;;  %v1179_v44 = vadd.f32 %v1177_v35, %v1167_v52  ;;  %v1180_v46 = vadd.f32 %v1178_v27, %v1168_v37  ;;  %v1185_v54 = vpop.permute.xlu1 %1184  ;;  %v1032_v27 = vstv %s3131_s10  ;;  %s3194_s10 = sld [smem:[#allocation8 + $0x34]] }
 0x238   : > { %v1186_v16 = vsel %vm1113_vm8, %v1183_v3, %v1185_v54  ;;  %v1187_v53 = vsel %vm1113_vm8, %v1185_v54, %v1183_v3  ;;  %v1024_v0 = vadd.f32 %v1022_v45, %v1018_v49  ;;  %v1029_v62 = vadd.f32 %v1027_v25, %v1023_v55 }
 0x239   : > { %1602 = vrot.lane.b32.xlu0 %v2613_v13, %s4211_s29  ;;  %v1189_v8 = vmul.f32 %v1188_v61, %v1186_v16  ;;  %v1190_v26 = vmul.f32 %v1188_v61, %v1187_v53  ;;  %1604 = vrot.lane.b32.xlu1 %v2615_v14, %s4211_s29  ;;  %v1212_v61 = vstv %s3134_s18  ;;  %v1028_v54 = vmul.f32 %v1026_v4, %v2439_v63  ;;  %s3196_s18 = sld [smem:[#allocation8 + $0xa]]  ;;  %s3202_s29 = sld [smem:[#allocation8 + $0x31]] }
 0x23a   : > { %v1033_v16 = vmul.f32 %v1032_v27, %v2582_v56 }
 0x23b   : > { %v1195_v9 = vpop.permute.xlu0 %1194  ;;  %v1191_v34 = vadd.f32 %v1189_v8, %v1179_v44  ;;  %v1192_v47 = vadd.f32 %v1190_v26, %v1180_v46  ;;  %v1197_v52 = vpop.permute.xlu1 %1196  ;;  %v1224_v26 = vstv %s3151_s5  ;;  %s4298_s5 = smov 80  }
 0x23c   : > { %v1198_v37 = vsel %vm1113_vm8, %v1195_v9, %v1197_v52  ;;  %v1199_v15 = vsel %vm1113_vm8, %v1197_v52, %v1195_v9  ;;  %v1044_v9 = vstv %s3153_s7  ;;  %v1035_v49 = vadd.f32 %v1033_v16, %v1029_v62  ;;  %s3218_s7 = sld [smem:[#allocation8 + $0x23]] }
 0x23d   : > { %1266 = vrot.lane.b32.xlu0 %v2519_v59, %s2172_s24  ;;  %v1201_v28 = vmul.f32 %v1200_v51, %v1198_v37  ;;  %v1202_v35 = vmul.f32 %v1200_v51, %v1199_v15  ;;  %1268 = vrot.lane.b32.xlu1 %v2521_v60, %s2172_s24  ;;  %s3181_s24 = sld [smem:[#allocation8 + $0x4b]]  ;;  %v1030_v51 = vadd.f32 %v1028_v54, %v1024_v0 }
 0x23e   : > { %v1039_v52 = vmul.f32 %v1038_v50, %v2463_v11  ;;  %v1050_v11 = vstv %s3167_s8  ;;  %v1046_v0 = vmul.f32 %v1044_v9, %v2375_v40  ;;  %s3243_s8 = sld [smem:[#allocation8 + $0x24]] }
 0x23f   : > { %v1207_v3 = vpop.permute.xlu0 %1206  ;;  %v1203_v6 = vadd.f32 %v1201_v28, %v1191_v34  ;;  %v1204_v44 = vadd.f32 %v1202_v35, %v1192_v47  ;;  %v1209_v46 = vpop.permute.xlu1 %1208  ;;  %v1034_v47 = vmul.f32 %v1032_v27, %v2585_v57  ;;  %v1045_v57 = vmul.f32 %v1044_v9, %v2373_v39 }
 0x240   : > { %v1210_v48 = vsel %vm1113_vm8, %v1207_v3, %v1209_v46  ;;  %v1211_v7 = vsel %vm1113_vm8, %v1209_v46, %v1207_v3  ;;  %v1041_v3 = vadd.f32 %v1039_v52, %v1035_v49  ;;  %v1056_v39 = vstv %s3169_s9  ;;  %s3266_s9 = sld [smem:[#allocation8 + $0x39]]  ;;  %v4303_v46 = vld [vmem:[#allocation43_spill] sm:$0xff]  ;;  %v4307_v49 = vld [vmem:[#allocation52_spill] sm:$0xff] }
 0x241   : > { %1440 = vrot.lane.b32.xlu0 %v2625_v17, %s4213_s28  ;;  %v1213_v53 = vmul.f32 %v1212_v61, %v1210_v48  ;;  %v1214_v1 = vmul.f32 %v1212_v61, %v1211_v7  ;;  %1442 = vrot.lane.b32.xlu1 %v2627_v18, %s4213_s28  ;;  %s3204_s28 = sld [smem:[#allocation8 + $0x32]]  ;;  %v1036_v27 = vadd.f32 %v1034_v47, %v1030_v51  ;;  %v1062_v61 = vstv %s3171_s17 }
 0x242   : > { %v529_v48 = vstv %s3187_s25  ;;  %v469_v9 = vstv %s3202_s29  ;;  %s3268_s17 = sld [smem:[#allocation8 + $0x3a]]  ;;  %v1314_v51 = vstv %s3220_s0  ;;  %v1057_v47 = vmul.f32 %v1056_v39, %v2600_v2  ;;  %s3290_s0 = sld [smem:[#allocation8 + $0x8]] }
 0x243   : > { %v1219_v8 = vpop.permute.xlu0 %1218  ;;  %v1215_v63 = vadd.f32 %v1213_v53, %v1203_v6  ;;  %v1216_v56 = vadd.f32 %v1214_v1, %v1204_v44  ;;  %v1221_v4 = vpop.permute.xlu1 %1220  ;;  %v1040_v6 = vmul.f32 %v1038_v50, %v2466_v12  ;;  %v1051_v44 = vmul.f32 %v1050_v11, %v2381_v41  ;;  %s3550_s29 = sld [smem:[#allocation8 + $0x37]]  ;;  %s3572_s25 = sld [smem:[#allocation8 + $0x5]] }
 0x244   : > { %v1222_v55 = vsel %vm1113_vm8, %v1219_v8, %v1221_v4  ;;  %v1223_v34 = vsel %vm1113_vm8, %v1221_v4, %v1219_v8  ;;  %v1047_v41 = vadd.f32 %v1045_v57, %v1041_v3  ;;  %v1302_v4 = vstv %s3218_s7  ;;  %s3292_s7 = sld [smem:[#allocation8 + $0x9]] }
 0x245   : > { %1614 = vrot.lane.b32.xlu0 %v2504_v33, %s4298_s5  ;;  %v1225_v37 = vmul.f32 %v1224_v26, %v1222_v55  ;;  %v1226_v15 = vmul.f32 %v1224_v26, %v1223_v34  ;;  %1616 = vrot.lane.b32.xlu1 %v2506_v36, %s4298_s5  ;;  %v1042_v50 = vadd.f32 %v1040_v6, %v1036_v27  ;;  %v1326_v6 = vstv %s3243_s8  ;;  %s3589_s8 = sld [smem:[#allocation8 + $0x6]] }
 0x246   : > { %v1053_v57 = vadd.f32 %v1051_v44, %v1047_v41  ;;  %v3307_v44 = vmul.f32 %v1062_v61, %v2488_v22 }
 0x247   : > { %v3226_v25 = vpop.permute.xlu0 %1230  ;;  %v3230_v45 = vadd.f32 %v1225_v37, %v1215_v63  ;;  %v3232_v28 = vadd.f32 %v1226_v15, %v1216_v56  ;;  %v1296_v35 = vpop.permute.xlu1 %1295  ;;  %v1052_v63 = vmul.f32 %v1050_v11, %v2383_v42  ;;  %v493_v56 = vstv %s3204_s28  ;;  %s3510_s28 = sld [smem:[#allocation8 + $0x26]] }
 0x248   : > { %v1048_v11 = vadd.f32 %v1046_v0, %v1042_v50  ;;  %v3304_v0 = vmul.f32 %v1056_v39, %v2603_v5  ;;  %v3324_v50 = vadd.f32 %v1057_v47, %v1053_v57 }
 0x249   : > { %1452 = vrot.lane.b32.xlu0 %v2519_v59, %s4299_s27  ;;  %1454 = vrot.lane.b32.xlu1 %v2521_v60, %s4299_s27  ;;  %s3259_s27 = sld [smem:[#allocation8 + $0x38]] }
 0x24a   : > { %v3326_v41 = vadd.f32 %v1052_v63, %v1048_v11  ;;  %v3347_v63 = vsel %vm454_vm10, %v2673_v21, %v2675_v24  ;;  %v467_v11 = vsel %vm454_vm10, %v2701_v29, %v2703_v30 }
 0x24b   : > { %v1298_v54 = vpop.permute.xlu0 %1297  ;;  %v1309_v1 = vpop.permute.xlu1 %1308 }
 0x24c   : > { %v1300_v12 = vsel %vm1299_vm9, %v1296_v35, %v1298_v54  ;;  %v1301_v53 = vsel %vm1299_vm9, %v1298_v54, %v1296_v35  ;;  %v3310_v54 = vmul.f32 %v1062_v61, %v2491_v23 }
 0x24d   : > { %1626 = vrot.lane.b32.xlu0 %v2625_v17, %s4298_s5  ;;  %1628 = vrot.lane.b32.xlu1 %v2627_v18, %s4298_s5  ;;  %v1303_v35 = vmul.f32 %v1302_v4, %v1300_v12  ;;  %v1304_v2 = vmul.f32 %v1302_v4, %v1301_v53  ;;  %v527_v12 = vsel %vm454_vm10, %v2661_v19, %v2663_v20 }
 0x24e   : > { %v528_v53 = vsel %vm454_vm10, %v2663_v20, %v2661_v19 }
 0x24f   : > { %v1311_v42 = vpop.permute.xlu0 %1310  ;;  %v1321_v15 = vpop.permute.xlu1 %1320  ;;  %v655_v19 = vstv %s3259_s27  ;;  %s3591_s27 = sld [smem:[#allocation8 + $0x3c]] }
 0x250   : > { %v1312_v52 = vsel %vm1299_vm9, %v1309_v1, %v1311_v42  ;;  %v1313_v37 = vsel %vm1299_vm9, %v1311_v42, %v1309_v1  ;;  %v3337_v42 = vmul.f32 %v529_v48, %v527_v12  ;;  %v481_v12 = vstv %s3279_s13  ;;  %s3437_s13 = sld [smem:[#allocation8 + $0x5c]] }
 0x251   : > { %v1315_v27 = vmul.f32 %v1314_v51, %v1312_v52  ;;  %v1316_v3 = vmul.f32 %v1314_v51, %v1313_v37  ;;  %1638 = vrot.lane.b32.xlu0 %v2519_v59, %s4298_s5  ;;  %1640 = vrot.lane.b32.xlu1 %v2521_v60, %s4298_s5  ;;  %v3333_v51 = vmul.f32 %v529_v48, %v528_v53  ;;  %v679_v52 = vstv %s3266_s9  ;;  %s3341_s5 = sld [smem:[#allocation8 + $0x55]]  ;;  %s3599_s9 = sld [smem:[#allocation8 + $0xc]] }
 0x252   : > { %v457_v37 = vstv %s3277_s14  ;;  %v505_v53 = vstv %s3282_s22  ;;  %s3375_s14 = sld [smem:[#allocation8 + $0x2b]]  ;;  %s3544_s22 = sld [smem:[#allocation8 + $0x4]] }
 0x253   : > { %v1317_v5 = vadd.f32 %v1315_v27, %v1303_v35  ;;  %v1318_v22 = vadd.f32 %v1316_v3, %v1304_v2  ;;  %v1323_v39 = vpop.permute.xlu0 %1322  ;;  %v1482_v1 = vpop.permute.xlu1 %1481  ;;  %v468_v35 = vsel %vm454_vm10, %v2703_v30, %v2701_v29  ;;  %v1500_v29 = vstv %s3301_s12  ;;  %s3408_s12 = sld [smem:[#allocation8 + $0x25]] }
 0x254   : > { %v1324_v23 = vsel %vm1299_vm9, %v1321_v15, %v1323_v39  ;;  %v1325_v61 = vsel %vm1299_vm9, %v1323_v39, %v1321_v15  ;;  %v470_v30 = vmul.f32 %v469_v9, %v468_v35  ;;  %v4308_v39 = vld [vmem:[#allocation53_spill] sm:$0xff] }
 0x255   : > { %v1327_v20 = vmul.f32 %v1326_v6, %v1324_v23  ;;  %v1328_v4 = vmul.f32 %v1326_v6, %v1325_v61  ;;  %v3366_v6 = vsel %vm454_vm10, %v2675_v24, %v2673_v21  ;;  %v1488_v23 = vstv %s3299_s19  ;;  %v4300_v24 = vld [vmem:[#allocation41_spill] sm:$0xff]  ;;  %s3462_s19 = sld [smem:[#allocation8 + $0x56]] }
 0x256   : > { %v471_v61 = vmul.f32 %v469_v9, %v467_v11  ;;  %v492_v21 = vsel %vm454_vm10, %v2715_v32, %v2713_v31  ;;  %v455_v9 = vsel %vm454_vm10, %v2777_v58, %v4300_v24 }
 0x257   : > { %v1329_v15 = vadd.f32 %v1327_v20, %v1317_v5  ;;  %v1330_v48 = vadd.f32 %v1328_v4, %v1318_v22  ;;  %v1484_v57 = vpop.permute.xlu0 %1483  ;;  %v1495_v3 = vpop.permute.xlu1 %1494  ;;  %v643_v5 = vstv %s3284_s15  ;;  %v667_v22 = vstv %s3290_s0  ;;  %s3493_s15 = sld [smem:[#allocation8 + $0x2c]]  ;;  %s3813_s0 = sld [smem:[#allocation8 + $0x21]] }
 0x258   : > { %v1486_v2 = vsel %vm1485_vm12, %v1482_v1, %v1484_v57  ;;  %v1487_v27 = vsel %vm1485_vm12, %v1484_v57, %v1482_v1  ;;  %v456_v1 = vsel %vm454_vm10, %v4300_v24, %v2777_v58  ;;  %v491_v4 = vsel %vm454_vm10, %v2713_v31, %v2715_v32  ;;  %v4301_v31 = vld [vmem:[#allocation35_spill] sm:$0xff]  ;;  %v4302_v32 = vld [vmem:[#allocation36_spill] sm:$0xff] }
 0x259   : > { %v1489_v40 = vmul.f32 %v1488_v23, %v1486_v2  ;;  %v1490_v16 = vmul.f32 %v1488_v23, %v1487_v27  ;;  %v494_v55 = vmul.f32 %v493_v56, %v492_v21  ;;  %v654_v26 = vsel %vm640_vm11, %v4302_v32, %v4301_v31 }
 0x25a   : > { %v458_v58 = vmul.f32 %v457_v37, %v456_v1  ;;  %v1338_v24 = vstv %s3341_s5  ;;  %v653_v1 = vsel %vm640_vm11, %v4301_v31, %v4302_v32  ;;  %v656_v31 = vmul.f32 %v655_v19, %v654_v26  ;;  %s3829_s5 = sld [smem:[#allocation8 + $0x52]] }
 0x25b   : > { %v1497_v20 = vpop.permute.xlu0 %1496  ;;  %v1333_v35 = vpop.permute.xlu1 %1332  ;;  %v1512_v32 = vstv %s3375_s14  ;;  %s3831_s14 = sld [smem:[#allocation8 + $0x28]] }
 0x25c   : > { %v1498_v57 = vsel %vm1485_vm12, %v1495_v3, %v1497_v20  ;;  %v1499_v11 = vsel %vm1485_vm12, %v1497_v20, %v1495_v3  ;;  %v4304_v3 = vld [vmem:[#allocation42_spill] sm:$0xff]  ;;  %v459_v20 = vmul.f32 %v457_v37, %v455_v9 }
 0x25d   : > { %v1501_v62 = vmul.f32 %v1500_v29, %v1498_v57  ;;  %v1502_v34 = vmul.f32 %v1500_v29, %v1499_v11  ;;  %v479_v2 = vsel %vm454_vm10, %v4304_v3, %v4303_v46  ;;  %v480_v27 = vsel %vm454_vm10, %v4303_v46, %v4304_v3  ;;  %v4305_v3 = vld [vmem:[#allocation28_spill] sm:$0xff] }
 0x25e   : > { %v495_v46 = vmul.f32 %v493_v56, %v491_v4  ;;  %v482_v37 = vmul.f32 %v481_v12, %v480_v27  ;;  %v483_v9 = vmul.f32 %v481_v12, %v479_v2  ;;  %v473_v7 = vadd.f32 %v471_v61, %v459_v20  ;;  %v4311_v20 = vld [vmem:[#allocation54_spill] sm:$0xff] }
 0x25f   : > { %v1503_v23 = vadd.f32 %v1501_v62, %v1489_v40  ;;  %v1504_v29 = vadd.f32 %v1502_v34, %v1490_v16  ;;  %v1335_v21 = vpop.permute.xlu0 %1334  ;;  %v1507_v8 = vpop.permute.xlu1 %1506  ;;  %v4306_v62 = vld [vmem:[#allocation27_spill] sm:$0xff] }
 0x260   : > { %v1336_v57 = vsel %vm1299_vm9, %v1333_v35, %v1335_v21  ;;  %v1337_v11 = vsel %vm1299_vm9, %v1335_v21, %v1333_v35  ;;  %v3432_v16 = vsel %vm454_vm10, %v4306_v62, %v4305_v3  ;;  %v657_v35 = vmul.f32 %v655_v19, %v653_v1  ;;  %v4309_v19 = vld [vmem:[#allocation38_spill] sm:$0xff] }
 0x261   : > { %v1339_v40 = vmul.f32 %v1338_v24, %v1336_v57  ;;  %v1340_v34 = vmul.f32 %v1338_v24, %v1337_v11  ;;  %v472_v21 = vadd.f32 %v470_v30, %v458_v58  ;;  %v642_v24 = vsel %vm640_vm11, %v4308_v39, %v4307_v49  ;;  %v4310_v30 = vld [vmem:[#allocation37_spill] sm:$0xff]  ;;  %v4312_v57 = vld [vmem:[#allocation55_spill] sm:$0xff] }
 0x262   : > { %v485_v1 = vadd.f32 %v483_v9, %v473_v7  ;;  %v644_v11 = vmul.f32 %v643_v5, %v642_v24  ;;  %v4313_v24 = vld [vmem:[#allocation44_spill] sm:$0xff] }
 0x263   : > { %v1341_v56 = vadd.f32 %v1339_v40, %v1329_v15  ;;  %v1342_v4 = vadd.f32 %v1340_v34, %v1330_v48  ;;  %v1509_v47 = vpop.permute.xlu0 %1508  ;;  %v1345_v2 = vpop.permute.xlu1 %1344  ;;  %v677_v15 = vsel %vm640_vm11, %v4310_v30, %v4309_v19  ;;  %v641_v48 = vsel %vm640_vm11, %v4307_v49, %v4308_v39 }
 0x264   : > { %v1510_v26 = vsel %vm1485_vm12, %v1507_v8, %v1509_v47  ;;  %v1511_v12 = vsel %vm1485_vm12, %v1509_v47, %v1507_v8  ;;  %v484_v27 = vadd.f32 %v482_v37, %v472_v21  ;;  %v666_v8 = vsel %vm640_vm11, %v4312_v57, %v4311_v20 }
 0x265   : > { %v1513_v61 = vmul.f32 %v1512_v32, %v1510_v26  ;;  %v1514_v58 = vmul.f32 %v1512_v32, %v1511_v12  ;;  %v1350_v47 = vstv %s3408_s12  ;;  %v665_v49 = vsel %vm640_vm11, %v4311_v20, %v4312_v57  ;;  %v4314_v26 = vld [vmem:[#allocation45_spill] sm:$0xff]  ;;  %s3837_s12 = sld [smem:[#allocation8 + $0x22]] }
 0x266   : > { %v678_v34 = vsel %vm640_vm11, %v4309_v19, %v4310_v30  ;;  %v645_v37 = vmul.f32 %v643_v5, %v641_v48  ;;  %v496_v19 = vadd.f32 %v494_v55, %v484_v27  ;;  %v503_v5 = vsel %vm454_vm10, %v4313_v24, %v4314_v26 }
 0x267   : > { %v1515_v39 = vadd.f32 %v1513_v61, %v1503_v23  ;;  %v1516_v40 = vadd.f32 %v1514_v58, %v1504_v29  ;;  %v1347_v7 = vpop.permute.xlu0 %1346  ;;  %v1519_v21 = vpop.permute.xlu1 %1518  ;;  %v504_v23 = vsel %vm454_vm10, %v4314_v26, %v4313_v24  ;;  %v668_v29 = vmul.f32 %v667_v22, %v666_v8 }
 0x268   : > { %v1348_v9 = vsel %vm1299_vm9, %v1345_v2, %v1347_v7  ;;  %v1349_v32 = vsel %vm1299_vm9, %v1347_v7, %v1345_v2  ;;  %v669_v2 = vmul.f32 %v667_v22, %v665_v49  ;;  %v1524_v30 = vstv %s3437_s13  ;;  %s3841_s13 = sld [smem:[#allocation8 + $0x59]] }
 0x269   : > { %v1351_v12 = vmul.f32 %v1350_v47, %v1348_v9  ;;  %v1352_v61 = vmul.f32 %v1350_v47, %v1349_v32  ;;  %v497_v48 = vadd.f32 %v495_v46, %v485_v1  ;;  %v658_v58 = vadd.f32 %v656_v31, %v644_v11  ;;  %v4315_v11 = vld [vmem:[#allocation57_spill] sm:$0xff] }
 0x26a   : > { %v506_v47 = vmul.f32 %v505_v53, %v504_v23  ;;  %v659_v55 = vadd.f32 %v657_v35, %v645_v37  ;;  %v507_v49 = vmul.f32 %v505_v53, %v503_v5  ;;  %v680_v35 = vmul.f32 %v679_v52, %v678_v34  ;;  %v4316_v37 = vld [vmem:[#allocation56_spill] sm:$0xff] }
 0x26b   : > { %v1353_v20 = vadd.f32 %v1351_v12, %v1341_v56  ;;  %v1354_v57 = vadd.f32 %v1352_v61, %v1342_v4  ;;  %v1521_v8 = vpop.permute.xlu0 %1520  ;;  %v1357_v22 = vpop.permute.xlu1 %1356  ;;  %v670_v9 = vadd.f32 %v668_v29, %v658_v58  ;;  %v516_v56 = vsel %vm454_vm10, %v4305_v3, %v4306_v62 }
 0x26c   : > { %v1522_v27 = vsel %vm1485_vm12, %v1519_v21, %v1521_v8  ;;  %v1523_v7 = vsel %vm1485_vm12, %v1521_v8, %v1519_v21  ;;  %v671_v4 = vadd.f32 %v669_v2, %v659_v55  ;;  %v1362_v1 = vstv %s3462_s19  ;;  %s3843_s19 = sld [smem:[#allocation8 + $0x2f]] }
 0x26d   : > { %v1525_v46 = vmul.f32 %v1524_v30, %v1522_v27  ;;  %v1526_v31 = vmul.f32 %v1524_v30, %v1523_v7  ;;  %v689_v53 = vsel %vm640_vm11, %v4316_v37, %v4315_v11  ;;  %v690_v32 = vsel %vm640_vm11, %v4315_v11, %v4316_v37 }
 0x26e   : > { %v681_v21 = vmul.f32 %v679_v52, %v677_v15  ;;  %v508_v24 = vadd.f32 %v506_v47, %v496_v19  ;;  %v509_v12 = vadd.f32 %v507_v49, %v497_v48  ;;  %v682_v61 = vadd.f32 %v680_v35, %v670_v9  ;;  %v4321_v48 = vld [vmem:[#allocation40_spill] sm:$0xff]  ;;  %v4322_v49 = vld [vmem:[#allocation39_spill] sm:$0xff] }
 0x26f   : > { %v1527_v3 = vadd.f32 %v1525_v46, %v1515_v39  ;;  %v1528_v62 = vadd.f32 %v1526_v31, %v1516_v40  ;;  %v1359_v34 = vpop.permute.xlu0 %1358  ;;  %v1531_v29 = vpop.permute.xlu1 %1530  ;;  %v4317_v39 = vstv %s3292_s7  ;;  %v1536_v55 = vstv %s3493_s15  ;;  %s3825_s7 = sld [smem:[#allocation8 + $0x2e]]  ;;  %s3849_s15 = sld [smem:[#allocation8 + $0x53]] }
 0x270   : > { %v1360_v26 = vsel %vm1299_vm9, %v1357_v22, %v1359_v34  ;;  %v1361_v23 = vsel %vm1299_vm9, %v1359_v34, %v1357_v22  ;;  %v683_v30 = vadd.f32 %v681_v21, %v671_v4  ;;  %v692_v58 = vmul.f32 %v4317_v39, %v690_v32  ;;  %v4324_v34 = vld [vmem:[#allocation24_spill] sm:$0xff]  ;;  %v4325_v21 = vld [vmem:[#allocation23_spill] sm:$0xff] }
 0x271   : > { %v1363_v5 = vmul.f32 %v1362_v1, %v1360_v26  ;;  %v1364_v2 = vmul.f32 %v1362_v1, %v1361_v23  ;;  %v4318_v40 = vmov %v4317_v39  ;;  %v4319_v27 = vstv %s3206_s20  ;;  %s3574_s20 = sld [smem:[#allocation8 + $0xb]] }
 0x272   : > { %v693_v8 = vmul.f32 %v4318_v40, %v689_v53  ;;  %v518_v52 = vmul.f32 %v4319_v27, %v516_v56  ;;  %v4320_v15 = vmov %v4319_v27  ;;  %v701_v9 = vsel %vm640_vm11, %v4322_v49, %v4321_v48 }
 0x273   : > { %v519_v19 = vmul.f32 %v4320_v15, %v3432_v16  ;;  %v1365_v47 = vadd.f32 %v1363_v5, %v1353_v20  ;;  %v1366_v7 = vadd.f32 %v1364_v2, %v1354_v57  ;;  %v1533_v22 = vpop.permute.xlu0 %1532  ;;  %v702_v46 = vsel %vm640_vm11, %v4321_v48, %v4322_v49  ;;  %v1369_v20 = vpop.permute.xlu1 %1368  ;;  %v4331_v49 = vld [vmem:[#allocation26_spill] sm:$0xff] }
 0x274   : > { %v1534_v31 = vsel %vm1485_vm12, %v1531_v29, %v1533_v22  ;;  %v1535_v16 = vsel %vm1485_vm12, %v1533_v22, %v1531_v29  ;;  %v520_v57 = vadd.f32 %v518_v52, %v508_v24  ;;  %v4323_v1 = vstv %s3194_s10  ;;  %s3601_s10 = sld [smem:[#allocation8 + $0x3d]] }
 0x275   : > { %v521_v56 = vadd.f32 %v519_v19, %v509_v12  ;;  %v1537_v35 = vmul.f32 %v1536_v55, %v1534_v31  ;;  %v1538_v4 = vmul.f32 %v1536_v55, %v1535_v16  ;;  %v542_v11 = vmul.f32 %v4323_v1, %v3366_v6 }
 0x276   : > { %v694_v37 = vadd.f32 %v692_v58, %v682_v61  ;;  %v695_v53 = vadd.f32 %v693_v8, %v683_v30  ;;  %v1374_v32 = vstv %s3510_s28  ;;  %v713_v26 = vsel %vm640_vm11, %v4325_v21, %v4324_v34  ;;  %s3851_s28 = sld [smem:[#allocation8 + $0x29]] }
 0x277   : > { %v714_v24 = vsel %vm640_vm11, %v4324_v34, %v4325_v21  ;;  %v3564_v23 = vadd.f32 %v1537_v35, %v1527_v3  ;;  %v3566_v29 = vadd.f32 %v1538_v4, %v1528_v62  ;;  %v1371_v6 = vpop.permute.xlu0 %1370  ;;  %v4326_v12 = vstv %s3268_s17  ;;  %v3580_v3 = vpop.permute.xlu1 %1542  ;;  %s3632_s17 = sld [smem:[#allocation8 + $0x3e]]  ;;  %v805_v4 = vld [vmem:[#allocation6 + $0x10] ss:$8 sm:$0x3] }
 0x278   : > { %v704_v61 = vmul.f32 %v4326_v12, %v702_v46  ;;  %v4327_v5 = vmov %v4326_v12  ;;  %v1372_v30 = vsel %vm1299_vm9, %v1369_v20, %v1371_v6  ;;  %v1373_v39 = vsel %vm1299_vm9, %v1371_v6, %v1369_v20 }
 0x279   : > { %v705_v2 = vmul.f32 %v4327_v5, %v701_v9  ;;  %v532_v62 = vadd.f32 %v3333_v51, %v520_v57  ;;  %v533_v58 = vadd.f32 %v3337_v42, %v521_v56  ;;  %v1375_v40 = vmul.f32 %v1374_v32, %v1372_v30  ;;  %v4332_v42 = vld [vmem:[#allocation25_spill] sm:$0xff]  ;;  %v4333_v57 = vld [vmem:[#allocation47_spill] sm:$0xff]  ;;  %v4334_v56 = vld [vmem:[#allocation46_spill] sm:$0xff] }
 0x27a   : > { %v1376_v8 = vmul.f32 %v1374_v32, %v1373_v39  ;;  %v4328_v55 = vmov %v4323_v1  ;;  %v4329_v52 = vstv %s3196_s18  ;;  %v706_v19 = vadd.f32 %v704_v61, %v694_v37  ;;  %s3630_s18 = sld [smem:[#allocation8 + $0xd]]  ;;  %v4338_v30 = vld [vmem:[#allocation30_spill] sm:$0xff]  ;;  %v4339_v39 = vld [vmem:[#allocation29_spill] sm:$0xff] }
 0x27b   : > { %v543_v27 = vmul.f32 %v4328_v55, %v3347_v63  ;;  %v716_v15 = vmul.f32 %v4329_v52, %v714_v24  ;;  %v707_v22 = vadd.f32 %v705_v2, %v695_v53  ;;  %v4330_v48 = vmov %v4329_v52  ;;  %v3607_v31 = vpop.permute.xlu0 %1544  ;;  %v4341_v55 = vld [vmem:[#allocation58_spill] sm:$0xff] }
 0x27c   : > { %v717_v51 = vmul.f32 %v4330_v48, %v713_v26  ;;  %v725_v9 = vsel %vm640_vm11, %v4332_v42, %v4331_v49  ;;  %v3603_v63 = vadd.f32 %v1375_v40, %v1365_v47  ;;  %v3605_v46 = vadd.f32 %v1376_v8, %v1366_v7  ;;  %v3622_v7 = vpop.permute.xlu1 %1380  ;;  %v4340_v8 = vld [vmem:[#allocation59_spill] sm:$0xff] }
 0x27d   : > { %v726_v16 = vsel %vm640_vm11, %v4331_v49, %v4332_v42  ;;  %v553_v20 = vstv %s3544_s22  ;;  %v551_v35 = vsel %vm454_vm10, %v4334_v56, %v4333_v57  ;;  %v552_v47 = vsel %vm454_vm10, %v4333_v57, %v4334_v56  ;;  %v4344_v56 = vld [vmem:[#allocation49_spill] sm:$0xff]  ;;  %s3853_s22 = sld [smem:[#allocation8 + $0x60]] }
 0x27e   : > { %v544_v1 = vadd.f32 %v542_v11, %v532_v62  ;;  %v545_v37 = vadd.f32 %v543_v27, %v533_v58  ;;  %v4335_v53 = vstv %s3173_s21  ;;  %v718_v34 = vadd.f32 %v716_v15, %v706_v19 }
 0x27f   : > { %v3628_v32 = vmul.f32 %v4335_v53, %v2613_v13  ;;  %v719_v21 = vadd.f32 %v717_v51, %v707_v22  ;;  %v3636_v26 = vadd.f32 %v3307_v44, %v3324_v50  ;;  %v3640_v11 = vadd.f32 %v3304_v0, %v3326_v41  ;;  %v3646_v2 = vpop.permute.xlu0 %1382 }
 0x280   : > { %v4336_v24 = vstv %s3200_s6  ;;  %v554_v61 = vmul.f32 %v553_v20, %v552_v47  ;;  %v555_v5 = vmul.f32 %v553_v20, %v551_v35  ;;  %v563_v44 = vsel %vm454_vm10, %v4339_v39, %v4338_v30  ;;  %v3658_v62 = vpop.permute.xlu1 %1554  ;;  %v4345_v35 = vld [vmem:[#allocation48_spill] sm:$0xff]  ;;  %s3807_s6 = sld [smem:[#allocation8 + $0x2d]] }
 0x281   : > { %v728_v6 = vmul.f32 %v4336_v24, %v726_v16  ;;  %v4337_v12 = vmov %v4336_v24  ;;  %v564_v0 = vsel %vm454_vm10, %v4338_v30, %v4339_v39  ;;  %v577_v50 = vstv %s3572_s25  ;;  %s4037_s25 = sld [smem:[#allocation8 + $0x30]] }
 0x282   : > { %v729_v13 = vmul.f32 %v4337_v12, %v725_v9  ;;  %v739_v41 = vstv %s3574_s20  ;;  %v556_v58 = vadd.f32 %v554_v61, %v544_v1  ;;  %v557_v40 = vadd.f32 %v555_v5, %v545_v37  ;;  %v4347_v12 = vld [vmem:[#allocation60_spill] sm:$0xff]  ;;  %s4059_s20 = sld [smem:[#allocation8 + $0x61]] }
 0x283   : > { %v737_v27 = vsel %vm640_vm11, %v4341_v55, %v4340_v8  ;;  %v738_v52 = vsel %vm640_vm11, %v4340_v8, %v4341_v55  ;;  %v601_v15 = vstv %s3589_s8  ;;  %v730_v19 = vadd.f32 %v728_v6, %v718_v34  ;;  %v3676_v57 = vpop.permute.xlu0 %1556  ;;  %v4346_v6 = vld [vmem:[#allocation61_spill] sm:$0xff]  ;;  %v4348_v8 = vld [vmem:[#allocation63_spill] sm:$0xff]  ;;  %v4349_v55 = vld [vmem:[#allocation62_spill] sm:$0xff]  ;;  %s1917_s8 = sshll.u32 %s2217_s16, 7  ;;  %s2175_s16 = smov [#allocation9]  }
 0x284   : > { %v731_v22 = vadd.f32 %v729_v13, %v719_v21  ;;  %v751_v48 = vstv %s3591_s27  ;;  %v4342_v51 = vstv %s3222_s1  ;;  %v763_v16 = vstv %s3599_s9  ;;  %v3686_v34 = vpop.permute.xlu1 %1392  ;;  %s3795_s1 = sld [smem:[#allocation8 + $0x5d]]  ;;  %s4385_s27 = sshll.u32 %s2346_s4, 3 }
 0x285   : > { %v566_v49 = vmul.f32 %v4342_v51, %v564_v0  ;;  %v4343_v42 = vmov %v4342_v51  ;;  %v775_v20 = vstv %s3601_s10  ;;  %v575_v47 = vsel %vm454_vm10, %v4345_v35, %v4344_v56  ;;  %s215_s9 = scalar_lea.vmem [#allocation9], %s4385_s27 }
 0x286   : > { %v567_v9 = vmul.f32 %v4343_v42, %v563_v44  ;;  %v576_v1 = vsel %vm454_vm10, %v4344_v56, %v4345_v35  ;;  %v740_v37 = vmul.f32 %v739_v41, %v738_v52  ;;  %v741_v53 = vmul.f32 %v739_v41, %v737_v27  ;;  %v4350_v52 = vld [vmem:[#allocation32_spill] sm:$0xff]  ;;  %v4353_v35 = vld [vmem:[#allocation65_spill] sm:$0xff]  ;;  %s1707_s10 = sshll.u32 %s215_s9, 4  ;;  %s4110_s10 = int_to_ptr.vmem [resolvable:$true] %s1707_s10 }
 0x287   : > { %v568_v21 = vadd.f32 %v566_v49, %v556_v58  ;;  %v749_v13 = vsel %vm640_vm11, %v4347_v12, %v4346_v6  ;;  %v750_v61 = vsel %vm640_vm11, %v4346_v6, %v4347_v12  ;;  %v787_v39 = vstv %s3630_s18  ;;  %v3706_v27 = vpop.permute.xlu0 %1394 }
 0x288   : > { %v569_v24 = vadd.f32 %v567_v9, %v557_v40  ;;  %v742_v5 = vadd.f32 %v740_v37, %v730_v19  ;;  %v743_v30 = vadd.f32 %v741_v53, %v731_v22  ;;  %v799_v44 = vstv %s3632_s17  ;;  %v4351_v19 = vld [vmem:[#allocation31_spill] sm:$0xff]  ;;  %v3716_v42 = vpop.permute.xlu1 %1566 }
 0x289   : > { %v578_v0 = vmul.f32 %v577_v50, %v576_v1  ;;  %v579_v41 = vmul.f32 %v577_v50, %v575_v47  ;;  %v761_v58 = vsel %vm640_vm11, %v4349_v55, %v4348_v8  ;;  %v762_v40 = vsel %vm640_vm11, %v4348_v8, %v4349_v55  ;;  %4352 = vst [vmem:[#allocation41_spill] sm:$0xff] %v3716_v42  ;;  %v4354_v47 = vld [vmem:[#allocation64_spill] sm:$0xff] }
 0x28a   : > { %v587_v22 = vsel %vm454_vm10, %v4351_v19, %v4350_v52  ;;  %v588_v50 = vsel %vm454_vm10, %v4350_v52, %v4351_v19  ;;  %v752_v51 = vmul.f32 %v751_v48, %v750_v61  ;;  %v753_v49 = vmul.f32 %v751_v48, %v749_v13 }
 0x28b   : > { %v580_v9 = vadd.f32 %v578_v0, %v568_v21  ;;  %v581_v56 = vadd.f32 %v579_v41, %v569_v24  ;;  %v773_v1 = vsel %vm640_vm11, %v4354_v47, %v4353_v35  ;;  %v774_v37 = vsel %vm640_vm11, %v4353_v35, %v4354_v47  ;;  %v4357_v21 = vld [vmem:[#allocation67_spill] sm:$0xff]  ;;  %v4358_v24 = vld [vmem:[#allocation66_spill] sm:$0xff]  ;;  %v3738_v52 = vpop.permute.xlu0 %1568  ;;  %v4362_v35 = vld [vmem:[#allocation68_spill] sm:$0xff] }
 0x28c   : > { %v754_v53 = vadd.f32 %v752_v51, %v742_v5  ;;  %v755_v6 = vadd.f32 %v753_v49, %v743_v30  ;;  %v764_v12 = vmul.f32 %v763_v16, %v762_v40  ;;  %v765_v8 = vmul.f32 %v763_v16, %v761_v58  ;;  %v4359_v5 = vld [vmem:[#allocation51_spill] sm:$0xff]  ;;  %v4360_v30 = vld [vmem:[#allocation50_spill] sm:$0xff]  ;;  %v4361_v49 = vld [vmem:[#allocation69_spill] sm:$0xff] }
 0x28d   : > { %v4355_v61 = vstv %s3224_s2  ;;  %v785_v0 = vsel %vm640_vm11, %v4358_v24, %v4357_v21  ;;  %v786_v41 = vsel %vm640_vm11, %v4357_v21, %v4358_v24  ;;  %v599_v16 = vsel %vm454_vm10, %v4360_v30, %v4359_v5  ;;  %s3797_s2 = sld [smem:[#allocation8 + $0x57]] }
 0x28e   : > { %v590_v48 = vmul.f32 %v4355_v61, %v588_v50  ;;  %v4356_v13 = vmov %v4355_v61  ;;  %v600_v58 = vsel %vm454_vm10, %v4359_v5, %v4360_v30  ;;  %v776_v40 = vmul.f32 %v775_v20, %v774_v37 }
 0x28f   : > { %v591_v55 = vmul.f32 %v4356_v13, %v587_v22  ;;  %v777_v19 = vmul.f32 %v775_v20, %v773_v1  ;;  %v3748_v22 = vpop.permute.xlu1 %1232  ;;  %v797_v47 = vsel %vm640_vm11, %v4362_v35, %v4361_v49  ;;  %v798_v61 = vsel %vm640_vm11, %v4361_v49, %v4362_v35  ;;  %v3758_v5 = vpop.permute.xlu0 %1404  ;;  %v4368_v49 = vld [vmem:[#allocation22_spill] sm:$0xff] }
 0x290   : > { %v592_v50 = vadd.f32 %v590_v48, %v580_v9  ;;  %v766_v13 = vadd.f32 %v764_v12, %v754_v53  ;;  %v767_v21 = vadd.f32 %v765_v8, %v755_v6  ;;  %v788_v24 = vmul.f32 %v787_v39, %v786_v41  ;;  %v4364_v12 = vld [vmem:[#allocation34_spill] sm:$0xff]  ;;  %v619_v8 = vld [vmem:[#allocation6 + $0x7] ss:$8 sm:$0x3] }
 0x291   : > { %v593_v51 = vadd.f32 %v591_v55, %v581_v56  ;;  %v789_v37 = vmul.f32 %v787_v39, %v785_v0  ;;  %v602_v20 = vmul.f32 %v601_v15, %v600_v58  ;;  %v603_v1 = vmul.f32 %v601_v15, %v599_v16  ;;  %v4365_v39 = vld [vmem:[#allocation33_spill] sm:$0xff] }
 0x292   : > { %v4363_v9 = vstv %s3173_s21  ;;  %v1066_v48 = vadd.f32 %v3310_v54, %v3640_v11  ;;  %v778_v55 = vadd.f32 %v776_v40, %v766_v13  ;;  %v779_v30 = vadd.f32 %v777_v19, %v767_v21  ;;  %v4367_v40 = vld [vmem:[#allocation21_spill] sm:$0xff]  ;;  %s3809_s21 = sld [smem:[#allocation8 + $0x27]] }
 0x293   : > { %v1070_v56 = vmul.f32 %v4363_v9, %v2615_v14  ;;  %v800_v42 = vmul.f32 %v799_v44, %v798_v61  ;;  %v801_v53 = vmul.f32 %v799_v44, %v797_v47  ;;  %v3765_v6 = vpop.permute.xlu1 %1406  ;;  %v611_v15 = vsel %vm454_vm10, %v4365_v39, %v4364_v12  ;;  %v991_v47 = vld [vmem:[#allocation6 + $0x11] ss:$8 sm:$0x3]  ;;  %v3782_v61 = vpop.permute.xlu0 %1578 }
 0x294   : > { %v612_v14 = vsel %vm454_vm10, %v4364_v12, %v4365_v39  ;;  %v1071_v54 = vadd.f32 %v3628_v32, %v3636_v26  ;;  %v4366_v11 = vstv %s3181_s24  ;;  %v604_v0 = vadd.f32 %v602_v20, %v592_v50  ;;  %v1092_v12 = vld [vmem:[#allocation6 + $0x12] ss:$8 sm:$0x3]  ;;  %s3811_s24 = sld [smem:[#allocation8 + $0x5e]] }
 0x295   : > { %v1075_v44 = vmul.f32 %v4366_v11, %v2504_v33  ;;  %v605_v41 = vadd.f32 %v603_v1, %v593_v51  ;;  %v790_v16 = vadd.f32 %v788_v24, %v778_v55  ;;  %v791_v58 = vadd.f32 %v789_v37, %v779_v30 }
 0x296   : > { %v810_v19 = vrot.slane %v805_v4, %v4367_v40  ;;  %v814_v35 = vrot.slane %v805_v4, %v4368_v49  ;;  %v4369_v13 = vmov %v4366_v11  ;;  %v1072_v26 = vadd.f32 %v1070_v56, %v1066_v48 }
 0x297   : > { %v1076_v32 = vmul.f32 %v4369_v13, %v2506_v36  ;;  %v4370_v21 = vstv %s3550_s29  ;;  %v802_v51 = vadd.f32 %v800_v42, %v790_v16  ;;  %v803_v24 = vadd.f32 %v801_v53, %v791_v58  ;;  %v3791_v37 = vpop.permute.xlu1 %1580  ;;  %v3815_v39 = vpop.permute.xlu0 %1242  ;;  %s3855_s29 = sld [smem:[#allocation8 + $0x5a]] }
 0x298   : > { %v614_v33 = vmul.f32 %v4370_v21, %v612_v14  ;;  %v4371_v9 = vmov %v4370_v21  ;;  %v624_v20 = vrot.slane %v619_v8, %v4367_v40  ;;  %v628_v1 = vrot.slane %v619_v8, %v4368_v49 }
 0x299   : > { %v615_v50 = vmul.f32 %v4371_v9, %v611_v15  ;;  %v4372_v36 = vstv %s3183_s23  ;;  %v996_v30 = vrot.slane %v991_v47, %v4367_v40  ;;  %v1000_v53 = vrot.slane %v991_v47, %v4368_v49  ;;  %s3823_s23 = sld [smem:[#allocation8 + $0x58]] }
 0x29a   : > { %v1081_v4 = vmul.f32 %v4372_v36, %v2625_v17  ;;  %v4373_v56 = vmov %v4372_v36  ;;  %v616_v42 = vadd.f32 %v614_v33, %v604_v0  ;;  %v1077_v17 = vadd.f32 %v1075_v44, %v1071_v54 }
 0x29b   : > { %v1082_v48 = vmul.f32 %v4373_v56, %v2627_v18  ;;  %v617_v55 = vadd.f32 %v615_v50, %v605_v41  ;;  %v4374_v18 = vstv %s3191_s30  ;;  %v1078_v8 = vadd.f32 %v1076_v32, %v1072_v26  ;;  %v3827_v16 = vpop.permute.xlu1 %1244  ;;  %s3835_s30 = sld [smem:[#allocation8 + $0x5f]] }
 0x29c   : > { %v1087_v15 = vmul.f32 %v4374_v18, %v2519_v59  ;;  %v4375_v14 = vmov %v4374_v18  ;;  %v817_v0 = vmul.f32 %v810_v19, %v802_v51  ;;  %v818_v41 = vmul.f32 %v814_v35, %v803_v24  ;;  %v3839_v19 = vpop.permute.xlu0 %1416 }
 0x29d   : > { %v1088_v11 = vmul.f32 %v4375_v14, %v2521_v60  ;;  %v1083_v54 = vadd.f32 %v1081_v4, %v1077_v17  ;;  %v1084_v44 = vadd.f32 %v1082_v48, %v1078_v8  ;;  %v631_v58 = vmul.f32 %v624_v20, %v616_v42  ;;  %v3871_v17 = vld [vmem:[#allocation6 + $0x13] ss:$8 sm:$0x3] }
 0x29e   : > { %v632_v59 = vmul.f32 %v628_v1, %v617_v55  ;;  %v1003_v47 = vmul.f32 %v996_v30, %v3052_v38  ;;  %v1004_v60 = vmul.f32 %v1000_v53, %v3054_v10  ;;  %v1097_v13 = vrot.slane %v1092_v12, %v4367_v40 }
 0x29f   : > { %v1089_v35 = vadd.f32 %v1087_v15, %v1083_v54  ;;  %v1101_v32 = vrot.slane %v1092_v12, %v4368_v49  ;;  %v1090_v38 = vadd.f32 %v1088_v11, %v1084_v44  ;;  %v819_v10 = vadd.f32 %v817_v0, %v631_v58  ;;  %v3847_v21 = vpop.permute.xlu1 %1418 }
 0x2a0   : > { %v820_v26 = vadd.f32 %v818_v41, %v632_v59  ;;  %v1548_v50 = vstv %s3795_s1  ;;  %v1386_v51 = vstv %s3797_s2  ;;  %v3859_v24 = vpop.permute.xlu0 %1590  ;;  %v1560_v36 = vstv %s3807_s6  ;;  %s4108_s1 = scalar_lea.hbm %s4155_s3, %s1917_s8  ;;  %s1693_s2 = scalar_lea.sflag [#allocation4], %s2346_s4 }
 0x2a1   : > { %v1005_v33 = vadd.f32 %v1003_v47, %v819_v10  ;;  %v1104_v20 = vmul.f32 %v1097_v13, %v1089_v35  ;;  %v1105_v1 = vmul.f32 %v1101_v32, %v1090_v38  ;;  %v1398_v4 = vstv %s3809_s21  ;;  %v3895_v13 = vld [vmem:[#allocation6 + $0x14] ss:$8 sm:$0x3]  ;;  %s2082_s6 = scalar_lea.vmem %s4110_s10, 128 }
 0x2a2   : > { %v1006_v9 = vadd.f32 %v1004_v60, %v820_v26  ;;  %v1572_v56 = vstv %s3811_s24  ;;  %v1236_v48 = vstv %s3813_s0  ;;  %v1410_v55 = vstv %s3823_s23  ;;  %p2083_p9 = scmp.ne.s32.totalorder %s4110_s10, %s2082_s6 }
 0x2a3   : > { %v3865_v42 = vpop.permute.xlu1 %1592  ;;  %v1584_v30 = vstv %s3825_s7  ;;  %v1248_v53 = vstv %s3829_s5  ;;  %v1422_v12 = vstv %s3831_s14  ;;  %v1596_v18 = vstv %s3835_s30 }
 0x2a4   : > { %v1260_v15 = vstv %s3837_s12  ;;  %v3875_v14 = vadd.f32 %v1104_v20, %v1005_v33  ;;  %v3877_v11 = vadd.f32 %v1105_v1, %v1006_v9  ;;  %v1546_v8 = vsel %vm1485_vm12, %v3580_v3, %v3607_v31  ;;  %v1255_v41 = vpop.permute.xlu0 %1254  ;;  %p2084_p12 = pnand %p2083_p9, %p2297_p7 }
 0x2a5   : > { %v1547_v0 = vsel %vm1485_vm12, %v3607_v31, %v3580_v3  ;;  %v1434_v54 = vstv %s3841_s13  ;;  %v1272_v59 = vstv %s3849_s15  ;;  %v1283_v47 = vrot.slane %v3871_v17, %v4367_v40 }
 0x2a6   : > { %v1287_v60 = vrot.slane %v3871_v17, %v4368_v49  ;;  %v1446_v35 = vstv %s3851_s28  ;;  %v1384_v32 = vsel %vm1299_vm9, %v3622_v7, %v3646_v2  ;;  %v1385_v3 = vsel %vm1299_vm9, %v3646_v2, %v3622_v7  ;;  %p2085_p10 = pneg %p2084_p12 }
 0x2a7   : > { %v1257_v58 = vpop.permute.xlu1 %1256  ;;  %v1549_v10 = vmul.f32 %v1548_v50, %v1546_v8  ;;  %v1550_v26 = vmul.f32 %v1548_v50, %v1547_v0  ;;  %v1558_v33 = vsel %vm1485_vm12, %v3658_v62, %v3676_v57  ;;  %v1559_v9 = vsel %vm1485_vm12, %v3676_v57, %v3658_v62 }
 0x2a8   : > { %v1234_v20 = vsel %vm1113_vm8, %v3226_v25, %v3748_v22  ;;  %v1235_v7 = vsel %vm1113_vm8, %v3748_v22, %v3226_v25  ;;  %v3923_v2 = vpop.permute.xlu0 %1428  ;;  %v1387_v8 = vmul.f32 %v1386_v51, %v1384_v32  ;;  %v1388_v62 = vmul.f32 %v1386_v51, %v1385_v3 }
 0x2a9   : > { %v1396_v57 = vsel %vm1299_vm9, %v3686_v34, %v3706_v27  ;;  %v1397_v25 = vsel %vm1299_vm9, %v3706_v27, %v3686_v34  ;;  %v1561_v0 = vmul.f32 %v1560_v36, %v1558_v33  ;;  %v1562_v31 = vmul.f32 %v1560_v36, %v1559_v9 }
 0x2aa   : > { %v1246_v1 = vsel %vm1113_vm8, %v3815_v39, %v3827_v16  ;;  %v1247_v51 = vsel %vm1113_vm8, %v3827_v16, %v3815_v39  ;;  %v1551_v32 = vadd.f32 %v1549_v10, %v3564_v23  ;;  %v1552_v3 = vadd.f32 %v1550_v26, %v3566_v29 }
 0x2ab   : > { %v1431_v22 = vpop.permute.xlu1 %1430  ;;  %v1237_v50 = vmul.f32 %v1236_v48, %v1234_v20  ;;  %v1238_v38 = vmul.f32 %v1236_v48, %v1235_v7  ;;  %v1399_v34 = vmul.f32 %v1398_v4, %v1396_v57  ;;  %v1400_v27 = vmul.f32 %v1398_v4, %v1397_v25 }
 0x2ac   : > { %v1258_v36 = vsel %vm1113_vm8, %v1255_v41, %v1257_v58  ;;  %v1259_v33 = vsel %vm1113_vm8, %v1257_v58, %v1255_v41  ;;  %v3951_v9 = vpop.permute.xlu0 %1602  ;;  %v1389_v44 = vadd.f32 %v1387_v8, %v3603_v63  ;;  %v1390_v39 = vadd.f32 %v1388_v62, %v3605_v46 }
 0x2ad   : > { %v1249_v16 = vmul.f32 %v1248_v53, %v1246_v1  ;;  %v1250_v23 = vmul.f32 %v1248_v53, %v1247_v51  ;;  %v1563_v48 = vadd.f32 %v1561_v0, %v1551_v32  ;;  %v1564_v10 = vadd.f32 %v1562_v31, %v1552_v3  ;;  %v4376_v31 = vld [vmem:[#allocation41_spill] sm:$0xff] }
 0x2ae   : > { %v1408_v4 = vsel %vm1299_vm9, %v3758_v5, %v3765_v6  ;;  %v1409_v41 = vsel %vm1299_vm9, %v3765_v6, %v3758_v5  ;;  %v1239_v63 = vadd.f32 %v1237_v50, %v3230_v45  ;;  %v1240_v46 = vadd.f32 %v1238_v38, %v3232_v28 }
 0x2af   : > { %v1605_v29 = vpop.permute.xlu1 %1604  ;;  %v1261_v58 = vmul.f32 %v1260_v15, %v1258_v36  ;;  %v1262_v53 = vmul.f32 %v1260_v15, %v1259_v33  ;;  %v1401_v26 = vadd.f32 %v1399_v34, %v1389_v44  ;;  %v1402_v20 = vadd.f32 %v1400_v27, %v1390_v39 }
 0x2b0   : > { %v1570_v7 = vsel %vm1485_vm12, %v4376_v31, %v3738_v52  ;;  %v1571_v5 = vsel %vm1485_vm12, %v3738_v52, %v4376_v31  ;;  %v1267_v45 = vpop.permute.xlu0 %1266  ;;  %v1411_v28 = vmul.f32 %v1410_v55, %v1408_v4  ;;  %v1412_v6 = vmul.f32 %v1410_v55, %v1409_v41 }
 0x2b1   : > { %v1251_v15 = vadd.f32 %v1249_v16, %v1239_v63  ;;  %v1252_v44 = vadd.f32 %v1250_v23, %v1240_v46  ;;  %v1582_v50 = vsel %vm1485_vm12, %v3782_v61, %v3791_v37  ;;  %v1583_v1 = vsel %vm1485_vm12, %v3791_v37, %v3782_v61 }
 0x2b2   : > { %v1573_v0 = vmul.f32 %v1572_v56, %v1570_v7  ;;  %v1574_v61 = vmul.f32 %v1572_v56, %v1571_v5  ;;  %v1420_v37 = vsel %vm1299_vm9, %v3839_v19, %v3847_v21  ;;  %v1421_v51 = vsel %vm1299_vm9, %v3847_v21, %v3839_v19 }
 0x2b3   : > { %v1269_v38 = vpop.permute.xlu1 %1268  ;;  %v1263_v8 = vadd.f32 %v1261_v58, %v1251_v15  ;;  %v1264_v62 = vadd.f32 %v1262_v53, %v1252_v44  ;;  %v1413_v3 = vadd.f32 %v1411_v28, %v1401_v26  ;;  %v1414_v34 = vadd.f32 %v1412_v6, %v1402_v20 }
 0x2b4   : > { %v1270_v52 = vsel %vm1113_vm8, %v1267_v45, %v1269_v38  ;;  %v1271_v55 = vsel %vm1113_vm8, %v1269_v38, %v1267_v45  ;;  %v1441_v32 = vpop.permute.xlu0 %1440  ;;  %v1585_v56 = vmul.f32 %v1584_v30, %v1582_v50  ;;  %v1586_v33 = vmul.f32 %v1584_v30, %v1583_v1 }
 0x2b5   : > { %v1273_v57 = vmul.f32 %v1272_v59, %v1270_v52  ;;  %v1274_v25 = vmul.f32 %v1272_v59, %v1271_v55  ;;  %v1432_v39 = vsel %vm1299_vm9, %v3923_v2, %v1431_v22  ;;  %v1433_v19 = vsel %vm1299_vm9, %v1431_v22, %v3923_v2 }
 0x2b6   : > { %v1423_v21 = vmul.f32 %v1422_v12, %v1420_v37  ;;  %v1424_v16 = vmul.f32 %v1422_v12, %v1421_v51  ;;  %v1594_v4 = vsel %vm1485_vm12, %v3859_v24, %v3865_v42  ;;  %v1595_v2 = vsel %vm1485_vm12, %v3865_v42, %v3859_v24 }
 0x2b7   : > { %v1275_v27 = vadd.f32 %v1273_v57, %v1263_v8  ;;  %v1276_v59 = vadd.f32 %v1274_v25, %v1264_v62  ;;  %v1443_v36 = vpop.permute.xlu1 %1442  ;;  %v1436_v22 = vmul.f32 %v1434_v54, %v1433_v19  ;;  %v1575_v63 = vadd.f32 %v1573_v0, %v1563_v48 }
 0x2b8   : > { %v1444_v12 = vsel %vm1299_vm9, %v1441_v32, %v1443_v36  ;;  %v1615_v17 = vpop.permute.xlu0 %1614  ;;  %v1576_v46 = vadd.f32 %v1574_v61, %v1564_v10  ;;  %v1606_v58 = vsel %vm1485_vm12, %v3951_v9, %v1605_v29  ;;  %v1607_v53 = vsel %vm1485_vm12, %v1605_v29, %v3951_v9 }
 0x2b9   : > { %v1290_v23 = vmul.f32 %v1283_v47, %v1275_v27  ;;  %v1291_v30 = vmul.f32 %v1287_v60, %v1276_v59  ;;  %v1445_v47 = vsel %vm1299_vm9, %v1443_v36, %v1441_v32  ;;  %v1435_v60 = vmul.f32 %v1434_v54, %v1432_v39 }
 0x2ba   : > { %v1425_v26 = vadd.f32 %v1423_v21, %v1413_v3  ;;  %v1426_v20 = vadd.f32 %v1424_v16, %v1414_v34  ;;  %v1447_v54 = vmul.f32 %v1446_v35, %v1444_v12  ;;  %v1588_v31 = vadd.f32 %v1586_v33, %v1576_v46 }
 0x2bb   : > { %v1292_v41 = vadd.f32 %v1290_v23, %v3875_v14  ;;  %v1293_v24 = vadd.f32 %v1291_v30, %v3877_v11  ;;  %v1617_v42 = vpop.permute.xlu1 %1616  ;;  %v1448_v14 = vmul.f32 %v1446_v35, %v1445_v47  ;;  %v1587_v11 = vadd.f32 %v1585_v56, %v1575_v63 }
 0x2bc   : > { %v1597_v48 = vmul.f32 %v1596_v18, %v1594_v4  ;;  %v1598_v10 = vmul.f32 %v1596_v18, %v1595_v2  ;;  %v1453_v7 = vpop.permute.xlu0 %1452  ;;  %v1437_v5 = vadd.f32 %v1435_v60, %v1425_v26  ;;  %v1438_v9 = vadd.f32 %v1436_v22, %v1426_v20  ;;  %v1650_v2 = vld [vmem:[#allocation6 + $0x15] ss:$8 sm:$0x3] }
 0x2bd   : > { %v4377_v29 = vstv %s3843_s19  ;;  %v1618_v15 = vsel %vm1485_vm12, %v1615_v17, %v1617_v42  ;;  %v1619_v44 = vsel %vm1485_vm12, %v1617_v42, %v1615_v17  ;;  %v4379_v52 = vstv %s3855_s29 }
 0x2be   : > { %v1609_v45 = vmul.f32 %v4377_v29, %v1606_v58  ;;  %v4378_v28 = vmov %v4377_v29  ;;  %v1449_v50 = vadd.f32 %v1447_v54, %v1437_v5  ;;  %v1450_v1 = vadd.f32 %v1448_v14, %v1438_v9 }
 0x2bf   : > { %v1610_v35 = vmul.f32 %v4378_v28, %v1607_v53  ;;  %v1455_v6 = vpop.permute.xlu1 %1454  ;;  %v4380_v8 = vmov %v4379_v52  ;;  %v1599_v57 = vadd.f32 %v1597_v48, %v1587_v11  ;;  %v1600_v25 = vadd.f32 %v1598_v10, %v1588_v31 }
 0x2c0   : > { %v1456_v18 = vsel %vm1299_vm9, %v1453_v7, %v1455_v6  ;;  %v1457_v38 = vsel %vm1299_vm9, %v1455_v6, %v1453_v7  ;;  %v1627_v0 = vpop.permute.xlu0 %1626  ;;  %v1632_v61 = vstv %s4037_s25  ;;  %v4381_v37 = vstv %s3853_s22 }
 0x2c1   : > { %v1459_v55 = vmul.f32 %v4379_v52, %v1456_v18  ;;  %v1460_v62 = vmul.f32 %v4380_v8, %v1457_v38  ;;  %v1621_v51 = vmul.f32 %v4381_v37, %v1618_v15  ;;  %v4382_v32 = vmov %v4381_v37 }
 0x2c2   : > { %v1622_v3 = vmul.f32 %v4382_v32, %v1619_v44  ;;  %v1611_v36 = vadd.f32 %v1609_v45, %v1599_v57  ;;  %v1612_v56 = vadd.f32 %v1610_v35, %v1600_v25  ;;  %v4383_v19 = vrot.slane %v3895_v13, %v4367_v40  ;;  %v2008_v44 = vld [vmem:[%s2352_s11] sm:$0xff]  ;;  %s2086_s11 = sshll.u32 %s2175_s16, 4  ;;  %s2087_s11 = int_to_ptr.vmem [resolvable:$false] %s2086_s11 }
 0x2c3   : > { %v1461_v34 = vadd.f32 %v1459_v55, %v1449_v50  ;;  %v1462_v27 = vadd.f32 %v1460_v62, %v1450_v1  ;;  %v1629_v59 = vpop.permute.xlu1 %1628  ;;  %v4384_v16 = vrot.slane %v3895_v13, %v4368_v49  ;;  %v1644_v47 = vstv %s4059_s20  ;;  %s2088_s21 = scalar_lea.vmem %s2087_s11, 256  ;;  %p2089_p1 = scmp.lt.s32.totalorder %s4110_s10, %s2087_s11 }
 0x2c4   : > { %v1630_v33 = vsel %vm1485_vm12, %v1627_v0, %v1629_v59  ;;  %v1631_v39 = vsel %vm1485_vm12, %v1629_v59, %v1627_v0  ;;  %v1639_v12 = vpop.permute.xlu0 %1638  ;;  %v1623_v17 = vadd.f32 %v1621_v51, %v1611_v36  ;;  %v1624_v60 = vadd.f32 %v1622_v3, %v1612_v56  ;;  %p2090_p6 = scmp.lt.s32.totalorder %s2088_s21, %s2082_s6 }
 0x2c5   : > { %v1476_v21 = vmul.f32 %v4383_v19, %v1461_v34  ;;  %v1477_v23 = vmul.f32 %v4384_v16, %v1462_v27  ;;  %v1633_v30 = vmul.f32 %v1632_v61, %v1630_v33  ;;  %v1634_v4 = vmul.f32 %v1632_v61, %v1631_v39 }
 0x2c6   : > { %v1655_v46 = vrot.slane %v1650_v2, %v4367_v40  ;;  %v1659_v58 = vrot.slane %v1650_v2, %v4368_v49  ;;  %p2091_p8 = por %p2090_p6, %p2089_p1 }
 0x2c7   : > { %v1478_v22 = vadd.f32 %v1476_v21, %v1292_v41  ;;  %v1479_v42 = vadd.f32 %v1477_v23, %v1293_v24  ;;  %v1641_v63 = vpop.permute.xlu1 %1640  ;;  %v1635_v26 = vadd.f32 %v1633_v30, %v1623_v17  ;;  %v1636_v20 = vadd.f32 %v1634_v4, %v1624_v60 }
 0x2c8   : > { %v1642_v53 = vsel %vm1485_vm12, %v1639_v12, %v1641_v63  ;;  %v1643_v13 = vsel %vm1485_vm12, %v1641_v63, %v1639_v12  ;;  %p2092_p13 = pnand %p2091_p8, %p2085_p10 }
 0x2c9   : > { %v1645_v54 = vmul.f32 %v1644_v47, %v1642_v53  ;;  %v1646_v14 = vmul.f32 %v1644_v47, %v1643_v13 }
 0x2cb   : > { %v1647_v11 = vadd.f32 %v1645_v54, %v1635_v26  ;;  %v1648_v31 = vadd.f32 %v1646_v14, %v1636_v20 }
 0x2cd   : > { %v1662_v48 = vmul.f32 %v1655_v46, %v1647_v11  ;;  %v1663_v41 = vmul.f32 %v1659_v58, %v1648_v31 }
 0x2cf   : > { %v1664_v24 = vadd.f32 %v1662_v48, %v1478_v22  ;;  %v1665_v10 = vadd.f32 %v1663_v41, %v1479_v42 }
 0x2d1   : > { %v1909_v7 = vmul.f32 -1.442695, %v1664_v24  ;;  %v1910_v49 = vmul.f32 -1.442695, %v1665_v10 }
 0x2d3   : > { %2000 = vpow2.f32 %v1909_v7 }
 0x2d4   : > { %2002 = vpow2.f32 %v1910_v49 }
 0x2dd   : > { %v2001_v5 = vpop.eup %2000 }
 0x2de   : > { %v2003_v43 = vpop.eup %2002  ;;  %v1672_v9 = vadd.f32 1.0, %v2001_v5 }
 0x2df   : > { %v1673_v29 = vadd.f32 1.0, %v2003_v43 }
 0x2e0   : > { %2004 = vrcp.f32 %v1672_v9 }
 0x2e1   : > { %2006 = vrcp.f32 %v1673_v29 }
 0x2ea   : > { %v2005_v45 = vpop.eup %2004 }
 0x2eb   : > { %v2007_v28 = vpop.eup %2006  ;;  %v1681_v35 = vrot.slane %v2005_v45, %v4367_v40 }
 0x2ec   : > { %v1685_v6 = vrot.slane %v2007_v28, %v4367_v40 }
 0x2ee   : > { %v1688_v15 = vcombine.low %v1681_v35, %v1685_v6 }
 0x2f0   : > { %v1690_v18 = vmul.f32 %v2008_v44, %v1688_v15 }
 0x2f2   : > { %1691 = vst [vmem:[%s215_s9] sm:$0xff] %v1690_v18 }
 0x2f3   : > { %2095 = shalt.err (!%p2092_p13)
}
 0x2f4   : > { %s2096_s4 = scalar_lea.hbm %s4108_s1, 128  ;;  %s2100_s23 = scalar_lea.hbm %s4155_s3, 256 }
 0x2f5   : > { %p2097_p4 = scmp.ne.s32.totalorder %s4108_s1, %s2096_s4  ;;  %p2101_p0 = scmp.lt.u32.totalorder %s4108_s1, %s4155_s3 }
 0x2f6   : > { %p2102_p3 = scmp.lt.u32.totalorder %s2100_s23, %s2096_s4  ;;  %p2104_p9 = scmp.lt.u32.totalorder %s2096_s4, %s4108_s1 }
 0x2f7   : > { %p2098_p2 = pnand %p2097_p4, %p2297_p7 }
 0x2f8   : > { %p2103_p5 = por %p2102_p3, %p2101_p0 }
 0x2f9   : > { %p2099_p11 = pneg %p2098_p2 }
 0x2fa   : > { %p2105_p12 = por %p2104_p9, %p2103_p5 }
 0x2fc   : > { %p2106_p10 = pnand %p2105_p12, %p2099_p11 }
 0x2fe   : > { %2109 = shalt.err (!%p2106_p10)
}
 0x2ff   : > { %1928 = dma.vmem_to_hbm [thread:$0]  (%p2297_p7), %s4110_s10, 128, %s4108_s1, %s1693_s2  }
 0x300 PF: > { %s4386_s14 = sld [smem:[#allocation14_spill]]  ;;  %s4387_s30 = sld [smem:[#allocation18_spill]] }
 0x301   : > { %s4388_s12 = sld [smem:[#allocation17_spill]] }
 0x306   : > { %s1719_s13 = sand.u32 1, %s4386_s14   ;;  %p4389_p1 = scmp.ne.s32.totalorder %s4387_s30, 0 }
 0x307   : > { %p4390_p6 = scmp.ge.s32.totalorder %s4388_s12, 2  ;;  %s1720_s19 = scalar_lea.sflag [#allocation4], %s1719_s13 }
 0x309   : > { %p1942_p8 = pnand %p4390_p6, %p4389_p1 }
 0x30b   : > { %2139 = dma.done.wait (!%p1942_p8), %s1720_s19, 128  }
 0x30c   : > { %2141 = vsyncadd (!%p1942_p8), %s1720_s19, 4294967168  ;;  %s4391_s15 = sld [smem:[#allocation19_spill]]  ;;  %s4392_s12 = sld [smem:[#allocation15_spill]] }
 0x30d   : > { %s4393_s13 = sld [smem:[#allocation16_spill]]  ;;  %s4394_s14 = sld [smem:[#allocation20_spill]] }
 0x312   : > { %p18_p13 = scmp.ge.s32.totalorder %s4391_s15, 4  }
 0x314   :  { %20 = sbr.rel (!%p18_p13) target bundleno = 11 (0xb), region = 99 }
 0x31b   :  { %1725 = vsyncpa [#allocation3], 1 }
 0x31c   :  { %1727 = vsyncpa [#allocation3 + $0x1], 1 }
 0x31d   :  { %1728 = vsyncpa [#allocation7], 1 }
 0x31e   :  { %1729 = vsyncpa [#allocation4], 1 }
 0x31f   :  { %1731 = vsyncpa [#allocation4 + $0x1], 1 }
 0x320   :  { %1732 = vsyncpa [#allocation5], 1 }
 0x321   :  { %1734 = vsyncpa [#allocation5 + $0x1], 1 }

</bundles_post_ra>
